<compile_context>
chip_gen: v7x
topology: tpu7x:2x2x1
jax: 0.10.0
libtpu: 0.0.40
codegen_flags: <defaults>
</compile_context>

<pallas_src>
import math
from functools import partial

import numpy as np
import jax
import jax.numpy as jnp
from jax.experimental import pallas as pl
from jax.experimental.pallas import tpu as pltpu
from jax.scipy.linalg import block_diag

# ----------------------------- configuration (small shapes) -----------------------------
N_NODES = 16          # nodes in the mini-batch
N_EDGES = 32          # edges
NUM_FEATS = 3         # meta-path channels C
IN_DIM = 32
HID_DIM = 32
NUM_CLASSES = 8
NUM_HEADS = 2
NUM_LABEL_FEATS = 2

PRELU_ALPHA = 0.25                    # nn.PReLU() default init
BN_SCALE = (1.0 + 1e-5) ** -0.5       # eval BatchNorm1d with default running stats
GAMMA_HSA = 0.0                       # HeteroSelfAttention.gamma init
GAMMA_GAT = 0.0                       # MyGAT.gamma init
BETA_GAT = 1.0                        # MyGAT.beta init
LN_EPS = 1e-5


# ----------------------------- fused Pallas kernel -----------------------------

def mygat_fused_kernel(
    # runtime scalars + graph data
    scal_ref, xfeat_ref, tgt_ref, label_ref, sd_ref, dt_ref, invdeg_ref,
    # feat_layers (block-diagonal MultiChannelProj + flattened LayerNorm affine) x2
    w1_ref, b1_ref, g1_ref, bb1_ref,
    w2_ref, b2_ref, g2_ref, bb2_ref,
    # HeteroSelfAttention fused head-major QKV + lane expansion constants
    hqkv_w_ref, hqkv_b_ref, eq_ref, ek_ref, rd_ref, ep_ref, ev_ref,
    # merge_channels + residual
    wm_ref, bm_ref, wr_ref,
    # MyGAT edge attention (fused K|Q), V, per-head reduction constant
    gkq_w_ref, gkq_b_ref, gv_w_ref, gv_b_ref, hr_ref,
    # output_layers
    ow1_ref, ow2_ref,
    # label_residual (label weights folded into lw1f)
    lw1f_ref, lw2_ref, lw3_ref, lw4_ref, lb4_ref,
    # output
    o_ref,
    *, num_channels, bn_scale, ln_eps):
    f32 = jnp.float32
    C = num_channels

    # runtime parameters (kept as operands so the attention paths are not DCE'd).
    gamma_hsa = scal_ref[0, 0]
    gamma_gat = scal_ref[0, 1]
    beta = scal_ref[0, 2]
    alpha = scal_ref[0, 3]

    def prelu(v):
        return jnp.where(v >= 0, v, alpha * v)

    def leaky(v, s):
        return jnp.where(v >= 0, v, s * v)

    def mm(a, b):
        return jnp.dot(a, b, preferred_element_type=f32)

    # ---- feat_layers: (MultiChannelProj -> LayerNorm([C, D]) -> PReLU) x2, lane-dense ----
    def mcp_ln(x, w_ref, b_ref, g_ref, bb_ref):
        y = mm(x, w_ref[...]) + b_ref[...]                       # (T, C*D), one wide matmul
        mu = jnp.mean(y, axis=-1, keepdims=True)                 # LN jointly over (C, D)
        d = y - mu
        var = jnp.mean(d * d, axis=-1, keepdims=True)
        yn = d * jax.lax.rsqrt(var + ln_eps) * g_ref[...] + bb_ref[...]
        return prelu(yn)

    x = mcp_ln(xfeat_ref[...], w1_ref, b1_ref, g1_ref, bb1_ref)
    x = mcp_ln(x, w2_ref, b2_ref, g2_ref, bb2_ref)               # (T, C*D)
    CD = x.shape[1]                                              # C*D (= 96)

    # ---- HeteroSelfAttention over the channel axis (all 2-D, lane-dense) ----
    # qkv lanes: [q (head-major h,c,d) | k (head-major) | v (head-major h,c,j)]
    qkv = mm(x, hqkv_w_ref[...]) + hqkv_b_ref[...]               # (T, 2*QW + VW)
    QW = eq_ref.shape[0]
    q = qkv[:, :QW]
    k = qkv[:, QW:2 * QW]
    v = qkv[:, 2 * QW:]
    # scores s[t, (n,h,m)] = leaky( (q[h,m,:]·k[h,n,:]) / sqrt(dq), 0.2 )
    # (1/sqrt(dq) is folded into rd on the host)
    qe = mm(q, eq_ref[...])                                      # (T, SW) expand (h,m,d)->(n,h,m,d)
    ke = mm(k, ek_ref[...])                                      # (T, SW) expand (h,n,d)->(n,h,m,d)
    s = leaky(mm(qe * ke, rd_ref[...]), 0.2)                     # (T, C*H*C), n-major
    # per-(h,m) softmax over n: n-groups are contiguous GW-wide slices -> exact group max/sum
    GW = s.shape[1] // C
    chunks = [s[:, n * GW:(n + 1) * GW] for n in range(C)]
    gm = chunks[0]
    for n in range(1, C):
        gm = jnp.maximum(gm, chunks[n])
    es = [jnp.exp(c - gm) for c in chunks]
    den = es[0]
    for n in range(1, C):
        den = den + es[n]
    inv = 1.0 / den
    p = jnp.concatenate([e * inv for e in es], axis=1)           # (T, C*H*C), n-major
    # att[t, m*D + h*dv + j] = sum_n p[t,(n,h,m)] * v[t,(h,n,j)]
    prod = mm(p, ep_ref[...]) * mm(v, ev_ref[...])               # (T, C*CD), (n, m, h, j) order
    att = prod[:, :CD]
    for n in range(1, C):
        att = att + prod[:, n * CD:(n + 1) * CD]                 # reduce over n
    x = gamma_hsa * att + x                                      # residual, gamma scaling

    # ---- merge_channels + residual, MyGAT.activation (PReLU) ----
    xact = prelu(mm(x, wm_ref[...]) + bm_ref[...] + mm(tgt_ref[...], wr_ref[...]))  # (N, D)

    # ---- MyGAT edge attention: stacked gather, fused K|Q, segment softmax, spmm-mean ----
    SD = sd_ref[...]                                             # (2E, N): [src one-hot; dst one-hot]
    E = SD.shape[0] // 2
    xsd = mm(SD, xact)                                           # rows [0:E)=x[src], [E:2E)=x[dst]
    kq = mm(xsd, gkq_w_ref[...]) + gkq_b_ref[...]                # (2E, 2*Dg)
    Dg = gkq_w_ref.shape[1] // 2
    ke2 = kq[:E, :Dg]                                            # K(x[src])   (E, Dg)
    qe2 = kq[E:, Dg:]                                            # Q(x[dst])   (E, Dg)
    # per-head sums via constant (Dg, H) matrix; 1/sqrt(dh) folded into hr
    sh = leaky(mm(ke2 * qe2, hr_ref[...]), 0.01)                 # (E, H)
    scores = jnp.sum(sh, axis=-1, keepdims=True)                 # sum over heads (E, 1)
    # segment softmax over destination nodes (global shift; softmax is shift-invariant)
    ex = jnp.exp(scores - jnp.max(scores))                       # (E, 1)
    DTm = dt_ref[...]                                            # (N, E)
    denom = mm(DTm, ex)                                          # per-dst sum      (N, 1)
    denom_e = mm(SD[E:, :], denom)                               # gather to edges  (E, 1)
    w_edge = ex / (denom_e + 1e-16)
    # SparseTensor(row=dst, col=src).matmul(v, reduce='mean')
    ve = mm(SD[:E, :], mm(xact, gv_w_ref[...]) + gv_b_ref[...])  # v[src]  (E, D)
    agg = mm(DTm, w_edge * ve) * invdeg_ref[...]                 # mean over incoming edges (N, D)
    x2 = gamma_gat * agg + xact

    # ---- output_layers + label_residual + beta mix ----
    h1 = prelu(mm(x2, ow1_ref[...]) * bn_scale)
    y_out = mm(h1, ow2_ref[...]) * bn_scale                      # (N, num_classes)
    z = prelu(mm(label_ref[...], lw1f_ref[...]) * bn_scale)      # label weights folded into lw1f
    z = prelu(mm(z, lw2_ref[...]) * bn_scale)
    z = prelu(mm(z, lw3_ref[...]) * bn_scale)
    z = mm(z, lw4_ref[...]) + lb4_ref[...]
    o_ref[...] = beta * y_out + z


# ----------------------------- pallas_call wrapper -----------------------------

def mygat_forward_pallas(packed, scal, feats_flat, tgt_feat, label_flat, SD, DT, inv_deg):
    N = feats_flat.shape[0]
    kernel = partial(
        mygat_fused_kernel,
        num_channels=NUM_FEATS, bn_scale=BN_SCALE, ln_eps=LN_EPS)
    args = (scal, feats_flat, tgt_feat, label_flat, SD, DT, inv_deg,
            packed['w1'], packed['b1'], packed['g1'], packed['bb1'],
            packed['w2'], packed['b2'], packed['g2'], packed['bb2'],
            packed['hqkv_w'], packed['hqkv_b'],
            packed['eq'], packed['ek'], packed['rd'], packed['ep'], packed['ev'],
            packed['wm'], packed['bm'], packed['wr'],
            packed['gkq_w'], packed['gkq_b'], packed['gv_w'], packed['gv_b'], packed['hr'],
            packed['ow1'], packed['ow2'],
            packed['lw1f'], packed['lw2'], packed['lw3'], packed['lw4'], packed['lb4'])
    # Single invocation: total live data is well under 1 MiB, so every operand and every
    # intermediate stays VMEM/vreg-resident (no grid, no HBM round trips between stages).
    return pl.pallas_call(
        kernel,
        out_shape=jax.ShapeDtypeStruct((N, NUM_CLASSES), jnp.float32),
        in_specs=[pl.BlockSpec(memory_space=pltpu.MemorySpace.VMEM)] * len(args),
        out_specs=pl.BlockSpec(memory_space=pltpu.MemorySpace.VMEM),
    )(*args)


# ----------------------------- host-side weight / constant packing (trace-time) -----------------------------

def _head_major_block(w, b, channels, num_heads):
    """Per-channel (Din, Dout) projection -> block-diagonal (C*Din, C*Dout) weight whose
    output lanes are ordered head-major across channels: lane = h*(C*dh) + c*dh + d."""
    dout = w.shape[1]
    dh = dout // num_heads
    wb = block_diag(*([w] * channels))                           # channel-major columns
    bb = jnp.tile(b.reshape(1, dout), (1, channels))
    perm = np.array([c * dout + h * dh + d
                     for h in range(num_heads)
                     for c in range(channels)
                     for d in range(dh)], dtype=np.int32)
    return wb[:, perm], bb[:, perm]


def _hsa_lane_constants(C, H, dq, dv):
    """0/1 lane expansion / reduction matrices so HeteroSelfAttention is pure 2-D matmuls.
    q/k lanes (h,m,d)=h*C*dq+m*dq+d ; v lanes (h,c,j)=h*C*dv+c*dv+j ;
    expanded score lane (n,h,m,d) ; pair lane (n,h,m)=n*H*C+h*C+m ;
    expanded output lane (n,m,h,j)=n*(C*D)+m*D+h*dv+j with D=H*dv."""
    D = H * dv
    QW, SW, PW = H * C * dq, C * H * C * dq, C * H * C
    VW, OW = H * C * dv, C * C * D
    EQ = np.zeros((QW, SW), np.float32)
    EK = np.zeros((QW, SW), np.float32)
    RD = np.zeros((SW, PW), np.float32)
    for h in range(H):
        for m in range(C):
            for n in range(C):
                for d in range(dq):
                    s_idx = n * (H * C * dq) + h * (C * dq) + m * dq + d
                    EQ[h * C * dq + m * dq + d, s_idx] = 1.0
                    EK[h * C * dq + n * dq + d, s_idx] = 1.0
                    RD[s_idx, n * (H * C) + h * C + m] = 1.0
    RD *= 1.0 / math.sqrt(dq)                                    # fold the QK scale
    EP = np.zeros((PW, OW), np.float32)
    EV = np.zeros((VW, OW), np.float32)
    for h in range(H):
        for m in range(C):
            for n in range(C):
                for j in range(dv):
                    o_idx = n * (C * D) + m * D + h * dv + j
                    EP[n * (H * C) + h * C + m, o_idx] = 1.0
                    EV[h * (C * dv) + n * dv + j, o_idx] = 1.0
    return (jnp.asarray(EQ), jnp.asarray(EK), jnp.asarray(RD),
            jnp.asarray(EP), jnp.asarray(EV))


def _gat_head_constant(H, dh):
    """(H*dh, H) block-ones matrix: per-head sums of K*Q, with 1/sqrt(dh) folded in."""
    HR = np.zeros((H * dh, H), np.float32)
    for h in range(H):
        for d in range(dh):
            HR[h * dh + d, h] = 1.0
    return jnp.asarray(HR / math.sqrt(dh))


def pack_params(p):
    C, H = NUM_FEATS, NUM_HEADS
    dq = (HID_DIM // 8) // H
    dv = HID_DIM // H
    dh = (HID_DIM // 4) // H
    wq, bq = _head_major_block(p['hq_w'], p['hq_b'], C, H)
    wk, bk = _head_major_block(p['hk_w'], p['hk_b'], C, H)
    wv, bv = _head_major_block(p['hv_w'], p['hv_b'], C, H)
    eq, ek, rd, ep, ev = _hsa_lane_constants(C, H, dq, dv)
    lwt = 1.0 / NUM_LABEL_FEATS                                  # label_weights init value
    return {
        'w1': block_diag(*[p['w1'][c] for c in range(C)]),
        'b1': p['b1'].reshape(1, -1), 'g1': p['g1'].reshape(1, -1), 'bb1': p['bb1'].reshape(1, -1),
        'w2': block_diag(*[p['w2'][c] for c in range(C)]),
        'b2': p['b2'].reshape(1, -1), 'g2': p['g2'].reshape(1, -1), 'bb2': p['bb2'].reshape(1, -1),
        'hqkv_w': jnp.concatenate([wq, wk, wv], axis=1),         # (C*D, C*(2*Dqk + D))
        'hqkv_b': jnp.concatenate([bq, bk, bv], axis=1),
        'eq': eq, 'ek': ek, 'rd': rd, 'ep': ep, 'ev': ev,
        'wm': p['wm'], 'bm': p['bm'], 'wr': p['wr'],
        'gkq_w': jnp.concatenate([p['gk_w'], p['gq_w']], axis=1),
        'gkq_b': jnp.concatenate([p['gk_b'], p['gq_b']], axis=1),
        'gv_w': p['gv_w'], 'gv_b': p['gv_b'], 'hr': _gat_head_constant(H, dh),
        'ow1': p['ow1'], 'ow2': p['ow2'],
        'lw1f': jnp.concatenate([lwt * p['lw1']] * NUM_LABEL_FEATS, axis=0),
        'lw2': p['lw2'], 'lw3': p['lw3'], 'lw4': p['lw4'], 'lb4': p['lb4'],
    }


# ----------------------------- pure-JAX reference (for verification) -----------------------------

def reference_forward(p, batch_feats, feat_keys, tgt_type, batch_label_feats, label_keys, edge_index):
    def prelu(v):
        return jnp.where(v >= 0, v, PRELU_ALPHA * v)

    def leaky(v, s):
        return jnp.where(v >= 0, v, s * v)

    def layernorm(y, g, b):
        mu = jnp.mean(y, axis=(-2, -1), keepdims=True)
        var = jnp.mean((y - mu) ** 2, axis=(-2, -1), keepdims=True)
        return (y - mu) / jnp.sqrt(var + LN_EPS) * g + b

    x = jnp.stack([batch_feats[k] for k in feat_keys], axis=1)
    tgt = batch_feats[tgt_type]
    y = jnp.einsum('bcn,cnm->bcm', x, p['w1']) + p['b1']
    y = prelu(layernorm(y, p['g1'], p['bb1']))
    y = jnp.einsum('bcn,cnm->bcm', y, p['w2']) + p['b2']
    y = prelu(layernorm(y, p['g2'], p['bb2']))
    B, M, Cd = y.shape
    H = NUM_HEADS
    q = (y @ p['hq_w'] + p['hq_b']).reshape(B, M, H, -1).transpose(0, 2, 1, 3)
    k = (y @ p['hk_w'] + p['hk_b']).reshape(B, M, H, -1).transpose(0, 2, 3, 1)
    v = (y @ p['hv_w'] + p['hv_b']).reshape(B, M, H, -1).transpose(0, 2, 1, 3)
    att = leaky(jnp.matmul(q, k) / math.sqrt(q.shape[-1]), 0.2)
    beta_att = jax.nn.softmax(att, axis=-1)
    out = GAMMA_HSA * jnp.matmul(beta_att, v)
    y = out.transpose(0, 2, 1, 3).reshape(B, M, Cd) + y
    feat = y.reshape(B, -1) @ p['wm'] + p['bm'] + tgt @ p['wr']
    xact = prelu(feat)
    src, dst = edge_index[0], edge_index[1]
    kk = xact[src] @ p['gk_w'] + p['gk_b']
    qq = xact[dst] @ p['gq_w'] + p['gq_b']
    vv = xact @ p['gv_w'] + p['gv_b']
    dh = kk.shape[-1] // H
    kk = kk.reshape(-1, H, dh)
    qq = qq.reshape(-1, H, dh)
    scores = leaky(jnp.sum(kk * qq, axis=-1) / math.sqrt(dh), 0.01)
    scores = jnp.sum(scores, axis=1)
    n_out = N_NODES
    smax = jax.ops.segment_max(scores, dst, num_segments=n_out)
    e = jnp.exp(scores - smax[dst])
    denom = jax.ops.segment_sum(e, dst, num_segments=n_out)
    w = e / (denom[dst] + 1e-16)
    num = jax.ops.segment_sum(w[:, None] * vv[src], dst, num_segments=n_out)
    deg = jax.ops.segment_sum(jnp.ones_like(w), dst, num_segments=n_out)
    agg = num / jnp.maximum(deg, 1.0)[:, None]
    x2 = GAMMA_GAT * agg + xact[:n_out]
    h = prelu((x2 @ p['ow1']) * BN_SCALE)
    yo = (h @ p['ow2']) * BN_SCALE
    le = sum((1.0 / NUM_LABEL_FEATS) * batch_label_feats[k2] for k2 in label_keys)
    z = prelu((le[:n_out] @ p['lw1']) * BN_SCALE)
    z = prelu((z @ p['lw2']) * BN_SCALE)
    z = prelu((z @ p['lw3']) * BN_SCALE)
    z = z @ p['lw4'] + p['lb4']
    return BETA_GAT * yo + z


# ----------------------------- parameter / input construction -----------------------------

def xavier_uniform(key, shape, gain=math.sqrt(2.0)):
    fan_in, fan_out = shape[-2], shape[-1]
    a = gain * math.sqrt(6.0 / (fan_in + fan_out))
    return jax.random.uniform(key, shape, jnp.float32, -a, a)


def make_params(key):
    ks = jax.random.split(key, 20)
    return {
        # feat_layers (MultiChannelProj + LayerNorm) x2
        'w1': xavier_uniform(ks[0], (NUM_FEATS, IN_DIM, HID_DIM)),
        'b1': jnp.zeros((NUM_FEATS, HID_DIM), jnp.float32),
        'g1': jnp.ones((NUM_FEATS, HID_DIM), jnp.float32),
        'bb1': jnp.zeros((NUM_FEATS, HID_DIM), jnp.float32),
        'w2': xavier_uniform(ks[1], (NUM_FEATS, HID_DIM, HID_DIM)),
        'b2': jnp.zeros((NUM_FEATS, HID_DIM), jnp.float32),
        'g2': jnp.ones((NUM_FEATS, HID_DIM), jnp.float32),
        'bb2': jnp.zeros((NUM_FEATS, HID_DIM), jnp.float32),
        # HeteroSelfAttention (K/Q: hid -> hid//8, V: hid -> hid)
        'hq_w': xavier_uniform(ks[2], (HID_DIM, HID_DIM // 8)),
        'hq_b': jnp.zeros((1, HID_DIM // 8), jnp.float32),
        'hk_w': xavier_uniform(ks[3], (HID_DIM, HID_DIM // 8)),
        'hk_b': jnp.zeros((1, HID_DIM // 8), jnp.float32),
        'hv_w': xavier_uniform(ks[4], (HID_DIM, HID_DIM)),
        'hv_b': jnp.zeros((1, HID_DIM), jnp.float32),
        # merge_channels + residual
        'wm': xavier_uniform(ks[5], (NUM_FEATS * HID_DIM, HID_DIM)),
        'bm': jnp.zeros((1, HID_DIM), jnp.float32),
        'wr': xavier_uniform(ks[6], (IN_DIM, HID_DIM)),
        # MyGAT K/Q (hid -> hid//4), V (hid -> hid)
        'gk_w': xavier_uniform(ks[7], (HID_DIM, HID_DIM // 4)),
        'gk_b': jnp.zeros((1, HID_DIM // 4), jnp.float32),
        'gq_w': xavier_uniform(ks[8], (HID_DIM, HID_DIM // 4)),
        'gq_b': jnp.zeros((1, HID_DIM // 4), jnp.float32),
        'gv_w': xavier_uniform(ks[9], (HID_DIM, HID_DIM)),
        'gv_b': jnp.zeros((1, HID_DIM), jnp.float32),
        # output_layers
        'ow1': xavier_uniform(ks[10], (HID_DIM, HID_DIM)),
        'ow2': xavier_uniform(ks[11], (HID_DIM, NUM_CLASSES)),
        # label_residual
        'lw1': xavier_uniform(ks[12], (NUM_CLASSES, HID_DIM)),
        'lw2': xavier_uniform(ks[13], (HID_DIM, HID_DIM)),
        'lw3': xavier_uniform(ks[14], (HID_DIM, HID_DIM)),
        'lw4': xavier_uniform(ks[15], (HID_DIM, NUM_CLASSES)),
        'lb4': jnp.zeros((1, NUM_CLASSES), jnp.float32),
    }


if __name__ == "__main__":
    key = jax.random.PRNGKey(0)
    pkey, dkey = jax.random.split(key)
    params = make_params(pkey)
    packed = pack_params(params)
    # runtime scalars: [gamma_hsa, gamma_gat, beta, prelu_alpha] at their nn init values
    scal = jnp.array([[GAMMA_HSA, GAMMA_GAT, BETA_GAT, PRELU_ALPHA]], jnp.float32)

    feat_keys = ["paper", "author", "field"]
    label_keys = ["PAP", "PFP"]
    tgt_type = "paper"
    dks = jax.random.split(dkey, 8)
    batch_feats = {k: jax.random.normal(dks[i], (N_NODES, IN_DIM), jnp.float32)
                   for i, k in enumerate(feat_keys)}
    batch_label_feats = {k: jax.random.normal(dks[3 + i], (N_NODES, NUM_CLASSES), jnp.float32)
                         for i, k in enumerate(label_keys)}
    # batch_label_embeds is only consumed when DecoupledHCOAT.output=True (it is False here).
    _batch_label_embeds = jax.random.normal(dks[6], (N_NODES, NUM_CLASSES), jnp.float32)

    # Deterministic edge list; every node receives >= 1 edge and max(dst) == N-1, so the
    # SparseTensor output covers all N rows (output.shape[0] == N).
    src = jnp.concatenate([(jnp.arange(N_NODES) * 5 + 2) % N_NODES,
                           (jnp.arange(N_NODES) * 7 + 11) % N_NODES]).astype(jnp.int32)
    dst = jnp.concatenate([jnp.arange(N_NODES),
                           (jnp.arange(N_NODES) * 3 + 1) % N_NODES]).astype(jnp.int32)
    edge_index = jnp.stack([src, dst])                                            # (2, E)

    # Glue: lane-dense flattening of dict features + one-hot scatter/gather operands.
    feats_stacked = jnp.stack([batch_feats[k] for k in feat_keys], axis=1)        # (N, C, F)
    feats_flat = feats_stacked.reshape(N_NODES, -1)                               # (N, C*F)
    tgt_feat = batch_feats[tgt_type]                                              # (N, F)
    label_flat = jnp.stack([batch_label_feats[k] for k in label_keys],
                           axis=1).reshape(N_NODES, -1)                           # (N, L*cls)
    S = jax.nn.one_hot(src, N_NODES, dtype=jnp.float32)                           # (E, N)
    Dm = jax.nn.one_hot(dst, N_NODES, dtype=jnp.float32)                          # (E, N)
    SD = jnp.concatenate([S, Dm], axis=0)                                         # (2E, N)
    DT = Dm.T                                                                     # (N, E)
    deg = jnp.sum(Dm, axis=0).reshape(N_NODES, 1)
    inv_deg = 1.0 / jnp.maximum(deg, 1.0)                                         # (N, 1)

    out = mygat_forward_pallas(packed, scal, feats_flat, tgt_feat, label_flat, SD, DT, inv_deg)
    out = jax.block_until_ready(out)
    assert out.shape == (N_NODES, NUM_CLASSES)

    with jax.default_matmul_precision("highest"):
        ref = reference_forward(params, batch_feats, feat_keys, tgt_type,
                                batch_label_feats, label_keys, edge_index)
    ref = jax.block_until_ready(ref)

    # Tolerance covers the kernel's default MXU matmul precision vs. the "highest"-precision
    # JAX reference; any layout / permutation bug produces errors orders of magnitude larger.
    if not bool(jnp.allclose(out, ref, atol=2e-2, rtol=2e-2)):
        raise AssertionError(
            f"Pallas output mismatch, max abs err = {float(jnp.max(jnp.abs(out - ref)))}")
    print("KERNEL_OK")
</pallas_src>

<mosaic_0001>
module attributes {stable_mosaic.version = 11 : i64} {
  func.func @mygat_fused_kernel(%arg0: memref<1x4xf32, #tpu.memory_space<vmem>>, %arg1: memref<16x96xf32, #tpu.memory_space<vmem>>, %arg2: memref<16x32xf32, #tpu.memory_space<vmem>>, %arg3: memref<16x16xf32, #tpu.memory_space<vmem>>, %arg4: memref<64x16xf32, #tpu.memory_space<vmem>>, %arg5: memref<16x32xf32, #tpu.memory_space<vmem>>, %arg6: memref<16x1xf32, #tpu.memory_space<vmem>>, %arg7: memref<96x96xf32, #tpu.memory_space<vmem>>, %arg8: memref<1x96xf32, #tpu.memory_space<vmem>>, %arg9: memref<1x96xf32, #tpu.memory_space<vmem>>, %arg10: memref<1x96xf32, #tpu.memory_space<vmem>>, %arg11: memref<96x96xf32, #tpu.memory_space<vmem>>, %arg12: memref<1x96xf32, #tpu.memory_space<vmem>>, %arg13: memref<1x96xf32, #tpu.memory_space<vmem>>, %arg14: memref<1x96xf32, #tpu.memory_space<vmem>>, %arg15: memref<96x120xf32, #tpu.memory_space<vmem>>, %arg16: memref<1x120xf32, #tpu.memory_space<vmem>>, %arg17: memref<12x36xf32, #tpu.memory_space<vmem>>, %arg18: memref<12x36xf32, #tpu.memory_space<vmem>>, %arg19: memref<36x18xf32, #tpu.memory_space<vmem>>, %arg20: memref<18x288xf32, #tpu.memory_space<vmem>>, %arg21: memref<96x288xf32, #tpu.memory_space<vmem>>, %arg22: memref<96x32xf32, #tpu.memory_space<vmem>>, %arg23: memref<1x32xf32, #tpu.memory_space<vmem>>, %arg24: memref<32x32xf32, #tpu.memory_space<vmem>>, %arg25: memref<32x16xf32, #tpu.memory_space<vmem>>, %arg26: memref<1x16xf32, #tpu.memory_space<vmem>>, %arg27: memref<32x32xf32, #tpu.memory_space<vmem>>, %arg28: memref<1x32xf32, #tpu.memory_space<vmem>>, %arg29: memref<8x2xf32, #tpu.memory_space<vmem>>, %arg30: memref<32x32xf32, #tpu.memory_space<vmem>>, %arg31: memref<32x8xf32, #tpu.memory_space<vmem>>, %arg32: memref<16x32xf32, #tpu.memory_space<vmem>>, %arg33: memref<32x32xf32, #tpu.memory_space<vmem>>, %arg34: memref<32x32xf32, #tpu.memory_space<vmem>>, %arg35: memref<32x8xf32, #tpu.memory_space<vmem>>, %arg36: memref<1x8xf32, #tpu.memory_space<vmem>>, %arg37: memref<16x8xf32, #tpu.memory_space<vmem>>) attributes {dimension_semantics = [], scalar_prefetch = 0 : i64, scratch_operands = 0 : i64, tpu.core_type = #tpu.core_type<tc>} {
    %c0 = arith.constant 0 : index
    %c0_0 = arith.constant 0 : index
    %0 = vector.load %arg0[%c0, %c0_0] : memref<1x4xf32, #tpu.memory_space<vmem>>, vector<1x1xf32>
    %1 = vector.extract %0[0, 0] : f32 from vector<1x1xf32>
    %c0_1 = arith.constant 0 : index
    %c1 = arith.constant 1 : index
    %2 = vector.load %arg0[%c0_1, %c1] : memref<1x4xf32, #tpu.memory_space<vmem>>, vector<1x1xf32>
    %3 = vector.extract %2[0, 0] : f32 from vector<1x1xf32>
    %c0_2 = arith.constant 0 : index
    %c2 = arith.constant 2 : index
    %4 = vector.load %arg0[%c0_2, %c2] : memref<1x4xf32, #tpu.memory_space<vmem>>, vector<1x1xf32>
    %5 = vector.extract %4[0, 0] : f32 from vector<1x1xf32>
    %c0_3 = arith.constant 0 : index
    %c3 = arith.constant 3 : index
    %6 = vector.load %arg0[%c0_3, %c3] : memref<1x4xf32, #tpu.memory_space<vmem>>, vector<1x1xf32>
    %7 = vector.extract %6[0, 0] : f32 from vector<1x1xf32>
    %c0_4 = arith.constant 0 : index
    %c0_5 = arith.constant 0 : index
    %8 = vector.load %arg1[%c0_4, %c0_5] : memref<16x96xf32, #tpu.memory_space<vmem>>, vector<16x96xf32>
    %c0_6 = arith.constant 0 : index
    %c0_7 = arith.constant 0 : index
    %9 = vector.load %arg7[%c0_6, %c0_7] : memref<96x96xf32, #tpu.memory_space<vmem>>, vector<96x96xf32>
    %cst = arith.constant dense<0.000000e+00> : vector<16x96xf32>
    %10 = tpu.matmul %8, %9, %cst {dimension_numbers = #tpu.dot_dimension_numbers<[1], [0], [0], [1], [0, 0, 1, 1], [], []>} : vector<16x96xf32>, vector<96x96xf32>, vector<16x96xf32> -> vector<16x96xf32>
    %c0_8 = arith.constant 0 : index
    %c0_9 = arith.constant 0 : index
    %11 = vector.load %arg8[%c0_8, %c0_9] : memref<1x96xf32, #tpu.memory_space<vmem>>, vector<1x96xf32>
    %12 = vector.broadcast %11 : vector<1x96xf32> to vector<16x96xf32>
    %13 = arith.addf %10, %12 : vector<16x96xf32>
    %cst_10 = arith.constant dense<0.000000e+00> : vector<16xf32>
    %14 = vector.multi_reduction <add>, %13, %cst_10 [1] : vector<16x96xf32> to vector<16xf32>
    %15 = vector.shape_cast %14 : vector<16xf32> to vector<16x1xf32>
    %cst_11 = arith.constant 9.600000e+01 : f32
    %16 = vector.broadcast %cst_11 : f32 to vector<16x1xf32>
    %17 = arith.divf %15, %16 : vector<16x1xf32>
    %18 = vector.broadcast %17 : vector<16x1xf32> to vector<16x96xf32>
    %19 = arith.subf %13, %18 : vector<16x96xf32>
    %20 = arith.mulf %19, %19 : vector<16x96xf32>
    %cst_12 = arith.constant dense<0.000000e+00> : vector<16xf32>
    %21 = vector.multi_reduction <add>, %20, %cst_12 [1] : vector<16x96xf32> to vector<16xf32>
    %22 = vector.shape_cast %21 : vector<16xf32> to vector<16x1xf32>
    %cst_13 = arith.constant 9.600000e+01 : f32
    %23 = vector.broadcast %cst_13 : f32 to vector<16x1xf32>
    %24 = arith.divf %22, %23 : vector<16x1xf32>
    %cst_14 = arith.constant 9.99999974E-6 : f32
    %25 = vector.broadcast %cst_14 : f32 to vector<16x1xf32>
    %26 = arith.addf %24, %25 : vector<16x1xf32>
    %27 = math.rsqrt %26 : vector<16x1xf32>
    %28 = vector.broadcast %27 : vector<16x1xf32> to vector<16x96xf32>
    %29 = arith.mulf %19, %28 : vector<16x96xf32>
    %c0_15 = arith.constant 0 : index
    %c0_16 = arith.constant 0 : index
    %30 = vector.load %arg9[%c0_15, %c0_16] : memref<1x96xf32, #tpu.memory_space<vmem>>, vector<1x96xf32>
    %31 = vector.broadcast %30 : vector<1x96xf32> to vector<16x96xf32>
    %32 = arith.mulf %29, %31 : vector<16x96xf32>
    %c0_17 = arith.constant 0 : index
    %c0_18 = arith.constant 0 : index
    %33 = vector.load %arg10[%c0_17, %c0_18] : memref<1x96xf32, #tpu.memory_space<vmem>>, vector<1x96xf32>
    %34 = vector.broadcast %33 : vector<1x96xf32> to vector<16x96xf32>
    %35 = arith.addf %32, %34 : vector<16x96xf32>
    %cst_19 = arith.constant 0.000000e+00 : f32
    %36 = vector.broadcast %cst_19 : f32 to vector<16x96xf32>
    %37 = arith.cmpf oge, %35, %36 : vector<16x96xf32>
    %38 = vector.broadcast %7 : f32 to vector<16x96xf32>
    %39 = arith.mulf %38, %35 : vector<16x96xf32>
    %40 = arith.select %37, %35, %39 : vector<16x96xi1>, vector<16x96xf32>
    %c0_20 = arith.constant 0 : index
    %c0_21 = arith.constant 0 : index
    %41 = vector.load %arg11[%c0_20, %c0_21] : memref<96x96xf32, #tpu.memory_space<vmem>>, vector<96x96xf32>
    %cst_22 = arith.constant dense<0.000000e+00> : vector<16x96xf32>
    %42 = tpu.matmul %40, %41, %cst_22 {dimension_numbers = #tpu.dot_dimension_numbers<[1], [0], [0], [1], [0, 0, 1, 1], [], []>} : vector<16x96xf32>, vector<96x96xf32>, vector<16x96xf32> -> vector<16x96xf32>
    %c0_23 = arith.constant 0 : index
    %c0_24 = arith.constant 0 : index
    %43 = vector.load %arg12[%c0_23, %c0_24] : memref<1x96xf32, #tpu.memory_space<vmem>>, vector<1x96xf32>
    %44 = vector.broadcast %43 : vector<1x96xf32> to vector<16x96xf32>
    %45 = arith.addf %42, %44 : vector<16x96xf32>
    %cst_25 = arith.constant dense<0.000000e+00> : vector<16xf32>
    %46 = vector.multi_reduction <add>, %45, %cst_25 [1] : vector<16x96xf32> to vector<16xf32>
    %47 = vector.shape_cast %46 : vector<16xf32> to vector<16x1xf32>
    %cst_26 = arith.constant 9.600000e+01 : f32
    %48 = vector.broadcast %cst_26 : f32 to vector<16x1xf32>
    %49 = arith.divf %47, %48 : vector<16x1xf32>
    %50 = vector.broadcast %49 : vector<16x1xf32> to vector<16x96xf32>
    %51 = arith.subf %45, %50 : vector<16x96xf32>
    %52 = arith.mulf %51, %51 : vector<16x96xf32>
    %cst_27 = arith.constant dense<0.000000e+00> : vector<16xf32>
    %53 = vector.multi_reduction <add>, %52, %cst_27 [1] : vector<16x96xf32> to vector<16xf32>
    %54 = vector.shape_cast %53 : vector<16xf32> to vector<16x1xf32>
    %cst_28 = arith.constant 9.600000e+01 : f32
    %55 = vector.broadcast %cst_28 : f32 to vector<16x1xf32>
    %56 = arith.divf %54, %55 : vector<16x1xf32>
    %cst_29 = arith.constant 9.99999974E-6 : f32
    %57 = vector.broadcast %cst_29 : f32 to vector<16x1xf32>
    %58 = arith.addf %56, %57 : vector<16x1xf32>
    %59 = math.rsqrt %58 : vector<16x1xf32>
    %60 = vector.broadcast %59 : vector<16x1xf32> to vector<16x96xf32>
    %61 = arith.mulf %51, %60 : vector<16x96xf32>
    %c0_30 = arith.constant 0 : index
    %c0_31 = arith.constant 0 : index
    %62 = vector.load %arg13[%c0_30, %c0_31] : memref<1x96xf32, #tpu.memory_space<vmem>>, vector<1x96xf32>
    %63 = vector.broadcast %62 : vector<1x96xf32> to vector<16x96xf32>
    %64 = arith.mulf %61, %63 : vector<16x96xf32>
    %c0_32 = arith.constant 0 : index
    %c0_33 = arith.constant 0 : index
    %65 = vector.load %arg14[%c0_32, %c0_33] : memref<1x96xf32, #tpu.memory_space<vmem>>, vector<1x96xf32>
    %66 = vector.broadcast %65 : vector<1x96xf32> to vector<16x96xf32>
    %67 = arith.addf %64, %66 : vector<16x96xf32>
    %cst_34 = arith.constant 0.000000e+00 : f32
    %68 = vector.broadcast %cst_34 : f32 to vector<16x96xf32>
    %69 = arith.cmpf oge, %67, %68 : vector<16x96xf32>
    %70 = vector.broadcast %7 : f32 to vector<16x96xf32>
    %71 = arith.mulf %70, %67 : vector<16x96xf32>
    %72 = arith.select %69, %67, %71 : vector<16x96xi1>, vector<16x96xf32>
    %c0_35 = arith.constant 0 : index
    %c0_36 = arith.constant 0 : index
    %73 = vector.load %arg15[%c0_35, %c0_36] : memref<96x120xf32, #tpu.memory_space<vmem>>, vector<96x120xf32>
    %cst_37 = arith.constant dense<0.000000e+00> : vector<16x120xf32>
    %74 = tpu.matmul %72, %73, %cst_37 {dimension_numbers = #tpu.dot_dimension_numbers<[1], [0], [0], [1], [0, 0, 1, 1], [], []>} : vector<16x96xf32>, vector<96x120xf32>, vector<16x120xf32> -> vector<16x120xf32>
    %c0_38 = arith.constant 0 : index
    %c0_39 = arith.constant 0 : index
    %75 = vector.load %arg16[%c0_38, %c0_39] : memref<1x120xf32, #tpu.memory_space<vmem>>, vector<1x120xf32>
    %76 = vector.broadcast %75 : vector<1x120xf32> to vector<16x120xf32>
    %77 = arith.addf %74, %76 : vector<16x120xf32>
    %78 = vector.extract_strided_slice %77 {offsets = [0, 0], sizes = [16, 12], strides = [1, 1]} : vector<16x120xf32> to vector<16x12xf32>
    %79 = vector.extract_strided_slice %77 {offsets = [0, 12], sizes = [16, 12], strides = [1, 1]} : vector<16x120xf32> to vector<16x12xf32>
    %80 = vector.extract_strided_slice %77 {offsets = [0, 24], sizes = [16, 96], strides = [1, 1]} : vector<16x120xf32> to vector<16x96xf32>
    %c0_40 = arith.constant 0 : index
    %c0_41 = arith.constant 0 : index
    %81 = vector.load %arg17[%c0_40, %c0_41] : memref<12x36xf32, #tpu.memory_space<vmem>>, vector<12x36xf32>
    %cst_42 = arith.constant dense<0.000000e+00> : vector<16x36xf32>
    %82 = tpu.matmul %78, %81, %cst_42 {dimension_numbers = #tpu.dot_dimension_numbers<[1], [0], [0], [1], [0, 0, 1, 1], [], []>} : vector<16x12xf32>, vector<12x36xf32>, vector<16x36xf32> -> vector<16x36xf32>
    %c0_43 = arith.constant 0 : index
    %c0_44 = arith.constant 0 : index
    %83 = vector.load %arg18[%c0_43, %c0_44] : memref<12x36xf32, #tpu.memory_space<vmem>>, vector<12x36xf32>
    %cst_45 = arith.constant dense<0.000000e+00> : vector<16x36xf32>
    %84 = tpu.matmul %79, %83, %cst_45 {dimension_numbers = #tpu.dot_dimension_numbers<[1], [0], [0], [1], [0, 0, 1, 1], [], []>} : vector<16x12xf32>, vector<12x36xf32>, vector<16x36xf32> -> vector<16x36xf32>
    %85 = arith.mulf %82, %84 : vector<16x36xf32>
    %c0_46 = arith.constant 0 : index
    %c0_47 = arith.constant 0 : index
    %86 = vector.load %arg19[%c0_46, %c0_47] : memref<36x18xf32, #tpu.memory_space<vmem>>, vector<36x18xf32>
    %cst_48 = arith.constant dense<0.000000e+00> : vector<16x18xf32>
    %87 = tpu.matmul %85, %86, %cst_48 {dimension_numbers = #tpu.dot_dimension_numbers<[1], [0], [0], [1], [0, 0, 1, 1], [], []>} : vector<16x36xf32>, vector<36x18xf32>, vector<16x18xf32> -> vector<16x18xf32>
    %cst_49 = arith.constant 0.000000e+00 : f32
    %88 = vector.broadcast %cst_49 : f32 to vector<16x18xf32>
    %89 = arith.cmpf oge, %87, %88 : vector<16x18xf32>
    %cst_50 = arith.constant 2.000000e-01 : f32
    %90 = vector.broadcast %cst_50 : f32 to vector<16x18xf32>
    %91 = arith.mulf %90, %87 : vector<16x18xf32>
    %92 = arith.select %89, %87, %91 : vector<16x18xi1>, vector<16x18xf32>
    %93 = vector.extract_strided_slice %92 {offsets = [0, 0], sizes = [16, 6], strides = [1, 1]} : vector<16x18xf32> to vector<16x6xf32>
    %94 = vector.extract_strided_slice %92 {offsets = [0, 6], sizes = [16, 6], strides = [1, 1]} : vector<16x18xf32> to vector<16x6xf32>
    %95 = vector.extract_strided_slice %92 {offsets = [0, 12], sizes = [16, 6], strides = [1, 1]} : vector<16x18xf32> to vector<16x6xf32>
    %96 = arith.maximumf %93, %94 : vector<16x6xf32>
    %97 = arith.maximumf %96, %95 : vector<16x6xf32>
    %98 = arith.subf %93, %97 : vector<16x6xf32>
    %99 = math.exp %98 : vector<16x6xf32>
    %100 = arith.subf %94, %97 : vector<16x6xf32>
    %101 = math.exp %100 : vector<16x6xf32>
    %102 = arith.subf %95, %97 : vector<16x6xf32>
    %103 = math.exp %102 : vector<16x6xf32>
    %104 = arith.addf %99, %101 : vector<16x6xf32>
    %105 = arith.addf %104, %103 : vector<16x6xf32>
    %cst_51 = arith.constant 1.000000e+00 : f32
    %106 = vector.broadcast %cst_51 : f32 to vector<16x6xf32>
    %107 = arith.divf %106, %105 : vector<16x6xf32>
    %108 = arith.mulf %99, %107 : vector<16x6xf32>
    %109 = arith.mulf %101, %107 : vector<16x6xf32>
    %110 = arith.mulf %103, %107 : vector<16x6xf32>
    %111 = tpu.concatenate %108, %109, %110 in 1 : vector<16x6xf32>, vector<16x6xf32>, vector<16x6xf32> -> vector<16x18xf32>
    %c0_52 = arith.constant 0 : index
    %c0_53 = arith.constant 0 : index
    %112 = vector.load %arg20[%c0_52, %c0_53] : memref<18x288xf32, #tpu.memory_space<vmem>>, vector<18x288xf32>
    %cst_54 = arith.constant dense<0.000000e+00> : vector<16x288xf32>
    %113 = tpu.matmul %111, %112, %cst_54 {dimension_numbers = #tpu.dot_dimension_numbers<[1], [0], [0], [1], [0, 0, 1, 1], [], []>} : vector<16x18xf32>, vector<18x288xf32>, vector<16x288xf32> -> vector<16x288xf32>
    %c0_55 = arith.constant 0 : index
    %c0_56 = arith.constant 0 : index
    %114 = vector.load %arg21[%c0_55, %c0_56] : memref<96x288xf32, #tpu.memory_space<vmem>>, vector<96x288xf32>
    %cst_57 = arith.constant dense<0.000000e+00> : vector<16x288xf32>
    %115 = tpu.matmul %80, %114, %cst_57 {dimension_numbers = #tpu.dot_dimension_numbers<[1], [0], [0], [1], [0, 0, 1, 1], [], []>} : vector<16x96xf32>, vector<96x288xf32>, vector<16x288xf32> -> vector<16x288xf32>
    %116 = arith.mulf %113, %115 : vector<16x288xf32>
    %117 = vector.extract_strided_slice %116 {offsets = [0, 0], sizes = [16, 96], strides = [1, 1]} : vector<16x288xf32> to vector<16x96xf32>
    %118 = vector.extract_strided_slice %116 {offsets = [0, 96], sizes = [16, 96], strides = [1, 1]} : vector<16x288xf32> to vector<16x96xf32>
    %119 = arith.addf %117, %118 : vector<16x96xf32>
    %120 = vector.extract_strided_slice %116 {offsets = [0, 192], sizes = [16, 96], strides = [1, 1]} : vector<16x288xf32> to vector<16x96xf32>
    %121 = arith.addf %119, %120 : vector<16x96xf32>
    %122 = vector.broadcast %1 : f32 to vector<16x96xf32>
    %123 = arith.mulf %122, %121 : vector<16x96xf32>
    %124 = arith.addf %123, %72 : vector<16x96xf32>
    %c0_58 = arith.constant 0 : index
    %c0_59 = arith.constant 0 : index
    %125 = vector.load %arg22[%c0_58, %c0_59] : memref<96x32xf32, #tpu.memory_space<vmem>>, vector<96x32xf32>
    %cst_60 = arith.constant dense<0.000000e+00> : vector<16x32xf32>
    %126 = tpu.matmul %124, %125, %cst_60 {dimension_numbers = #tpu.dot_dimension_numbers<[1], [0], [0], [1], [0, 0, 1, 1], [], []>} : vector<16x96xf32>, vector<96x32xf32>, vector<16x32xf32> -> vector<16x32xf32>
    %c0_61 = arith.constant 0 : index
    %c0_62 = arith.constant 0 : index
    %127 = vector.load %arg23[%c0_61, %c0_62] : memref<1x32xf32, #tpu.memory_space<vmem>>, vector<1x32xf32>
    %128 = vector.broadcast %127 : vector<1x32xf32> to vector<16x32xf32>
    %129 = arith.addf %126, %128 : vector<16x32xf32>
    %c0_63 = arith.constant 0 : index
    %c0_64 = arith.constant 0 : index
    %130 = vector.load %arg2[%c0_63, %c0_64] : memref<16x32xf32, #tpu.memory_space<vmem>>, vector<16x32xf32>
    %c0_65 = arith.constant 0 : index
    %c0_66 = arith.constant 0 : index
    %131 = vector.load %arg24[%c0_65, %c0_66] : memref<32x32xf32, #tpu.memory_space<vmem>>, vector<32x32xf32>
    %cst_67 = arith.constant dense<0.000000e+00> : vector<16x32xf32>
    %132 = tpu.matmul %130, %131, %cst_67 {dimension_numbers = #tpu.dot_dimension_numbers<[1], [0], [0], [1], [0, 0, 1, 1], [], []>} : vector<16x32xf32>, vector<32x32xf32>, vector<16x32xf32> -> vector<16x32xf32>
    %133 = arith.addf %129, %132 : vector<16x32xf32>
    %cst_68 = arith.constant 0.000000e+00 : f32
    %134 = vector.broadcast %cst_68 : f32 to vector<16x32xf32>
    %135 = arith.cmpf oge, %133, %134 : vector<16x32xf32>
    %136 = vector.broadcast %7 : f32 to vector<16x32xf32>
    %137 = arith.mulf %136, %133 : vector<16x32xf32>
    %138 = arith.select %135, %133, %137 : vector<16x32xi1>, vector<16x32xf32>
    %c0_69 = arith.constant 0 : index
    %c0_70 = arith.constant 0 : index
    %139 = vector.load %arg4[%c0_69, %c0_70] : memref<64x16xf32, #tpu.memory_space<vmem>>, vector<64x16xf32>
    %cst_71 = arith.constant dense<0.000000e+00> : vector<64x32xf32>
    %140 = tpu.matmul %139, %138, %cst_71 {dimension_numbers = #tpu.dot_dimension_numbers<[1], [0], [0], [1], [0, 0, 1, 1], [], []>} : vector<64x16xf32>, vector<16x32xf32>, vector<64x32xf32> -> vector<64x32xf32>
    %c0_72 = arith.constant 0 : index
    %c0_73 = arith.constant 0 : index
    %141 = vector.load %arg25[%c0_72, %c0_73] : memref<32x16xf32, #tpu.memory_space<vmem>>, vector<32x16xf32>
    %cst_74 = arith.constant dense<0.000000e+00> : vector<64x16xf32>
    %142 = tpu.matmul %140, %141, %cst_74 {dimension_numbers = #tpu.dot_dimension_numbers<[1], [0], [0], [1], [0, 0, 1, 1], [], []>} : vector<64x32xf32>, vector<32x16xf32>, vector<64x16xf32> -> vector<64x16xf32>
    %c0_75 = arith.constant 0 : index
    %c0_76 = arith.constant 0 : index
    %143 = vector.load %arg26[%c0_75, %c0_76] : memref<1x16xf32, #tpu.memory_space<vmem>>, vector<1x16xf32>
    %144 = vector.broadcast %143 : vector<1x16xf32> to vector<64x16xf32>
    %145 = arith.addf %142, %144 : vector<64x16xf32>
    %146 = vector.extract_strided_slice %145 {offsets = [0, 0], sizes = [32, 8], strides = [1, 1]} : vector<64x16xf32> to vector<32x8xf32>
    %147 = vector.extract_strided_slice %145 {offsets = [32, 8], sizes = [32, 8], strides = [1, 1]} : vector<64x16xf32> to vector<32x8xf32>
    %148 = arith.mulf %146, %147 : vector<32x8xf32>
    %c0_77 = arith.constant 0 : index
    %c0_78 = arith.constant 0 : index
    %149 = vector.load %arg29[%c0_77, %c0_78] : memref<8x2xf32, #tpu.memory_space<vmem>>, vector<8x2xf32>
    %cst_79 = arith.constant dense<0.000000e+00> : vector<32x2xf32>
    %150 = tpu.matmul %148, %149, %cst_79 {dimension_numbers = #tpu.dot_dimension_numbers<[1], [0], [0], [1], [0, 0, 1, 1], [], []>} : vector<32x8xf32>, vector<8x2xf32>, vector<32x2xf32> -> vector<32x2xf32>
    %cst_80 = arith.constant 0.000000e+00 : f32
    %151 = vector.broadcast %cst_80 : f32 to vector<32x2xf32>
    %152 = arith.cmpf oge, %150, %151 : vector<32x2xf32>
    %cst_81 = arith.constant 0.00999999977 : f32
    %153 = vector.broadcast %cst_81 : f32 to vector<32x2xf32>
    %154 = arith.mulf %153, %150 : vector<32x2xf32>
    %155 = arith.select %152, %150, %154 : vector<32x2xi1>, vector<32x2xf32>
    %cst_82 = arith.constant dense<0.000000e+00> : vector<32xf32>
    %156 = vector.multi_reduction <add>, %155, %cst_82 [1] : vector<32x2xf32> to vector<32xf32>
    %157 = vector.shape_cast %156 : vector<32xf32> to vector<32x1xf32>
    %158 = vector.shape_cast %157 : vector<32x1xf32> to vector<1x32x1xf32>
    %cst_83 = arith.constant dense<0xFF800000> : vector<1xf32>
    %159 = vector.multi_reduction <maximumf>, %158, %cst_83 [1, 2] : vector<1x32x1xf32> to vector<1xf32>
    %160 = vector.shape_cast %159 : vector<1xf32> to vector<1x1x1xf32>
    %161 = vector.extract %160[0, 0, 0] : f32 from vector<1x1x1xf32>
    %162 = vector.broadcast %161 : f32 to vector<32x1xf32>
    %163 = arith.subf %157, %162 : vector<32x1xf32>
    %164 = math.exp %163 : vector<32x1xf32>
    %c0_84 = arith.constant 0 : index
    %c0_85 = arith.constant 0 : index
    %165 = vector.load %arg5[%c0_84, %c0_85] : memref<16x32xf32, #tpu.memory_space<vmem>>, vector<16x32xf32>
    %cst_86 = arith.constant dense<0.000000e+00> : vector<16x1xf32>
    %166 = tpu.matmul %165, %164, %cst_86 {dimension_numbers = #tpu.dot_dimension_numbers<[1], [0], [0], [1], [0, 0, 1, 1], [], []>} : vector<16x32xf32>, vector<32x1xf32>, vector<16x1xf32> -> vector<16x1xf32>
    %167 = vector.extract_strided_slice %139 {offsets = [32, 0], sizes = [32, 16], strides = [1, 1]} : vector<64x16xf32> to vector<32x16xf32>
    %cst_87 = arith.constant dense<0.000000e+00> : vector<32x1xf32>
    %168 = tpu.matmul %167, %166, %cst_87 {dimension_numbers = #tpu.dot_dimension_numbers<[1], [0], [0], [1], [0, 0, 1, 1], [], []>} : vector<32x16xf32>, vector<16x1xf32>, vector<32x1xf32> -> vector<32x1xf32>
    %cst_88 = arith.constant 1.000000e-16 : f32
    %169 = vector.broadcast %cst_88 : f32 to vector<32x1xf32>
    %170 = arith.addf %168, %169 : vector<32x1xf32>
    %171 = arith.divf %164, %170 : vector<32x1xf32>
    %172 = vector.extract_strided_slice %139 {offsets = [0, 0], sizes = [32, 16], strides = [1, 1]} : vector<64x16xf32> to vector<32x16xf32>
    %c0_89 = arith.constant 0 : index
    %c0_90 = arith.constant 0 : index
    %173 = vector.load %arg27[%c0_89, %c0_90] : memref<32x32xf32, #tpu.memory_space<vmem>>, vector<32x32xf32>
    %cst_91 = arith.constant dense<0.000000e+00> : vector<16x32xf32>
    %174 = tpu.matmul %138, %173, %cst_91 {dimension_numbers = #tpu.dot_dimension_numbers<[1], [0], [0], [1], [0, 0, 1, 1], [], []>} : vector<16x32xf32>, vector<32x32xf32>, vector<16x32xf32> -> vector<16x32xf32>
    %c0_92 = arith.constant 0 : index
    %c0_93 = arith.constant 0 : index
    %175 = vector.load %arg28[%c0_92, %c0_93] : memref<1x32xf32, #tpu.memory_space<vmem>>, vector<1x32xf32>
    %176 = vector.broadcast %175 : vector<1x32xf32> to vector<16x32xf32>
    %177 = arith.addf %174, %176 : vector<16x32xf32>
    %cst_94 = arith.constant dense<0.000000e+00> : vector<32x32xf32>
    %178 = tpu.matmul %172, %177, %cst_94 {dimension_numbers = #tpu.dot_dimension_numbers<[1], [0], [0], [1], [0, 0, 1, 1], [], []>} : vector<32x16xf32>, vector<16x32xf32>, vector<32x32xf32> -> vector<32x32xf32>
    %179 = vector.broadcast %171 : vector<32x1xf32> to vector<32x32xf32>
    %180 = arith.mulf %179, %178 : vector<32x32xf32>
    %cst_95 = arith.constant dense<0.000000e+00> : vector<16x32xf32>
    %181 = tpu.matmul %165, %180, %cst_95 {dimension_numbers = #tpu.dot_dimension_numbers<[1], [0], [0], [1], [0, 0, 1, 1], [], []>} : vector<16x32xf32>, vector<32x32xf32>, vector<16x32xf32> -> vector<16x32xf32>
    %c0_96 = arith.constant 0 : index
    %c0_97 = arith.constant 0 : index
    %182 = vector.load %arg6[%c0_96, %c0_97] : memref<16x1xf32, #tpu.memory_space<vmem>>, vector<16x1xf32>
    %183 = vector.broadcast %182 : vector<16x1xf32> to vector<16x32xf32>
    %184 = arith.mulf %181, %183 : vector<16x32xf32>
    %185 = vector.broadcast %3 : f32 to vector<16x32xf32>
    %186 = arith.mulf %185, %184 : vector<16x32xf32>
    %187 = arith.addf %186, %138 : vector<16x32xf32>
    %c0_98 = arith.constant 0 : index
    %c0_99 = arith.constant 0 : index
    %188 = vector.load %arg30[%c0_98, %c0_99] : memref<32x32xf32, #tpu.memory_space<vmem>>, vector<32x32xf32>
    %cst_100 = arith.constant dense<0.000000e+00> : vector<16x32xf32>
    %189 = tpu.matmul %187, %188, %cst_100 {dimension_numbers = #tpu.dot_dimension_numbers<[1], [0], [0], [1], [0, 0, 1, 1], [], []>} : vector<16x32xf32>, vector<32x32xf32>, vector<16x32xf32> -> vector<16x32xf32>
    %cst_101 = arith.constant 0.999994993 : f32
    %190 = vector.broadcast %cst_101 : f32 to vector<16x32xf32>
    %191 = arith.mulf %189, %190 : vector<16x32xf32>
    %cst_102 = arith.constant 0.000000e+00 : f32
    %192 = vector.broadcast %cst_102 : f32 to vector<16x32xf32>
    %193 = arith.cmpf oge, %191, %192 : vector<16x32xf32>
    %194 = vector.broadcast %7 : f32 to vector<16x32xf32>
    %195 = arith.mulf %194, %191 : vector<16x32xf32>
    %196 = arith.select %193, %191, %195 : vector<16x32xi1>, vector<16x32xf32>
    %c0_103 = arith.constant 0 : index
    %c0_104 = arith.constant 0 : index
    %197 = vector.load %arg31[%c0_103, %c0_104] : memref<32x8xf32, #tpu.memory_space<vmem>>, vector<32x8xf32>
    %cst_105 = arith.constant dense<0.000000e+00> : vector<16x8xf32>
    %198 = tpu.matmul %196, %197, %cst_105 {dimension_numbers = #tpu.dot_dimension_numbers<[1], [0], [0], [1], [0, 0, 1, 1], [], []>} : vector<16x32xf32>, vector<32x8xf32>, vector<16x8xf32> -> vector<16x8xf32>
    %cst_106 = arith.constant 0.999994993 : f32
    %199 = vector.broadcast %cst_106 : f32 to vector<16x8xf32>
    %200 = arith.mulf %198, %199 : vector<16x8xf32>
    %c0_107 = arith.constant 0 : index
    %c0_108 = arith.constant 0 : index
    %201 = vector.load %arg3[%c0_107, %c0_108] : memref<16x16xf32, #tpu.memory_space<vmem>>, vector<16x16xf32>
    %c0_109 = arith.constant 0 : index
    %c0_110 = arith.constant 0 : index
    %202 = vector.load %arg32[%c0_109, %c0_110] : memref<16x32xf32, #tpu.memory_space<vmem>>, vector<16x32xf32>
    %cst_111 = arith.constant dense<0.000000e+00> : vector<16x32xf32>
    %203 = tpu.matmul %201, %202, %cst_111 {dimension_numbers = #tpu.dot_dimension_numbers<[1], [0], [0], [1], [0, 0, 1, 1], [], []>} : vector<16x16xf32>, vector<16x32xf32>, vector<16x32xf32> -> vector<16x32xf32>
    %cst_112 = arith.constant 0.999994993 : f32
    %204 = vector.broadcast %cst_112 : f32 to vector<16x32xf32>
    %205 = arith.mulf %203, %204 : vector<16x32xf32>
    %cst_113 = arith.constant 0.000000e+00 : f32
    %206 = vector.broadcast %cst_113 : f32 to vector<16x32xf32>
    %207 = arith.cmpf oge, %205, %206 : vector<16x32xf32>
    %208 = vector.broadcast %7 : f32 to vector<16x32xf32>
    %209 = arith.mulf %208, %205 : vector<16x32xf32>
    %210 = arith.select %207, %205, %209 : vector<16x32xi1>, vector<16x32xf32>
    %c0_114 = arith.constant 0 : index
    %c0_115 = arith.constant 0 : index
    %211 = vector.load %arg33[%c0_114, %c0_115] : memref<32x32xf32, #tpu.memory_space<vmem>>, vector<32x32xf32>
    %cst_116 = arith.constant dense<0.000000e+00> : vector<16x32xf32>
    %212 = tpu.matmul %210, %211, %cst_116 {dimension_numbers = #tpu.dot_dimension_numbers<[1], [0], [0], [1], [0, 0, 1, 1], [], []>} : vector<16x32xf32>, vector<32x32xf32>, vector<16x32xf32> -> vector<16x32xf32>
    %cst_117 = arith.constant 0.999994993 : f32
    %213 = vector.broadcast %cst_117 : f32 to vector<16x32xf32>
    %214 = arith.mulf %212, %213 : vector<16x32xf32>
    %cst_118 = arith.constant 0.000000e+00 : f32
    %215 = vector.broadcast %cst_118 : f32 to vector<16x32xf32>
    %216 = arith.cmpf oge, %214, %215 : vector<16x32xf32>
    %217 = vector.broadcast %7 : f32 to vector<16x32xf32>
    %218 = arith.mulf %217, %214 : vector<16x32xf32>
    %219 = arith.select %216, %214, %218 : vector<16x32xi1>, vector<16x32xf32>
    %c0_119 = arith.constant 0 : index
    %c0_120 = arith.constant 0 : index
    %220 = vector.load %arg34[%c0_119, %c0_120] : memref<32x32xf32, #tpu.memory_space<vmem>>, vector<32x32xf32>
    %cst_121 = arith.constant dense<0.000000e+00> : vector<16x32xf32>
    %221 = tpu.matmul %219, %220, %cst_121 {dimension_numbers = #tpu.dot_dimension_numbers<[1], [0], [0], [1], [0, 0, 1, 1], [], []>} : vector<16x32xf32>, vector<32x32xf32>, vector<16x32xf32> -> vector<16x32xf32>
    %cst_122 = arith.constant 0.999994993 : f32
    %222 = vector.broadcast %cst_122 : f32 to vector<16x32xf32>
    %223 = arith.mulf %221, %222 : vector<16x32xf32>
    %cst_123 = arith.constant 0.000000e+00 : f32
    %224 = vector.broadcast %cst_123 : f32 to vector<16x32xf32>
    %225 = arith.cmpf oge, %223, %224 : vector<16x32xf32>
    %226 = vector.broadcast %7 : f32 to vector<16x32xf32>
    %227 = arith.mulf %226, %223 : vector<16x32xf32>
    %228 = arith.select %225, %223, %227 : vector<16x32xi1>, vector<16x32xf32>
    %c0_124 = arith.constant 0 : index
    %c0_125 = arith.constant 0 : index
    %229 = vector.load %arg35[%c0_124, %c0_125] : memref<32x8xf32, #tpu.memory_space<vmem>>, vector<32x8xf32>
    %cst_126 = arith.constant dense<0.000000e+00> : vector<16x8xf32>
    %230 = tpu.matmul %228, %229, %cst_126 {dimension_numbers = #tpu.dot_dimension_numbers<[1], [0], [0], [1], [0, 0, 1, 1], [], []>} : vector<16x32xf32>, vector<32x8xf32>, vector<16x8xf32> -> vector<16x8xf32>
    %c0_127 = arith.constant 0 : index
    %c0_128 = arith.constant 0 : index
    %231 = vector.load %arg36[%c0_127, %c0_128] : memref<1x8xf32, #tpu.memory_space<vmem>>, vector<1x8xf32>
    %232 = vector.broadcast %231 : vector<1x8xf32> to vector<16x8xf32>
    %233 = arith.addf %230, %232 : vector<16x8xf32>
    %234 = vector.broadcast %5 : f32 to vector<16x8xf32>
    %235 = arith.mulf %234, %200 : vector<16x8xf32>
    %236 = arith.addf %235, %233 : vector<16x8xf32>
    %c0_129 = arith.constant 0 : index
    %c0_130 = arith.constant 0 : index
    %237 = vector.load %arg37[%c0_129, %c0_130] : memref<16x8xf32, #tpu.memory_space<vmem>>, vector<16x8xf32>
    tpu.vector_store %arg37[%c0_129, %c0_130], %236 {strides = array<i32>} : memref<16x8xf32, #tpu.memory_space<vmem>>, vector<16x8xf32>,
    return
  }
}

</mosaic_0001>

<bundles_post_ra>
// kernel: tpu_custom_call.1
= control target key start
LH: loop header
LB: loop body
LE: loop exit
PB: predicated region body
PF: predicated region fallthrough
CT: control target
= control target key end

     0   :  { %s4892_s6 = smov 1   ;;  %s4893_s10 = smov 2   ;;  %s5675_s0 = inlined_call_operand.smem [shape: u32[38], index: -1, kind: input, shape index: {}] }
   0x1   :  { %s4977_s5 = sld [smem:[%s5675_s0]]   ;;  %s4894_s14 = smov 3  }
   0x2   :  { %s4982_s9 = sld [smem:[%s5675_s0 + %s4892_s6]]   ;;  %s4895_s18 = smov 4  }
   0x3   :  { %s4987_s13 = sld [smem:[%s5675_s0 + %s4893_s10]]   ;;  %s4896_s22 = smov 5  }
   0x4   :  { %s4992_s17 = sld [smem:[%s5675_s0 + %s4894_s14]]   ;;  %s4897_s26 = smov 6  }
   0x5   :  { %s4997_s21 = sld [smem:[%s5675_s0 + %s4895_s18]]   ;;  %s4898_s30 = smov 7  }
   0x6   :  { %s5002_s25 = sld [smem:[%s5675_s0 + %s4896_s22]]   ;;  %s4899_s4 = smov 8  }
   0x7   :  { %5694 = sst [smem:[#allocation48_spill]] %s4977_s5  ;;  %s4900_s10 = smov 9  }
   0x8   :  { %s5007_s29 = sld [smem:[%s5675_s0 + %s4897_s26]]   ;;  %s4901_s15 = smov 10  }
   0x9   :  { %s5012_s3 = sld [smem:[%s5675_s0 + %s4898_s30]]   ;;  %s4902_s20 = smov 11  }
   0xa   :  { %s5017_s8 = sld [smem:[%s5675_s0 + %s4899_s4]]   ;;  %s4903_s26 = smov 12  }
   0xb   :  { %5695 = sst [smem:[#allocation49_spill]] %s4997_s21  ;;  %s4904_s1 = smov 13  }
   0xc   :  { %s5022_s14 = sld [smem:[%s5675_s0 + %s4900_s10]]   ;;  %s4905_s7 = smov 14  }
   0xd   :  { %s5027_s19 = sld [smem:[%s5675_s0 + %s4901_s15]]   ;;  %s4906_s15 = smov 15  }
   0xe   :  { %5696 = sst [smem:[#allocation50_spill]] %s5007_s29  ;;  %s4907_s22 = smov 16  }
   0xf   :  { %5697 = sst [smem:[#allocation51_spill]] %s5012_s3  ;;  %s4908_s28 = smov 17  }
  0x10   :  { %s5032_s24 = sld [smem:[%s5675_s0 + %s4902_s20]]  }
  0x11   :  { %s5037_s30 = sld [smem:[%s5675_s0 + %s4903_s26]]  }
  0x12   :  { %s5042_s6 = sld [smem:[%s5675_s0 + %s4904_s1]]  }
  0x13   :  { %s5047_s12 = sld [smem:[%s5675_s0 + %s4905_s7]]   ;;  %s4909_s7 = smov 18  }
  0x14   :  { %s5052_s20 = sld [smem:[%s5675_s0 + %s4906_s15]]   ;;  %s4910_s15 = smov 19  }
  0x15   :  { %s5057_s27 = sld [smem:[%s5675_s0 + %s4907_s22]]   ;;  %s4911_s22 = smov 20  }
  0x16   :  { %5698 = sst [smem:[#allocation52_spill]] %s5032_s24 }
  0x17   :  { %s5062_s4 = sld [smem:[%s5675_s0 + %s4908_s28]]   ;;  %s4912_s28 = smov 21  }
  0x18   :  { %5699 = sst [smem:[#allocation53_spill]] %s5042_s6 }
  0x19   :  { %s5067_s29 = sld [smem:[%s5675_s0 + %s4909_s7]]   ;;  %s4913_s7 = smov 22  }
  0x1a   :  { %5700 = sst [smem:[#allocation54_spill]] %s5052_s20 }
  0x1b   :  { %s5072_s21 = sld [smem:[%s5675_s0 + %s4910_s15]]   ;;  %s4914_s15 = smov 23  }
  0x1c   :  { %s5077_s24 = sld [smem:[%s5675_s0 + %s4911_s22]]   ;;  %s4915_s22 = smov 24  }
  0x1d   :  { %5701 = sst [smem:[#allocation55_spill]] %s5062_s4 }
  0x1e   :  { %s5082_s5 = sld [smem:[%s5675_s0 + %s4912_s28]]   ;;  %s4916_s28 = smov 25  }
  0x1f   :  { %s5087_s3 = sld [smem:[%s5675_s0 + %s4913_s7]]   ;;  %s4917_s7 = smov 26  }
  0x21   :  { %5702 = sst [smem:[#allocation56_spill]] %s5072_s21 }
  0x22   :  { %5703 = sst [smem:[#allocation57_spill]] %s5077_s24 }
  0x23   :  { %s5092_s21 = sld [smem:[%s5675_s0 + %s4914_s15]]   ;;  %s4918_s15 = smov 27  }
  0x24   :  { %5704 = sst [smem:[#allocation58_spill]] %s5082_s5 }
  0x25   :  { %5705 = sst [smem:[#allocation59_spill]] %s5087_s3 }
  0x26   :  { %s5097_s24 = sld [smem:[%s5675_s0 + %s4915_s22]]   ;;  %s4919_s22 = smov 28  }
  0x27   :  { %s5102_s5 = sld [smem:[%s5675_s0 + %s4916_s28]]   ;;  %s4920_s28 = smov 29  }
  0x28   :  { %s5107_s3 = sld [smem:[%s5675_s0 + %s4917_s7]]   ;;  %s4921_s7 = smov 30  }
  0x29   :  { %s5112_s4 = sld [smem:[%s5675_s0 + %s4918_s15]]   ;;  %s4922_s15 = smov 31  }
  0x2a   :  { %s5132_s20 = sld [smem:[%s5675_s0 + %s4922_s15]]   ;;  %s4926_s15 = smov 35  }
  0x2c   :  { %5706 = sst [smem:[#allocation60_spill]] %s5097_s24 }
  0x2d   :  { %5707 = sst [smem:[#allocation61_spill]] %s5102_s5 }
  0x2e   :  { %5708 = sst [smem:[#allocation62_spill]] %s5107_s3 }
  0x2f   :  { %s5117_s24 = sld [smem:[%s5675_s0 + %s4919_s22]]   ;;  %s4923_s22 = smov 32  }
  0x30   :  { %s5122_s5 = sld [smem:[%s5675_s0 + %s4920_s28]]   ;;  %s4924_s28 = smov 33  }
  0x31   :  { %s5127_s3 = sld [smem:[%s5675_s0 + %s4921_s7]]   ;;  %s4925_s7 = smov 34  }
  0x32   :  { %5711 = sst [smem:[#allocation65_spill]] %s5132_s20 }
  0x33   :  { %s5147_s6 = sld [smem:[%s5675_s0 + %s4925_s7]]  }
  0x34   :  { %s5152_s20 = sld [smem:[%s5675_s0 + %s4926_s15]]  }
  0x35   :  { %5709 = sst [smem:[#allocation63_spill]] %s5117_s24 }
  0x36   :  { %5710 = sst [smem:[#allocation64_spill]] %s5122_s5 }
  0x37   :  { %s5137_s24 = sld [smem:[%s5675_s0 + %s4923_s22]]   ;;  %s4927_s22 = smov 36  }
  0x38   :  { %s5142_s5 = sld [smem:[%s5675_s0 + %s4924_s28]]   ;;  %s4928_s28 = smov 37  }
  0x3d   :  { %5712 = sst [smem:[#allocation66_spill]] %s5137_s24 }
  0x3e   :  { %5713 = sst [smem:[#allocation67_spill]] %s5142_s5 }
  0x3f   :  { %s5157_s24 = sld [smem:[%s5675_s0 + %s4927_s22]]  }
  0x40   :  { %s5162_s5 = sld [smem:[%s5675_s0 + %s4928_s28]]  }
  0x41   :  { %80 = vsyncpa [#allocation3], 0 }
  0x42   :  { %81 = vsyncpa [#allocation5], 0 }
  0x43   :  { %82 = vsyncpa [#allocation8], 0 }
  0x44   :  { %83 = vsyncpa [#allocation11], 0 }
  0x45   :  { %84 = vsyncpa [#allocation14], 0 }
  0x46   :  { %85 = vsyncpa [#allocation17], 0 }
  0x47   :  { %86 = vsyncpa [#allocation20], 0 }
  0x48   :  { %87 = vsyncpa [#allocation23], 0 }
  0x49   :  { %88 = vsyncpa [#allocation26], 0 }
  0x4a   :  { %89 = vsyncpa [#allocation29], 0 }
  0x4b   :  { %90 = vsyncpa [#allocation32], 0 }
  0x4c   :  { %91 = vsyncpa [#allocation35], 0  ;;  %s4929_s7 = smov [#allocation4]   ;;  %s4930_s11 = smov [#allocation7]  }
  0x4d   :  { %s111_s10 = sshll.u32 %s4929_s7, 4  ;;  %s137_s0 = sshll.u32 %s4930_s11, 4  ;;  %s112_s10 = int_to_ptr.vmem [resolvable:$true] %s111_s10  ;;  %s5164_s0 = int_to_ptr.vmem [resolvable:$true] %s137_s0 }
  0x4e   :  { %s4384_s15 = scalar_lea.hbm %s4987_s13, 256 }
  0x4f   :  { %p4385_p0 = scmp.ne.s32.totalorder %s4987_s13, %s4384_s15  ;;  %p4388_p1 = scmp.lt.u32.totalorder %s4384_s15, %s4987_s13 }
  0x51   :  { %p4390_p2 = pnand %p4388_p1, %p4385_p0 }
  0x53   :  { %4393 = shalt.err (!%p4390_p2)
}
  0x54   :  { %s4394_s16 = scalar_lea.vmem %s112_s10, 256  ;;  %p4399_p4 = scmp.lt.s32.totalorder %s112_s10, %s112_s10 }
  0x55   :  { %p4395_p3 = scmp.ne.s32.totalorder %s112_s10, %s4394_s16  ;;  %p4400_p5 = scmp.lt.s32.totalorder %s4394_s16, %s4394_s16 }
  0x57   :  { %p4401_p6 = por %p4400_p5, %p4399_p4 }
  0x59   :  { %p4402_p7 = pnand %p4401_p6, %p4395_p3 }
  0x5b   :  { %4405 = shalt.err (!%p4402_p7)
}
  0x5c   :  { %s4931_s18 = smov 128   ;;  %s4932_s22 = smov 8  }
  0x5d   :  { %117 = dma.hbm_to_vmem [thread:$0]  %s4987_s13, 256, %s112_s10, [#allocation5], %s4931_s18, %s4931_s18, %s4932_s22  }
  0x5e   :  { %s4406_s23 = scalar_lea.hbm %s5002_s25, 256 }
  0x5f   :  { %p4407_p8 = scmp.ne.s32.totalorder %s5002_s25, %s4406_s23  ;;  %p4410_p9 = scmp.lt.u32.totalorder %s4406_s23, %s5002_s25 }
  0x61   :  { %p4412_p10 = pnand %p4410_p9, %p4407_p8 }
  0x63   :  { %4415 = shalt.err (!%p4412_p10)
}
  0x64   :  { %s4416_s26 = scalar_lea.vmem %s5164_s0, 256  ;;  %p4421_p12 = scmp.lt.s32.totalorder %s5164_s0, %s5164_s0 }
  0x65   :  { %p4417_p11 = scmp.ne.s32.totalorder %s5164_s0, %s4416_s26  ;;  %p4422_p13 = scmp.lt.s32.totalorder %s4416_s26, %s4416_s26 }
  0x67   :  { %p4423_p0 = por %p4422_p13, %p4421_p12 }
  0x69   :  { %p4424_p1 = pnand %p4423_p0, %p4417_p11 }
  0x6b   :  { %4427 = shalt.err (!%p4424_p1)
}
  0x6c   :  { %143 = dma.hbm_to_vmem [thread:$0]  %s5002_s25, 256, %s5164_s0, [#allocation8], %s4931_s18, %s4931_s18, %s4932_s22  }
  0x6d   :  { %s4933_s13 = smov [#allocation10]   ;;  %s4934_s1 = smov [#allocation13]  }
  0x6e   :  { %s164_s28 = sshll.u32 %s4933_s13, 4  ;;  %s186_s2 = sshll.u32 %s4934_s1, 4  ;;  %s165_s28 = int_to_ptr.vmem [resolvable:$true] %s164_s28  ;;  %s187_s2 = int_to_ptr.vmem [resolvable:$true] %s186_s2 }
  0x6f   :  { %s4428_s7 = scalar_lea.hbm %s5022_s14, 16 }
  0x70   :  { %p4429_p2 = scmp.ne.s32.totalorder %s5022_s14, %s4428_s7  ;;  %p4432_p3 = scmp.lt.u32.totalorder %s4428_s7, %s5022_s14 }
  0x72   :  { %p4434_p4 = pnand %p4432_p3, %p4429_p2 }
  0x74   :  { %4437 = shalt.err (!%p4434_p4)
}
  0x75   :  { %s4438_s10 = scalar_lea.vmem %s165_s28, 16  ;;  %s4442_s11 = scalar_lea.vmem %s165_s28, 32 }
  0x76   :  { %p4439_p5 = scmp.ne.s32.totalorder %s165_s28, %s4438_s10  ;;  %p4443_p6 = scmp.lt.s32.totalorder %s165_s28, %s165_s28 }
  0x77   :  { %p4444_p7 = scmp.lt.s32.totalorder %s4442_s11, %s4438_s10 }
  0x79   :  { %p4445_p8 = por %p4444_p7, %p4443_p6 }
  0x7b   :  { %p4446_p9 = pnand %p4445_p8, %p4439_p5 }
  0x7d   :  { %4449 = shalt.err (!%p4446_p9)
}
  0x7e   :  { %167 = dma.hbm_to_vmem [thread:$0]  %s5022_s14, 16, %s165_s28, [#allocation11]  }
  0x7f   :  { %s4450_s25 = scalar_lea.hbm %s5037_s30, 16 }
  0x80   :  { %p4451_p10 = scmp.ne.s32.totalorder %s5037_s30, %s4450_s25  ;;  %p4454_p11 = scmp.lt.u32.totalorder %s4450_s25, %s5037_s30 }
  0x82   :  { %p4456_p12 = pnand %p4454_p11, %p4451_p10 }
  0x84   :  { %4459 = shalt.err (!%p4456_p12)
}
  0x85   :  { %s4460_s0 = scalar_lea.vmem %s187_s2, 16  ;;  %s4464_s15 = scalar_lea.vmem %s187_s2, 32 }
  0x86   :  { %p4461_p13 = scmp.ne.s32.totalorder %s187_s2, %s4460_s0  ;;  %p4465_p0 = scmp.lt.s32.totalorder %s187_s2, %s187_s2 }
  0x87   :  { %p4466_p1 = scmp.lt.s32.totalorder %s4464_s15, %s4460_s0 }
  0x89   :  { %p4467_p2 = por %p4466_p1, %p4465_p0 }
  0x8b   :  { %p4468_p3 = pnand %p4467_p2, %p4461_p13 }
  0x8d   :  { %4471 = shalt.err (!%p4468_p3)
}
  0x8e   :  { %189 = dma.hbm_to_vmem [thread:$0]  %s5037_s30, 16, %s187_s2, [#allocation14]  }
  0x8f   :  { %s4935_s16 = smov [#allocation16]   ;;  %s4936_s23 = smov [#allocation19]  }
  0x90   :  { %s206_s14 = sshll.u32 %s4935_s16, 4  ;;  %s228_s26 = sshll.u32 %s4936_s23, 4  ;;  %s207_s14 = int_to_ptr.vmem [resolvable:$true] %s206_s14  ;;  %s229_s26 = int_to_ptr.vmem [resolvable:$true] %s228_s26 }
  0x91   :  { %s4472_s13 = scalar_lea.hbm %s5047_s12, 16 }
  0x92   :  { %p4473_p4 = scmp.ne.s32.totalorder %s5047_s12, %s4472_s13  ;;  %p4476_p5 = scmp.lt.u32.totalorder %s4472_s13, %s5047_s12 }
  0x94   :  { %p4478_p6 = pnand %p4476_p5, %p4473_p4 }
  0x96   :  { %4481 = shalt.err (!%p4478_p6)
}
  0x97   :  { %s4482_s28 = scalar_lea.vmem %s207_s14, 16  ;;  %s4486_s1 = scalar_lea.vmem %s207_s14, 32 }
  0x98   :  { %p4483_p7 = scmp.ne.s32.totalorder %s207_s14, %s4482_s28  ;;  %p4487_p8 = scmp.lt.s32.totalorder %s207_s14, %s207_s14 }
  0x99   :  { %p4488_p9 = scmp.lt.s32.totalorder %s4486_s1, %s4482_s28 }
  0x9b   :  { %p4489_p10 = por %p4488_p9, %p4487_p8 }
  0x9d   :  { %p4490_p11 = pnand %p4489_p10, %p4483_p7 }
  0x9f   :  { %4493 = shalt.err (!%p4490_p11)
}
  0xa0   :  { %209 = dma.hbm_to_vmem [thread:$0]  %s5047_s12, 16, %s207_s14, [#allocation17]  }
  0xa1   :  { %s4494_s30 = scalar_lea.hbm %s5057_s27, 16 }
  0xa2   :  { %p4495_p12 = scmp.ne.s32.totalorder %s5057_s27, %s4494_s30  ;;  %p4498_p13 = scmp.lt.u32.totalorder %s4494_s30, %s5057_s27 }
  0xa4   :  { %p4500_p0 = pnand %p4498_p13, %p4495_p12 }
  0xa6   :  { %4503 = shalt.err (!%p4500_p0)
}
  0xa7   :  { %s4504_s2 = scalar_lea.vmem %s229_s26, 16  ;;  %s4508_s7 = scalar_lea.vmem %s229_s26, 32 }
  0xa8   :  { %p4505_p1 = scmp.ne.s32.totalorder %s229_s26, %s4504_s2  ;;  %p4509_p2 = scmp.lt.s32.totalorder %s229_s26, %s229_s26 }
  0xa9   :  { %p4510_p3 = scmp.lt.s32.totalorder %s4508_s7, %s4504_s2 }
  0xab   :  { %p4511_p4 = por %p4510_p3, %p4509_p2 }
  0xad   :  { %p4512_p5 = pnand %p4511_p4, %p4505_p1 }
  0xaf   :  { %4515 = shalt.err (!%p4512_p5)
}
  0xb0   :  { %231 = dma.hbm_to_vmem [thread:$0]  %s5057_s27, 16, %s229_s26, [#allocation20]  }
  0xb1   :  { %s4937_s10 = smov [#allocation22]   ;;  %s4938_s11 = smov [#allocation25]  }
  0xb2   :  { %s249_s12 = sshll.u32 %s4937_s10, 4  ;;  %s280_s25 = sshll.u32 %s4938_s11, 4  ;;  %s250_s12 = int_to_ptr.vmem [resolvable:$true] %s249_s12  ;;  %s281_s25 = int_to_ptr.vmem [resolvable:$true] %s280_s25 }
  0xb3   :  { %s4516_s0 = scalar_lea.hbm %s5067_s29, 256 }
  0xb4   :  { %p4517_p6 = scmp.ne.s32.totalorder %s5067_s29, %s4516_s0  ;;  %p4520_p7 = scmp.lt.u32.totalorder %s4516_s0, %s5067_s29 }
  0xb6   :  { %p4522_p8 = pnand %p4520_p7, %p4517_p6 }
  0xb8   :  { %4525 = shalt.err (!%p4522_p8)
}
  0xb9   :  { %s4526_s15 = scalar_lea.vmem %s250_s12, 256  ;;  %p4531_p10 = scmp.lt.s32.totalorder %s250_s12, %s250_s12 }
  0xba   :  { %p4527_p9 = scmp.ne.s32.totalorder %s250_s12, %s4526_s15  ;;  %p4532_p11 = scmp.lt.s32.totalorder %s4526_s15, %s4526_s15 }
  0xbc   :  { %p4533_p12 = por %p4532_p11, %p4531_p10 }
  0xbe   :  { %p4534_p13 = pnand %p4533_p12, %p4527_p9 }
  0xc0   :  { %4537 = shalt.err (!%p4534_p13)
}
  0xc1   :  { %255 = dma.hbm_to_vmem [thread:$0]  %s5067_s29, 256, %s250_s12, [#allocation23], %s4931_s18, %s4931_s18, %s4932_s22  }
  0xc2   :  { %s4538_s27 = scalar_lea.hbm %s5092_s21, 16 }
  0xc3   :  { %p4539_p0 = scmp.ne.s32.totalorder %s5092_s21, %s4538_s27  ;;  %p4542_p1 = scmp.lt.u32.totalorder %s4538_s27, %s5092_s21 }
  0xc5   :  { %p4544_p2 = pnand %p4542_p1, %p4539_p0 }
  0xc7   :  { %4547 = shalt.err (!%p4544_p2)
}
  0xc8   :  { %s4548_s16 = scalar_lea.vmem %s281_s25, 16  ;;  %s4552_s14 = scalar_lea.vmem %s281_s25, 32 }
  0xc9   :  { %p4549_p3 = scmp.ne.s32.totalorder %s281_s25, %s4548_s16  ;;  %p4553_p4 = scmp.lt.s32.totalorder %s281_s25, %s281_s25 }
  0xca   :  { %p4554_p5 = scmp.lt.s32.totalorder %s4552_s14, %s4548_s16 }
  0xcc   :  { %p4555_p6 = por %p4554_p5, %p4553_p4 }
  0xce   :  { %p4556_p7 = pnand %p4555_p6, %p4549_p3 }
  0xd0   :  { %4559 = shalt.err (!%p4556_p7)
}
  0xd1   :  { %283 = dma.hbm_to_vmem [thread:$0]  %s5092_s21, 16, %s281_s25, [#allocation26]  }
  0xd2   :  { %s4939_s23 = smov [#allocation28]   ;;  %s4940_s26 = smov [#allocation31]  }
  0xd3   :  { %s303_s29 = sshll.u32 %s4939_s23, 4  ;;  %s327_s13 = sshll.u32 %s4940_s26, 4  ;;  %s304_s29 = int_to_ptr.vmem [resolvable:$true] %s303_s29  ;;  %s5212_s13 = int_to_ptr.vmem [resolvable:$true] %s327_s13 }
  0xd4   :  { %s4560_s28 = scalar_lea.hbm %s5112_s4, 512 }
  0xd5   :  { %p4561_p8 = scmp.ne.s32.totalorder %s5112_s4, %s4560_s28  ;;  %p4564_p9 = scmp.lt.u32.totalorder %s4560_s28, %s5112_s4 }
  0xd7   :  { %p4566_p10 = pnand %p4564_p9, %p4561_p8 }
  0xd9   :  { %4569 = shalt.err (!%p4566_p10)
}
  0xda   :  { %s4570_s1 = scalar_lea.vmem %s304_s29, 512  ;;  %p4575_p12 = scmp.lt.s32.totalorder %s304_s29, %s304_s29 }
  0xdb   :  { %p4571_p11 = scmp.ne.s32.totalorder %s304_s29, %s4570_s1  ;;  %p4576_p13 = scmp.lt.s32.totalorder %s4570_s1, %s4570_s1 }
  0xdd   :  { %p4577_p0 = por %p4576_p13, %p4575_p12 }
  0xdf   :  { %p4578_p1 = pnand %p4577_p0, %p4571_p11 }
  0xe1   :  { %4581 = shalt.err (!%p4578_p1)
}
  0xe2   :  { %309 = dma.hbm_to_vmem [thread:$0]  %s5112_s4, 512, %s304_s29, [#allocation29], %s4931_s18, %s4931_s18, %s4932_s22  }
  0xe3   :  { %s4582_s21 = scalar_lea.hbm %s5127_s3, 512 }
  0xe4   :  { %p4583_p2 = scmp.ne.s32.totalorder %s5127_s3, %s4582_s21  ;;  %p4586_p3 = scmp.lt.u32.totalorder %s4582_s21, %s5127_s3 }
  0xe6   :  { %p4588_p4 = pnand %p4586_p3, %p4583_p2 }
  0xe8   :  { %4591 = shalt.err (!%p4588_p4)
}
  0xe9   :  { %s4592_s30 = scalar_lea.vmem %s5212_s13, 512  ;;  %p4597_p6 = scmp.lt.s32.totalorder %s5212_s13, %s5212_s13 }
  0xea   :  { %p4593_p5 = scmp.ne.s32.totalorder %s5212_s13, %s4592_s30  ;;  %p4598_p7 = scmp.lt.s32.totalorder %s4592_s30, %s4592_s30 }
  0xec   :  { %p4599_p8 = por %p4598_p7, %p4597_p6 }
  0xee   :  { %p4600_p9 = pnand %p4599_p8, %p4593_p5 }
  0xf0   :  { %4603 = shalt.err (!%p4600_p9)
}
  0xf1   :  { %333 = dma.hbm_to_vmem [thread:$0]  %s5127_s3, 512, %s5212_s13, [#allocation32], %s4931_s18, %s4931_s18, %s4932_s22  }
  0xf2   :  { %s4941_s4 = smov [#allocation2]   ;;  %s4942_s7 = smov [#allocation6]  }
  0xf3   :  { %s99_s2 = sshll.u32 %s4941_s4, 4  ;;  %s123_s10 = sshll.u32 %s4942_s7, 4  ;;  %s100_s2 = int_to_ptr.vmem [resolvable:$true] %s99_s2  ;;  %s5233_s10 = int_to_ptr.vmem [resolvable:$true] %s123_s10 }
  0xf4   :  { %s4604_s12 = scalar_lea.hbm %s4982_s9, 256 }
  0xf5   :  { %p4605_p10 = scmp.ne.s32.totalorder %s4982_s9, %s4604_s12  ;;  %p4608_p11 = scmp.lt.u32.totalorder %s4604_s12, %s4982_s9 }
  0xf7   :  { %p4610_p12 = pnand %p4608_p11, %p4605_p10 }
  0xf9   :  { %4613 = shalt.err (!%p4610_p12)
}
  0xfa   :  { %s4614_s11 = scalar_lea.vmem %s100_s2, 256  ;;  %p4619_p0 = scmp.lt.s32.totalorder %s100_s2, %s100_s2 }
  0xfb   :  { %p4615_p13 = scmp.ne.s32.totalorder %s100_s2, %s4614_s11  ;;  %p4620_p1 = scmp.lt.s32.totalorder %s4614_s11, %s4614_s11 }
  0xfd   :  { %p4621_p2 = por %p4620_p1, %p4619_p0 }
  0xff   :  { %p4622_p3 = pnand %p4621_p2, %p4615_p13 }
 0x101   :  { %4625 = shalt.err (!%p4622_p3)
}
 0x102   :  { %105 = dma.hbm_to_vmem [thread:$0]  %s4982_s9, 256, %s100_s2, [#allocation3], %s4931_s18, %s4931_s18, %s4932_s22  }
 0x103   :  { %s4626_s3 = scalar_lea.hbm %s4992_s17, 256 }
 0x104   :  { %p4627_p4 = scmp.ne.s32.totalorder %s4992_s17, %s4626_s3  ;;  %p4630_p5 = scmp.lt.u32.totalorder %s4626_s3, %s4992_s17 }
 0x106   :  { %p4632_p6 = pnand %p4630_p5, %p4627_p4 }
 0x108   :  { %4635 = shalt.err (!%p4632_p6)
}
 0x109   :  { %s4636_s25 = scalar_lea.vmem %s5233_s10, 256  ;;  %p4641_p8 = scmp.lt.s32.totalorder %s5233_s10, %s5233_s10 }
 0x10a   :  { %p4637_p7 = scmp.ne.s32.totalorder %s5233_s10, %s4636_s25  ;;  %p4642_p9 = scmp.lt.s32.totalorder %s4636_s25, %s4636_s25 }
 0x10c   :  { %p4643_p10 = por %p4642_p9, %p4641_p8 }
 0x10e   :  { %p4644_p11 = pnand %p4643_p10, %p4637_p7 }
 0x110   :  { %4647 = shalt.err (!%p4644_p11)
}
 0x111   :  { %129 = dma.hbm_to_vmem [thread:$0]  %s4992_s17, 256, %s5233_s10, [#allocation5], %s4931_s18, %s4931_s18, %s4932_s22  }
 0x112   :  { %s4943_s9 = smov [#allocation9]   ;;  %s4944_s15 = smov [#allocation12]  }
 0x113   :  { %s154_s0 = sshll.u32 %s4943_s9, 4  ;;  %s174_s27 = sshll.u32 %s4944_s15, 4  ;;  %s155_s0 = int_to_ptr.vmem [resolvable:$true] %s154_s0  ;;  %s175_s27 = int_to_ptr.vmem [resolvable:$true] %s174_s27 }
 0x114   :  { %s4648_s16 = scalar_lea.hbm %s5017_s8, 16 }
 0x115   :  { %p4649_p12 = scmp.ne.s32.totalorder %s5017_s8, %s4648_s16  ;;  %p4652_p13 = scmp.lt.u32.totalorder %s4648_s16, %s5017_s8 }
 0x117   :  { %p4654_p0 = pnand %p4652_p13, %p4649_p12 }
 0x119   :  { %4657 = shalt.err (!%p4654_p0)
}
 0x11a   :  { %s4658_s14 = scalar_lea.vmem %s155_s0, 16  ;;  %s4662_s23 = scalar_lea.vmem %s155_s0, 32 }
 0x11b   :  { %p4659_p1 = scmp.ne.s32.totalorder %s155_s0, %s4658_s14  ;;  %p4663_p2 = scmp.lt.s32.totalorder %s155_s0, %s155_s0 }
 0x11c   :  { %p4664_p3 = scmp.lt.s32.totalorder %s4662_s23, %s4658_s14 }
 0x11e   :  { %p4665_p4 = por %p4664_p3, %p4663_p2 }
 0x120   :  { %p4666_p5 = pnand %p4665_p4, %p4659_p1 }
 0x122   :  { %4669 = shalt.err (!%p4666_p5)
}
 0x123   :  { %157 = dma.hbm_to_vmem [thread:$0]  %s5017_s8, 16, %s155_s0, [#allocation8]  }
 0x124   :  { %s4670_s17 = scalar_lea.hbm %s5027_s19, 16 }
 0x125   :  { %p4671_p6 = scmp.ne.s32.totalorder %s5027_s19, %s4670_s17  ;;  %p4674_p7 = scmp.lt.u32.totalorder %s4670_s17, %s5027_s19 }
 0x127   :  { %p4676_p8 = pnand %p4674_p7, %p4671_p6 }
 0x129   :  { %4679 = shalt.err (!%p4676_p8)
}
 0x12a   :  { %s4680_s29 = scalar_lea.vmem %s175_s27, 16  ;;  %s4684_s26 = scalar_lea.vmem %s175_s27, 32 }
 0x12b   :  { %p4681_p9 = scmp.ne.s32.totalorder %s175_s27, %s4680_s29  ;;  %p4685_p10 = scmp.lt.s32.totalorder %s175_s27, %s175_s27 }
 0x12c   :  { %p4686_p11 = scmp.lt.s32.totalorder %s4684_s26, %s4680_s29 }
 0x12e   :  { %p4687_p12 = por %p4686_p11, %p4685_p10 }
 0x130   :  { %p4688_p13 = pnand %p4687_p12, %p4681_p9 }
 0x132   :  { %4691 = shalt.err (!%p4688_p13)
}
 0x133   :  { %s5714_s13 = sld [smem:[#allocation53_spill]]  ;;  %s4945_s28 = smov [#allocation15]  }
 0x134   :  { %177 = dma.hbm_to_vmem [thread:$0]  %s5027_s19, 16, %s175_s27, [#allocation11]  }
 0x135   :  { %s196_s8 = sshll.u32 %s4945_s28, 4  ;;  %s4946_s1 = smov [#allocation18]   ;;  %s197_s8 = int_to_ptr.vmem [resolvable:$true] %s196_s8 }
 0x136   :  { %s215_s21 = sshll.u32 %s4946_s1, 4  ;;  %s5262_s21 = int_to_ptr.vmem [resolvable:$true] %s215_s21 }
 0x139   :  { %s4692_s30 = scalar_lea.hbm %s5714_s13, 16 }
 0x13a   :  { %p4693_p0 = scmp.ne.s32.totalorder %s5714_s13, %s4692_s30  ;;  %p4696_p1 = scmp.lt.u32.totalorder %s4692_s30, %s5714_s13 }
 0x13c   :  { %p4698_p2 = pnand %p4696_p1, %p4693_p0 }
 0x13e   :  { %4701 = shalt.err (!%p4698_p2)
}
 0x13f   :  { %s4702_s4 = scalar_lea.vmem %s197_s8, 16  ;;  %s4706_s2 = scalar_lea.vmem %s197_s8, 32 }
 0x140   :  { %p4703_p3 = scmp.ne.s32.totalorder %s197_s8, %s4702_s4  ;;  %p4707_p4 = scmp.lt.s32.totalorder %s197_s8, %s197_s8 }
 0x141   :  { %p4708_p5 = scmp.lt.s32.totalorder %s4706_s2, %s4702_s4 }
 0x143   :  { %p4709_p6 = por %p4708_p5, %p4707_p4 }
 0x145   :  { %p4710_p7 = pnand %p4709_p6, %p4703_p3 }
 0x147   :  { %4713 = shalt.err (!%p4710_p7)
}
 0x148   :  { %s5715_s19 = sld [smem:[#allocation54_spill]] }
 0x149   :  { %199 = dma.hbm_to_vmem [thread:$0]  %s5714_s13, 16, %s197_s8, [#allocation14]  }
 0x14e   :  { %s4714_s7 = scalar_lea.hbm %s5715_s19, 1536 }
 0x14f   :  { %p4715_p8 = scmp.ne.s32.totalorder %s5715_s19, %s4714_s7  ;;  %p4718_p9 = scmp.lt.u32.totalorder %s4714_s7, %s5715_s19 }
 0x151   :  { %p4720_p10 = pnand %p4718_p9, %p4715_p8 }
 0x153   :  { %4723 = shalt.err (!%p4720_p10)
}
 0x154   :  { %s4724_s10 = scalar_lea.vmem %s5262_s21, 1536  ;;  %p4729_p12 = scmp.lt.s32.totalorder %s5262_s21, %s5262_s21 }
 0x155   :  { %p4725_p11 = scmp.ne.s32.totalorder %s5262_s21, %s4724_s10  ;;  %p4730_p13 = scmp.lt.s32.totalorder %s4724_s10, %s4724_s10 }
 0x157   :  { %p4731_p0 = por %p4730_p13, %p4729_p12 }
 0x159   :  { %p4732_p1 = pnand %p4731_p0, %p4725_p11 }
 0x15b   :  { %4735 = shalt.err (!%p4732_p1)
}
 0x15c   :  { %s5716_s12 = sld [smem:[#allocation55_spill]]  ;;  %s4947_s11 = smov [#allocation21]  }
 0x15d   :  { %221 = dma.hbm_to_vmem [thread:$0]  %s5715_s19, 1536, %s5262_s21, [#allocation17], %s4931_s18, %s4931_s18, %s4932_s22  }
 0x15e   :  { %s237_s3 = sshll.u32 %s4947_s11, 4  ;;  %s4948_s25 = smov [#allocation24]   ;;  %s238_s3 = int_to_ptr.vmem [resolvable:$true] %s237_s3 }
 0x15f   :  { %s263_s9 = sshll.u32 %s4948_s25, 4  ;;  %s5280_s9 = int_to_ptr.vmem [resolvable:$true] %s263_s9 }
 0x162   :  { %s4736_s0 = scalar_lea.hbm %s5716_s12, 256 }
 0x163   :  { %p4737_p2 = scmp.ne.s32.totalorder %s5716_s12, %s4736_s0  ;;  %p4740_p3 = scmp.lt.u32.totalorder %s4736_s0, %s5716_s12 }
 0x165   :  { %p4742_p4 = pnand %p4740_p3, %p4737_p2 }
 0x167   :  { %4745 = shalt.err (!%p4742_p4)
}
 0x168   :  { %s4746_s15 = scalar_lea.vmem %s238_s3, 256  ;;  %p4751_p6 = scmp.lt.s32.totalorder %s238_s3, %s238_s3 }
 0x169   :  { %p4747_p5 = scmp.ne.s32.totalorder %s238_s3, %s4746_s15  ;;  %p4752_p7 = scmp.lt.s32.totalorder %s4746_s15, %s4746_s15 }
 0x16b   :  { %p4753_p8 = por %p4752_p7, %p4751_p6 }
 0x16d   :  { %p4754_p9 = pnand %p4753_p8, %p4747_p5 }
 0x16f   :  { %4757 = shalt.err (!%p4754_p9)
}
 0x170   :  { %s5717_s27 = sld [smem:[#allocation57_spill]] }
 0x171   :  { %243 = dma.hbm_to_vmem [thread:$0]  %s5716_s12, 256, %s238_s3, [#allocation20], %s4931_s18, %s4931_s18, %s4932_s22  }
 0x176   :  { %s4758_s16 = scalar_lea.hbm %s5717_s27, 1152 }
 0x177   :  { %p4759_p10 = scmp.ne.s32.totalorder %s5717_s27, %s4758_s16  ;;  %p4762_p11 = scmp.lt.u32.totalorder %s4758_s16, %s5717_s27 }
 0x179   :  { %p4764_p12 = pnand %p4762_p11, %p4759_p10 }
 0x17b   :  { %4767 = shalt.err (!%p4764_p12)
}
 0x17c   :  { %s4768_s14 = scalar_lea.vmem %s5280_s9, 1152  ;;  %p4773_p0 = scmp.lt.s32.totalorder %s5280_s9, %s5280_s9 }
 0x17d   :  { %p4769_p13 = scmp.ne.s32.totalorder %s5280_s9, %s4768_s14  ;;  %p4774_p1 = scmp.lt.s32.totalorder %s4768_s14, %s4768_s14 }
 0x17f   :  { %p4775_p2 = por %p4774_p1, %p4773_p0 }
 0x181   :  { %p4776_p3 = pnand %p4775_p2, %p4769_p13 }
 0x183   :  { %4779 = shalt.err (!%p4776_p3)
}
 0x184   :  { %s4949_s23 = smov 384   ;;  %s5718_s17 = sld [smem:[#allocation62_spill]] }
 0x185   :  { %s4950_s29 = smov 24   ;;  %s4951_s26 = smov [#allocation27]  }
 0x186   :  { %269 = dma.hbm_to_vmem [thread:$0]  %s5717_s27, 1152, %s5280_s9, [#allocation23], %s4949_s23, %s4949_s23, %s4950_s29  }
 0x187   :  { %s294_s13 = sshll.u32 %s4951_s26, 4  ;;  %s4952_s28 = smov [#allocation30]   ;;  %s295_s13 = int_to_ptr.vmem [resolvable:$true] %s294_s13 }
 0x188   :  { %s316_s8 = sshll.u32 %s4952_s28, 4  ;;  %s317_s8 = int_to_ptr.vmem [resolvable:$true] %s316_s8 }
 0x18a   :  { %s4780_s1 = scalar_lea.hbm %s5718_s17, 16 }
 0x18b   :  { %p4781_p4 = scmp.ne.s32.totalorder %s5718_s17, %s4780_s1  ;;  %p4784_p5 = scmp.lt.u32.totalorder %s4780_s1, %s5718_s17 }
 0x18d   :  { %p4786_p6 = pnand %p4784_p5, %p4781_p4 }
 0x18f   :  { %4789 = shalt.err (!%p4786_p6)
}
 0x190   :  { %s4790_s21 = scalar_lea.vmem %s295_s13, 16  ;;  %s4794_s30 = scalar_lea.vmem %s295_s13, 32 }
 0x191   :  { %p4791_p7 = scmp.ne.s32.totalorder %s295_s13, %s4790_s21  ;;  %p4795_p8 = scmp.lt.s32.totalorder %s295_s13, %s295_s13 }
 0x192   :  { %p4796_p9 = scmp.lt.s32.totalorder %s4794_s30, %s4790_s21 }
 0x194   :  { %p4797_p10 = por %p4796_p9, %p4795_p8 }
 0x196   :  { %p4798_p11 = pnand %p4797_p10, %p4791_p7 }
 0x198   :  { %4801 = shalt.err (!%p4798_p11)
}
 0x199   :  { %s5719_s4 = sld [smem:[#allocation63_spill]] }
 0x19a   :  { %297 = dma.hbm_to_vmem [thread:$0]  %s5718_s17, 16, %s295_s13, [#allocation26]  }
 0x19f   :  { %s4802_s2 = scalar_lea.hbm %s5719_s4, 16 }
 0x1a0   :  { %p4803_p12 = scmp.ne.s32.totalorder %s5719_s4, %s4802_s2  ;;  %p4806_p13 = scmp.lt.u32.totalorder %s4802_s2, %s5719_s4 }
 0x1a2   :  { %p4808_p0 = pnand %p4806_p13, %p4803_p12 }
 0x1a4   :  { %4811 = shalt.err (!%p4808_p0)
}
 0x1a5   :  { %s4812_s19 = scalar_lea.vmem %s317_s8, 16  ;;  %s4816_s7 = scalar_lea.vmem %s317_s8, 32 }
 0x1a6   :  { %p4813_p1 = scmp.ne.s32.totalorder %s317_s8, %s4812_s19  ;;  %p4817_p2 = scmp.lt.s32.totalorder %s317_s8, %s317_s8 }
 0x1a7   :  { %p4818_p3 = scmp.lt.s32.totalorder %s4816_s7, %s4812_s19 }
 0x1a9   :  { %p4819_p4 = por %p4818_p3, %p4817_p2 }
 0x1ab   :  { %p4820_p5 = pnand %p4819_p4, %p4813_p1 }
 0x1ad   :  { %4823 = shalt.err (!%p4820_p5)
}
 0x1ae   :  { %s5720_s10 = sld [smem:[#allocation66_spill]]  ;;  %s4953_s12 = smov [#allocation33]  }
 0x1af   :  { %319 = dma.hbm_to_vmem [thread:$0]  %s5719_s4, 16, %s317_s8, [#allocation29]  }
 0x1b0   :  { %s341_s11 = sshll.u32 %s4953_s12, 4  ;;  %s4954_s3 = smov [#allocation34]   ;;  %s342_s11 = int_to_ptr.vmem [resolvable:$true] %s341_s11 }
 0x1b1   :  { %s355_s25 = sshll.u32 %s4954_s3, 4  ;;  %s5306_s25 = int_to_ptr.vmem [resolvable:$true] %s355_s25 }
 0x1b4   :  { %s4824_s9 = scalar_lea.hbm %s5720_s10, 256 }
 0x1b5   :  { %p4825_p6 = scmp.ne.s32.totalorder %s5720_s10, %s4824_s9  ;;  %p4828_p7 = scmp.lt.u32.totalorder %s4824_s9, %s5720_s10 }
 0x1b7   :  { %p4830_p8 = pnand %p4828_p7, %p4825_p6 }
 0x1b9   :  { %4833 = shalt.err (!%p4830_p8)
}
 0x1ba   :  { %s4834_s0 = scalar_lea.vmem %s342_s11, 256  ;;  %p4839_p10 = scmp.lt.s32.totalorder %s342_s11, %s342_s11 }
 0x1bb   :  { %p4835_p9 = scmp.ne.s32.totalorder %s342_s11, %s4834_s0  ;;  %p4840_p11 = scmp.lt.s32.totalorder %s4834_s0, %s4834_s0 }
 0x1bd   :  { %p4841_p12 = por %p4840_p11, %p4839_p10 }
 0x1bf   :  { %p4842_p13 = pnand %p4841_p12, %p4835_p9 }
 0x1c1   :  { %4845 = shalt.err (!%p4842_p13)
}
 0x1c2   :  { %347 = dma.hbm_to_vmem [thread:$0]  %s5720_s10, 256, %s342_s11, [#allocation32], %s4931_s18, %s4931_s18, %s4932_s22  }
 0x1c3   :  { %s4846_s15 = scalar_lea.hbm %s5147_s6, 512 }
 0x1c4   :  { %p4847_p0 = scmp.ne.s32.totalorder %s5147_s6, %s4846_s15  ;;  %p4850_p1 = scmp.lt.u32.totalorder %s4846_s15, %s5147_s6 }
 0x1c6   :  { %p4852_p2 = pnand %p4850_p1, %p4847_p0 }
 0x1c8   :  { %4855 = shalt.err (!%p4852_p2)
}
 0x1c9   :  { %s4856_s27 = scalar_lea.vmem %s5306_s25, 512  ;;  %p4861_p4 = scmp.lt.s32.totalorder %s5306_s25, %s5306_s25 }
 0x1ca   :  { %p4857_p3 = scmp.ne.s32.totalorder %s5306_s25, %s4856_s27  ;;  %p4862_p5 = scmp.lt.s32.totalorder %s4856_s27, %s4856_s27 }
 0x1cc   :  { %p4863_p6 = por %p4862_p5, %p4861_p4 }
 0x1ce   :  { %p4864_p7 = pnand %p4863_p6, %p4857_p3 }
 0x1d0   :  { %4867 = shalt.err (!%p4864_p7)
}
 0x1d1   :  { %361 = dma.hbm_to_vmem [thread:$0]  %s5147_s6, 512, %s5306_s25, [#allocation35], %s4931_s18, %s4931_s18, %s4932_s22  }
 0x1d2   :  { %4868 = dma.done.wait [#allocation3], 256  }
 0x1d3   :  { %4869 = vsyncadd [#allocation3], 4294967040 }
 0x1d4   :  { %4870 = dma.done.wait [#allocation5], 512  }
 0x1d5   :  { %4871 = vsyncadd [#allocation5], 4294966784 }
 0x1d6   :  { %4872 = dma.done.wait [#allocation8], 272  }
 0x1d7   :  { %4873 = vsyncadd [#allocation8], 4294967024 }
 0x1d8   :  { %4874 = dma.done.wait [#allocation11], 32  }
 0x1d9   :  { %4875 = vsyncadd [#allocation11], 4294967264 }
 0x1da   :  { %4876 = dma.done.wait [#allocation14], 32  }
 0x1db   :  { %4877 = vsyncadd [#allocation14], 4294967264 }
 0x1dc   :  { %4878 = dma.done.wait [#allocation17], 1552  }
 0x1dd   :  { %4879 = vsyncadd [#allocation17], 4294965744 }
 0x1de   :  { %4880 = dma.done.wait [#allocation20], 272  }
 0x1df   :  { %4881 = vsyncadd [#allocation20], 4294967024 }
 0x1e0   :  { %4882 = dma.done.wait [#allocation23], 1408  }
 0x1e1   :  { %4883 = vsyncadd [#allocation23], 4294965888 }
 0x1e2   :  { %4884 = dma.done.wait [#allocation26], 32  }
 0x1e3   :  { %4885 = vsyncadd [#allocation26], 4294967264 }
 0x1e4   :  { %4886 = dma.done.wait [#allocation29], 528  }
 0x1e5   :  { %4887 = vsyncadd [#allocation29], 4294966768 }
 0x1e6   :  { %4888 = dma.done.wait [#allocation32], 768  }
 0x1e7   :  { %4889 = vsyncadd [#allocation32], 4294966528 }
 0x1e8   :  { %4890 = dma.done.wait [#allocation35], 512  }
 0x1e9   :  { %4891 = vsyncadd [#allocation35], 4294966784  ;;  %s5721_s6 = sld [smem:[#allocation51_spill]]  ;;  %vm468_vm0 = vcmask 785408   ;;  %v447_v8 = vld [vmem:[#allocation2] sm:$0xff]  ;;  %s5722_s18 = sld [smem:[#allocation48_spill]] }
 0x1ea   :  { %3666 = vmatprep.mubr.msk.f32.mxu0 %vm468_vm0, %v447_v8  ;;  %v448_v19 = vld [vmem:[#allocation2 + $0x8] sm:$0xff]  ;;  %s4955_s22 = smov 127   ;;  %s4956_s16 = smov 126   ;;  %v3368_v21 = vld [vmem:[#allocation9] ss:$0 sm:$0xff]  ;;  %vm861_vm5 = vcmask 1043456  }
 0x1eb   :  { %s4957_s14 = smov 125   ;;  %s5723_s23 = sld [smem:[#allocation52_spill]]  ;;  %vm4958_vm6 = vmmov 1   ;;  %vm854_vm8 = vcmask 97280   ;;  %vm1035_vm9 = vcmask 293888   ;;  %vm1241_vm12 = vcmask 1041408  }
 0x1ec   :  { %vm4056_vm7 = vmpackc.low %vm861_vm5, %vm4958_vm6  ;;  %s5724_s28 = sld [smem:[#allocation56_spill]]  ;;  %s4959_s8 = smov 116   ;;  %vm1220_vm13 = vcmask 48128   ;;  %vm1234_vm14 = vcmask 146432   ;;  %vm1617_vm15 = vcmask 261120   ;;  %vm2250_vm6 = vcmask 15360  }
 0x1ed   :  { %s4960_s1 = smov 122   ;;  %s4961_s21 = smov 12  }
 0x1ee   :  { %s4962_s30 = smov 6   ;;  %s5725_s4 = sld [smem:[#allocation58_spill]] }
 0x1ef   :  { %v449_v0 = vld [vmem:[%s5721_s6] sm:$0xff]  ;;  %v450_v1 = vld [vmem:[%s5721_s6 + $0x8] sm:$0xff]  ;;  %v451_v2 = vld [vmem:[%s5721_s6 + $0x10] sm:$0xff]  ;;  %s4964_s2 = smov 104   ;;  %s5726_s19 = sld [smem:[#allocation59_spill]] }
 0x1f0   :  { %v3983_v3 = vpack.c.bf16 %v450_v1, %v449_v0  ;;  %v452_v4 = vld [vmem:[%s5721_s6 + $0x18] sm:$0xff]  ;;  %v453_v6 = vld [vmem:[%s5721_s6 + $0x20] sm:$0xff]  ;;  %v454_v7 = vld [vmem:[%s5721_s6 + $0x28] sm:$0xff]  ;;  %s4965_s7 = smov 32   ;;  %s5727_s10 = sld [smem:[#allocation60_spill]] }
 0x1f1   :  { %v3987_v5 = vpack.c.bf16 %v452_v4, %v451_v2  ;;  %v3991_v9 = vpack.c.bf16 %v454_v7, %v453_v6  ;;  %v455_v10 = vld [vmem:[%s5721_s6 + $0x30] sm:$0xff]  ;;  %v456_v11 = vld [vmem:[%s5721_s6 + $0x38] sm:$0xff]  ;;  %v457_v13 = vld [vmem:[%s5721_s6 + $0x40] sm:$0xff]  ;;  %s4966_s12 = smov 64   ;;  %s5728_s11 = sld [smem:[#allocation49_spill]] }
 0x1f2   :  { %3984 = vmatprep.subr.bf16.mxu0 %v3983_v3  ;;  %v3995_v12 = vpack.c.bf16 %v456_v11, %v455_v10  ;;  %v458_v14 = vld [vmem:[%s5721_s6 + $0x48] sm:$0xff]  ;;  %v459_v16 = vld [vmem:[%s5721_s6 + $0x50] sm:$0xff]  ;;  %v460_v17 = vld [vmem:[%s5721_s6 + $0x58] sm:$0xff]  ;;  %s5729_s3 = sld [smem:[#allocation61_spill]]  ;;  %s5730_s25 = sld [smem:[#allocation64_spill]] }
 0x1f3   :  { %3986 = vmatpush3.bf16.msra.mxu0 %v3983_v3  ;;  %v3999_v15 = vpack.c.bf16 %v458_v14, %v457_v13  ;;  %v4003_v18 = vpack.c.bf16 %v460_v17, %v459_v16  ;;  %v432_v20 = vld [vmem:[%s5722_s18] sm:$0x1]  ;;  %v603_v42 = vld [vmem:[%s5723_s23 + $0x8] sm:$0xff]  ;;  %v604_v44 = vld [vmem:[%s5723_s23 + $0x10] sm:$0xff]  ;;  %s4967_s9 = smov 120   ;;  %s5731_s15 = sld [smem:[#allocation50_spill]] }
 0x1f4   :  { %3988 = vmatprep.subr.bf16.mxu0 %v3987_v5  ;;  %435 = vrot.lane.b32.xlu1 %v432_v20, %s4955_s22  ;;  %4255 = vpush %v432_v20  ;;  %v602_v41 = vld [vmem:[%s5723_s23] sm:$0xff]  ;;  %v605_v45 = vld [vmem:[%s5723_s23 + $0x18] sm:$0xff]  ;;  %v607_v48 = vld [vmem:[%s5723_s23 + $0x28] sm:$0xff]  ;;  %s5732_s27 = sld [smem:[#allocation65_spill]]  ;;  %s5733_s6 = sld [smem:[#allocation67_spill]] }
 0x1f5   :  { %v4007_v43 = vpack.c.bf16 %v603_v42, %v602_v41  ;;  %v4011_v46 = vpack.c.bf16 %v605_v45, %v604_v44  ;;  %v606_v47 = vld [vmem:[%s5723_s23 + $0x20] sm:$0xff]  ;;  %v608_v49 = vld [vmem:[%s5723_s23 + $0x30] sm:$0xff]  ;;  %v609_v51 = vld [vmem:[%s5723_s23 + $0x38] sm:$0xff] }
 0x1f6   :  { %v4015_v50 = vpack.c.bf16 %v607_v48, %v606_v47  ;;  %v4019_v52 = vpack.c.bf16 %v609_v51, %v608_v49  ;;  %v610_v53 = vld [vmem:[%s5723_s23 + $0x40] sm:$0xff]  ;;  %v611_v54 = vld [vmem:[%s5723_s23 + $0x48] sm:$0xff]  ;;  %v612_v56 = vld [vmem:[%s5723_s23 + $0x50] sm:$0xff] }
 0x1f7   :  { %3990 = vmatpush3.bf16.msra.mxu0 %v3987_v5  ;;  %4008 = vmatprep.subr.bf16.mxu1 %v4007_v43  ;;  %v4023_v55 = vpack.c.bf16 %v611_v54, %v610_v53  ;;  %v613_v57 = vld [vmem:[%s5723_s23 + $0x58] sm:$0xff]  ;;  %v3371_v2 = vld [vmem:[#allocation10] ss:$0 sm:$0xff]  ;;  %v3372_v4 = vld [vmem:[#allocation12] ss:$0 sm:$0xff] }
 0x1f8   :  { %3992 = vmatprep.subr.bf16.mxu0 %v3991_v9  ;;  %439 = vrot.lane.b32.xlu1 %v432_v20, %s4956_s16  ;;  %v4027_v58 = vpack.c.bf16 %v613_v57, %v612_v56  ;;  %v3373_v16 = vld [vmem:[#allocation13] ss:$0 sm:$0xff]  ;;  %v758_v42 = vld [vmem:[#allocation18 + $0x30] sm:$0xff]  ;;  %v760_v45 = vld [vmem:[#allocation18 + $0x40] sm:$0xff] }
 0x1f9   :  { %4010 = vmatpush3.bf16.msra.mxu1 %v4007_v43  ;;  %v759_v43 = vld [vmem:[#allocation18 + $0x38] sm:$0xff]  ;;  %v762_v48 = vld [vmem:[#allocation18 + $0x50] sm:$0xff] }
 0x1fa   :  { %4012 = vmatprep.subr.bf16.mxu1 %v4011_v46  ;;  %v4043_v44 = vpack.c.bf16 %v759_v43, %v758_v42  ;;  %v763_v49 = vld [vmem:[#allocation18 + $0x58] sm:$0xff] }
 0x1fb   :  { %3994 = vmatpush3.bf16.msra.mxu0 %v3991_v9 }
 0x1fc   :  { %3996 = vmatprep.subr.bf16.mxu0 %v3995_v12 }
 0x1fd   :  { %4014 = vmatpush3.bf16.msra.mxu1 %v4011_v46  ;;  %v761_v46 = vld [vmem:[#allocation18 + $0x48] sm:$0xff] }
 0x1fe   :  { %4016 = vmatprep.subr.bf16.mxu1 %v4015_v50  ;;  %v4047_v47 = vpack.c.bf16 %v761_v46, %v760_v45 }
 0x1ff   :  { %3998 = vmatpush3.bf16.msra.mxu0 %v3995_v12 }
 0x200   :  { %4000 = vmatprep.subr.bf16.mxu0 %v3999_v15 }
 0x201   :  { %4018 = vmatpush3.bf16.msra.mxu1 %v4015_v50  ;;  %v4051_v50 = vpack.c.bf16 %v763_v49, %v762_v48 }
 0x202   :  { %4020 = vmatprep.subr.bf16.mxu1 %v4019_v52 }
 0x203   :  { %4002 = vmatpush3.bf16.msra.mxu0 %v3999_v15 }
 0x204   :  { %4004 = vmatprep.subr.bf16.mxu0 %v4003_v18 }
 0x205   :  { %4022 = vmatpush3.bf16.msra.mxu1 %v4019_v52 }
 0x206   :  { %4024 = vmatprep.subr.bf16.mxu1 %v4023_v55 }
 0x207   :  { %4006 = vmatpush3.bf16.msra.mxu0 %v4003_v18 }
 0x209   :  { %4026 = vmatpush3.bf16.msra.mxu1 %v4023_v55 }
 0x20a   :  { %3667 = vmatmul.mubr.msk.f32.vlgmr.msra.gmra.mrb[0].mxu0 %vm468_vm0, %v448_v19  ;;  %4028 = vmatprep.subr.bf16.mxu1 %v4027_v58 }
 0x20d   :  { %4030 = vmatpush3.bf16.msra.mxu1 %v4027_v58  ;;  %v3376_v58 = vld [vmem:[#allocation15] ss:$0 sm:$0xff] }
 0x225   :  { %s5358_s17 = spop %4255 }
 0x266   :  { %v436_v28 = vpop.permute.xlu1 %435 }
 0x267   :  { %4257 = vpush %v436_v28 }
 0x26a   :  { %v440_v29 = vpop.permute.xlu1 %439 }
 0x26b   :  { %4259 = vpush %v440_v29 }
 0x298   :  { %s5360_s29 = spop %4257 }
 0x29c   :  { %s5362_s26 = spop %4259 }
 0x2dd   :  { %v3668_v22 = vpop.f32.mrb[0].mxu0 }
 0x2de   :  { %v541_v23 = vpop.f32.mrb[1].mxu0  ;;  %v547_v25 = vadd.f32 %v3668_v22, %v3368_v21 }
 0x2df   :  { %v542_v24 = vadd.f32 %v3368_v21, %v541_v23 }
 0x2e0   :  { %v553_v27 = vsel %vm468_vm0, %v547_v25, 0.0 }
 0x2e1   :  { %v550_v26 = vsel %vm468_vm0, %v542_v24, 0.0 }
 0x2e2   :  { %551 = vadd.xlane.f32.xlu0 %v550_v26 }
 0x2e6   :  { %554 = vadd.xlane.f32.xlu0 %v553_v27 }
 0x2fc   :  { %443 = vrot.lane.b32.xlu0 %v432_v20, %s4957_s14 }
 0x36f   :  { %v552_v30 = vpop.xlane.xlu0 %551 }
 0x370   :  { %v557_v31 = vmul.f32 0.010416667, %v552_v30 }
 0x372   :  { %v559_v32 = vsub.f32 %v542_v24, %v557_v31 }
 0x373   :  { %v555_v33 = vpop.xlane.xlu0 %554 }
 0x374   :  { %v558_v34 = vmul.f32 0.010416667, %v555_v33  ;;  %v561_v35 = vmul.f32 %v559_v32, %v559_v32  ;;  %v752_v33 = vld [vmem:[#allocation18] sm:$0xff] }
 0x376   :  { %v560_v36 = vsub.f32 %v547_v25, %v558_v34  ;;  %v563_v37 = vsel %vm468_vm0, %v561_v35, 0.0  ;;  %v753_v34 = vld [vmem:[#allocation18 + $0x8] sm:$0xff] }
 0x377   :  { %564 = vadd.xlane.f32.xlu1 %v563_v37  ;;  %v444_v38 = vpop.permute.xlu0 %443  ;;  %v4031_v35 = vpack.c.bf16 %v753_v34, %v752_v33  ;;  %v755_v37 = vld [vmem:[#allocation18 + $0x18] sm:$0xff] }
 0x378   :  { %v562_v39 = vmul.f32 %v560_v36, %v560_v36  ;;  %4261 = vpush %v444_v38 }
 0x379   :  { %4032 = vmatprep.subr.bf16.mxu0 %v4031_v35 }
 0x37a   :  { %v566_v40 = vsel %vm468_vm0, %v562_v39, 0.0  ;;  %4034 = vmatpush3.bf16.msra.mxu0 %v4031_v35  ;;  %v756_v39 = vld [vmem:[#allocation18 + $0x20] sm:$0xff] }
 0x37b   :  { %567 = vadd.xlane.f32.xlu0 %v566_v40  ;;  %v757_v40 = vld [vmem:[#allocation18 + $0x28] sm:$0xff] }
 0x37c   :  { %v4039_v41 = vpack.c.bf16 %v757_v40, %v756_v39 }
 0x3a9   :  { %s4262_s13 = spop %4261 }
 0x3aa   :  { %v5364_v9 = vstv %s4262_s13 }
 0x404   :  { %v565_v59 = vpop.xlane.xlu1 %564 }
 0x405   :  { %v569_v60 = vmul.f32 0.010416667, %v565_v59 }
 0x407   :  { %v571_v61 = vadd.f32 1e-05, %v569_v60  ;;  %v3377_v60 = vld [vmem:[#allocation16] ss:$0 sm:$0xff] }
 0x408   :  { %v568_v62 = vpop.xlane.xlu0 %567 }
 0x409   :  { %4344 = vrsqrt.f32 %v571_v61  ;;  %v570_v63 = vmul.f32 0.010416667, %v568_v62 }
 0x40b   :  { %v572_v0 = vadd.f32 1e-05, %v570_v63 }
 0x40d   :  { %4346 = vrsqrt.f32 %v572_v0 }
 0x413   :  { %v4345_v1 = vpop.eup %4344 }
 0x414   :  { %v575_v3 = vmul.f32 %v4345_v1, %v559_v32 }
 0x416   :  { %v584_v5 = vmul.f32 %v3371_v2, %v575_v3 }
 0x417   :  { %v4347_v6 = vpop.eup %4346 }
 0x418   :  { %v576_v7 = vmul.f32 %v4347_v6, %v560_v36  ;;  %v593_v8 = vadd.f32 %v3372_v4, %v584_v5  ;;  %v754_v36 = vld [vmem:[#allocation18 + $0x10] sm:$0xff] }
 0x419   :  { %v4035_v38 = vpack.c.bf16 %v755_v37, %v754_v36 }
 0x41a   :  { %v585_v10 = vmul.f32 %v3371_v2, %v576_v7  ;;  %vm595_vm1 = vcmp.ge.f32.partialorder %v593_v8, 0.0  ;;  %v598_v11 = vmul.f32 %v5364_v9, %v593_v8  ;;  %v852_v7 = vld [vmem:[#allocation21] sm:$0xff] }
 0x41b   :  { %4036 = vmatprep.subr.bf16.mxu0 %v4035_v38 }
 0x41c   :  { %v594_v12 = vadd.f32 %v3372_v4, %v585_v10  ;;  %v600_v13 = vsel %vm595_vm1, %v593_v8, %v598_v11  ;;  %4038 = vmatpush3.bf16.msra.mxu0 %v4035_v38  ;;  %v853_v8 = vld [vmem:[#allocation21 + $0x8] sm:$0xf]  ;;  %v940_v11 = vld [vmem:[#allocation22] sm:$0xff]  ;;  %vm1634_vm1 = vcmask 523264  }
 0x41d   :  { %3693 = vmatprep.mubr.msk.f32.mxu1 %vm468_vm0, %v600_v13  ;;  %4040 = vmatprep.subr.bf16.mxu0 %v4039_v41  ;;  %v4055_v10 = vpack.c.bf16 %v853_v8, %v852_v7 }
 0x41e   :  { %vm596_vm2 = vcmp.ge.f32.partialorder %v594_v12, 0.0  ;;  %v599_v14 = vmul.f32 %v5364_v9, %v594_v12 }
 0x420   :  { %v601_v15 = vsel %vm596_vm2, %v594_v12, %v599_v14  ;;  %4042 = vmatpush3.bf16.msra.mxu0 %v4039_v41  ;;  %v941_v12 = vld [vmem:[#allocation22 + $0x8] sm:$0xf]  ;;  %v3378_v14 = vld [vmem:[#allocation19] ss:$0 sm:$0xff]  ;;  %vm1849_vm2 = vcmask 130048  }
 0x421   :  { %3694 = vmatmul.mubr.msk.f32.vlgmr.msra.gmra.mrb[0].mxu1 %vm468_vm0, %v601_v15  ;;  %4044 = vmatprep.subr.bf16.mxu0 %v4043_v44  ;;  %v4061_v13 = vpack.c.bf16 %v941_v12, %v940_v11 }
 0x423   :  { %4063 = vmatprep.subr.msk.bf16.mxu1 %vm4056_vm7, %v4061_v13 }
 0x424   :  { %4046 = vmatpush3.bf16.msra.mxu0 %v4043_v44  ;;  %4066 = vmatpush3.bf16.msk.msra.mxu1 %vm4056_vm7, %v4061_v13 }
 0x425   :  { %4048 = vmatprep.subr.bf16.mxu0 %v4047_v47 }
 0x428   :  { %4050 = vmatpush3.bf16.msra.mxu0 %v4047_v47 }
 0x429   :  { %4052 = vmatprep.subr.bf16.mxu0 %v4051_v50 }
 0x42c   :  { %4054 = vmatpush3.bf16.msra.mxu0 %v4051_v50 }
 0x42d   :  { %4057 = vmatprep.subr.msk.bf16.mxu0 %vm4056_vm7, %v4055_v10 }
 0x4f4   :  { %v3695_v17 = vpop.f32.mrb[0].mxu1 }
 0x4f5   :  { %v693_v18 = vpop.f32.mrb[1].mxu1  ;;  %v699_v20 = vadd.f32 %v3695_v17, %v3373_v16 }
 0x4f6   :  { %v694_v19 = vadd.f32 %v3373_v16, %v693_v18 }
 0x4f7   :  { %v705_v22 = vsel %vm468_vm0, %v699_v20, 0.0 }
 0x4f8   :  { %v702_v21 = vsel %vm468_vm0, %v694_v19, 0.0 }
 0x4f9   :  { %703 = vadd.xlane.f32.xlu1 %v702_v21 }
 0x4fd   :  { %706 = vadd.xlane.f32.xlu1 %v705_v22  ;;  %v1032_v22 = vld [vmem:[%s5724_s28 + $0x10] sm:$0xff] }
 0x586   :  { %v704_v23 = vpop.xlane.xlu1 %703 }
 0x587   :  { %v708_v24 = vmul.f32 0.010416667, %v704_v23  ;;  %v1033_v23 = vld [vmem:[%s5724_s28 + $0x18] sm:$0xff] }
 0x589   :  { %v710_v25 = vsub.f32 %v694_v19, %v708_v24  ;;  %v1030_v19 = vld [vmem:[%s5724_s28] sm:$0xff] }
 0x58a   :  { %v707_v26 = vpop.xlane.xlu1 %706 }
 0x58b   :  { %v709_v27 = vmul.f32 0.010416667, %v707_v26  ;;  %v712_v28 = vmul.f32 %v710_v25, %v710_v25 }
 0x58d   :  { %v711_v29 = vsub.f32 %v699_v20, %v709_v27  ;;  %v714_v30 = vsel %vm468_vm0, %v712_v28, 0.0  ;;  %v1031_v20 = vld [vmem:[%s5724_s28 + $0x8] sm:$0xff]  ;;  %v1034_v27 = vld [vmem:[%s5724_s28 + $0x20] sm:$0xf] }
 0x58e   :  { %715 = vadd.xlane.f32.xlu1 %v714_v30  ;;  %v4067_v21 = vpack.c.bf16 %v1031_v20, %v1030_v19  ;;  %v1227_v19 = vld [vmem:[#allocation24 + $0x10] sm:$0xff]  ;;  %v1230_v20 = vld [vmem:[#allocation24 + $0x28] sm:$0xff] }
 0x58f   :  { %v713_v31 = vmul.f32 %v711_v29, %v711_v29 }
 0x590   :  { %4068 = vmatprep.subr.bf16.mxu1 %v4067_v21 }
 0x591   :  { %v717_v32 = vsel %vm468_vm0, %v713_v31, 0.0 }
 0x592   :  { %718 = vadd.xlane.f32.xlu1 %v717_v32 }
 0x61b   :  { %v716_v51 = vpop.xlane.xlu1 %715 }
 0x61c   :  { %v720_v52 = vmul.f32 0.010416667, %v716_v51 }
 0x61e   :  { %v722_v53 = vadd.f32 1e-05, %v720_v52 }
 0x61f   :  { %v719_v54 = vpop.xlane.xlu1 %718 }
 0x620   :  { %4348 = vrsqrt.f32 %v722_v53  ;;  %v721_v55 = vmul.f32 0.010416667, %v719_v54 }
 0x622   :  { %v723_v56 = vadd.f32 1e-05, %v721_v55 }
 0x624   :  { %4350 = vrsqrt.f32 %v723_v56 }
 0x62a   :  { %v4349_v57 = vpop.eup %4348 }
 0x62b   :  { %v726_v59 = vmul.f32 %v4349_v57, %v710_v25  ;;  %v4071_v25 = vpack.c.bf16 %v1033_v23, %v1032_v22  ;;  %v4079_v22 = vpack.c.bf16 %v1230_v20, %v1227_v19  ;;  %v1424_v19 = vld [vmem:[%s5725_s4 + $0xa8] sm:$0xff] }
 0x62c   :  { %v1428_v20 = vld [vmem:[%s5725_s4 + $0xc8] sm:$0xff] }
 0x62d   :  { %v735_v61 = vmul.f32 %v3376_v58, %v726_v59 }
 0x62e   :  { %v4351_v62 = vpop.eup %4350 }
 0x62f   :  { %v727_v63 = vmul.f32 %v4351_v62, %v711_v29  ;;  %v744_v0 = vadd.f32 %v3377_v60, %v735_v61 }
 0x631   :  { %v736_v1 = vmul.f32 %v3376_v58, %v727_v63  ;;  %vm746_vm3 = vcmp.ge.f32.partialorder %v744_v0, 0.0  ;;  %v748_v2 = vmul.f32 %v744_v0, %v5364_v9 }
 0x633   :  { %v745_v3 = vadd.f32 %v3377_v60, %v736_v1  ;;  %v5375_v4 = vsel %vm746_vm3, %v744_v0, %v748_v2  ;;  %v1226_v0 = vld [vmem:[#allocation24 + $0x8] sm:$0xff]  ;;  %v1229_v1 = vld [vmem:[#allocation24 + $0x20] sm:$0xff] }
 0x634   :  { %3720 = vmatprep.mubr.msk.f32.mxu0 %vm468_vm0, %v5375_v4  ;;  %v1225_v2 = vld [vmem:[#allocation24] sm:$0xff] }
 0x635   :  { %vm747_vm4 = vcmp.ge.f32.partialorder %v745_v3, 0.0  ;;  %v749_v5 = vmul.f32 %v745_v3, %v5364_v9 }
 0x637   :  { %v5380_v6 = vsel %vm747_vm4, %v745_v3, %v749_v5  ;;  %v4075_v3 = vpack.c.bf16 %v1229_v1, %v1226_v0  ;;  %v1228_v5 = vld [vmem:[#allocation24 + $0x18] sm:$0xff]  ;;  %vm2140_vm4 = vcmask 64512  }
 0x638   :  { %3721 = vmatmul.mubr.msk.f32.vlgmr.msra.gmra.mrb[2].mxu0 %vm468_vm0, %v5380_v6  ;;  %v4077_v7 = vpack.c.bf16 %v1228_v5, %v1225_v2 }
 0x639   :  { %4060 = vmatpush3.bf16.msk.msra.mxu0 %vm4056_vm7, %v4055_v10 }
 0x63a   :  { %4080 = vmatprep.subr.bf16.mxu0 %v4079_v22 }
 0x70b   :  { %v3722_v15 = vpop.f32.mrb[2].mxu0 }
 0x70c   :  { %v5385_v16 = vadd.f32 %v3722_v15, %v3378_v14  ;;  %v843_v17 = vpop.f32.mrb[3].mxu0 }
 0x70d   :  { %v5387_v18 = vadd.f32 %v3378_v14, %v843_v17 }
 0x70e   :  { %944 = vrot.lane.b32.xlu0 %v5385_v16, %s4959_s8 }
 0x70f   :  { %942 = vrot.lane.b32.xlu1 %v5387_v18, %s4959_s8  ;;  %3727 = vmatprep.mubr.msk.f32.mxu0 %vm854_vm8, %v5387_v18 }
 0x710   :  { %3728 = vmatmul.mubr.msk.f32.vlgmr.msra.gmra.mrb[4].mxu0 %vm854_vm8, %v5385_v16 }
 0x711   :  { %4082 = vmatpush3.bf16.msra.mxu0 %v4079_v22  ;;  %v1423_v22 = vld [vmem:[%s5725_s4 + $0xa0] sm:$0xff] }
 0x780   :  { %v945_v26 = vpop.permute.xlu0 %944 }
 0x781   :  { %v943_v24 = vpop.permute.xlu1 %942 }
 0x782   :  { %3734 = vmatprep.mubr.msk.f32.mxu1 %vm854_vm8, %v943_v24 }
 0x783   :  { %3735 = vmatmul.mubr.msk.f32.vlgmr.msra.gmra.mrb[2].mxu1 %vm854_vm8, %v945_v26  ;;  %v1404_v26 = vld [vmem:[%s5725_s4 + $0x8] sm:$0xff] }
 0x784   :  { %4070 = vmatpush3.bf16.msra.mxu1 %v4067_v21 }
 0x785   :  { %4072 = vmatprep.subr.bf16.mxu1 %v4071_v25 }
 0x788   :  { %4074 = vmatpush3.bf16.msra.mxu1 %v4071_v25  ;;  %v1232_v25 = vld [vmem:[#allocation24 + $0x38] sm:$0x3] }
 0x789   :  { %3745 = vmatprep.subr.msk.mxu1 %vm861_vm5, %v1034_v27 }
 0x78c   :  { %3746 = vmatpush3.msk.msra.mxu1 %vm861_vm5, %v1034_v27  ;;  %v1407_v27 = vld [vmem:[%s5725_s4 + $0x20] sm:$0xff] }
 0x78d   :  { %4076 = vmatprep.subr.bf16.mxu1 %v4075_v3  ;;  %v1418_v3 = vld [vmem:[%s5725_s4 + $0x78] sm:$0xff] }
 0x7e3   :  { %v3729_v28 = vpop.f32.mrb[4].mxu0 }
 0x7e4   :  { %v931_v29 = vpop.f32.mrb[5].mxu0 }
 0x856   :  { %v3736_v30 = vpop.f32.mrb[2].mxu1 }
 0x857   :  { %v1029_v31 = vmul.f32 %v3736_v30, %v3729_v28  ;;  %v1019_v32 = vpop.f32.mrb[3].mxu1  ;;  %v4083_v30 = vpack.c.bf16 %v1407_v27, %v1404_v26  ;;  %v1427_v27 = vld [vmem:[%s5725_s4 + $0xc0] sm:$0xff] }
 0x858   :  { %v1028_v33 = vmul.f32 %v1019_v32, %v931_v29  ;;  %v1231_v29 = vld [vmem:[#allocation24 + $0x30] sm:$0x3] }
 0x85a   :  { %3747 = vmatprep.mubr.msk.f32.mxu1 %vm1035_vm9, %v1028_v33  ;;  %v4963_v33 = vmov 0.0  }
 0x85b   :  { %3748 = vmatmul.mubr.msk.f32.vlgmr.msra.gmra.mrb[4].mxu1 %vm1035_vm9, %v1029_v31 }
 0x85c   :  { %4078 = vmatpush1.bf16.msra.mxu1 %v4077_v7  ;;  %1315 = vmatprep.mubr.f32.mxu1 %v4963_v33 }
 0x85d   :  { %3390 = vmatprep.subr.msk.mxu1 %vm1241_vm12, %v1232_v25 }
 0x860   :  { %3391 = vmatpush1.msk.msra.mxu1 %vm1241_vm12, %v1231_v29  ;;  %v1434_v29 = vld [vmem:[%s5725_s4 + $0xf8] sm:$0xff] }
 0x861   :  { %4084 = vmatprep.subr.bf16.mxu1 %v4083_v30  ;;  %v1437_v30 = vld [vmem:[%s5725_s4 + $0x110] sm:$0xff] }
 0x92e   :  { %v3749_v34 = vpop.f32.mrb[4].mxu1 }
 0x92f   :  { %vm1121_vm10 = vcmp.ge.f32.partialorder %v3749_v34, 0.0  ;;  %v1123_v35 = vmul.f32 0.2, %v3749_v34  ;;  %v1111_v36 = vpop.f32.mrb[5].mxu1 }
 0x930   :  { %vm1120_vm11 = vcmp.ge.f32.partialorder %v1111_v36, 0.0  ;;  %v1122_v37 = vmul.f32 0.2, %v1111_v36 }
 0x931   :  { %v1125_v38 = vsel %vm1121_vm10, %v3749_v34, %v1123_v35  ;;  %v1233_v34 = vld [vmem:[#allocation24 + $0x40] sm:$0x3]  ;;  %v1405_v35 = vld [vmem:[%s5725_s4 + $0x10] sm:$0xff] }
 0x932   :  { %v1124_v39 = vsel %vm1120_vm11, %v1111_v36, %v1122_v37  ;;  %1130 = vrot.lane.b32.xlu0 %v1125_v38, %s4960_s1  ;;  %v1408_v36 = vld [vmem:[%s5725_s4 + $0x28] sm:$0xff]  ;;  %3754 = vmatprep.subr.msk.mxu0 %vm1241_vm12, %v1233_v34 }
 0x933   :  { %1128 = vrot.lane.b32.xlu1 %v1124_v39, %s4960_s1  ;;  %v4107_v37 = vpack.c.bf16 %v1408_v36, %v1405_v35  ;;  %3755 = vmatpush3.msk.msra.mxu0 %vm1241_vm12, %v1233_v34  ;;  %v4103_v35 = vpack.c.bf16 %v1437_v30, %v1434_v29  ;;  %v1641_v29 = vstv %s5358_s17 }
 0x935   :  { %4108 = vmatprep.subr.bf16.mxu0 %v4107_v37 }
 0x937   :  { %1136 = vrot.lane.b32.xlu1 %v1124_v39, %s4959_s8 }
 0x93b   :  { %1138 = vrot.lane.b32.xlu1 %v1125_v38, %s4959_s8 }
 0x9a4   :  { %v1131_v42 = vpop.permute.xlu0 %1130 }
 0x9a5   :  { %v1129_v40 = vpop.permute.xlu1 %1128  ;;  %v1135_v45 = vmax.f32 %v1125_v38, %v1131_v42  ;;  %v1403_v42 = vld [vmem:[%s5725_s4] sm:$0xff] }
 0x9a6   :  { %v1134_v41 = vmax.f32 %v1124_v39, %v1129_v40 }
 0x9a9   :  { %v1137_v43 = vpop.permute.xlu1 %1136 }
 0x9aa   :  { %v1142_v44 = vmax.f32 %v1134_v41, %v1137_v43  ;;  %v1406_v43 = vld [vmem:[%s5725_s4 + $0x18] sm:$0xff] }
 0x9ac   :  { %1164 = vrot.lane.b32.xlu1 %v1142_v44, %s4961_s21  ;;  %1152 = vrot.lane.b32.xlu0 %v1142_v44, %s4962_s30  ;;  %v1144_v8 = vsub.f32 %v1124_v39, %v1142_v44 }
 0x9ad   :  { %v1139_v46 = vpop.permute.xlu1 %1138 }
 0x9ae   :  { %v1143_v47 = vmax.f32 %v1135_v45, %v1139_v46  ;;  %v1146_v10 = vmul.f32 1.442695, %v1144_v8  ;;  %v1410_v46 = vld [vmem:[%s5725_s4 + $0x38] sm:$0xff] }
 0x9b0   :  { %1166 = vrot.lane.b32.xlu1 %v1143_v47, %s4961_s21  ;;  %1154 = vrot.lane.b32.xlu0 %v1143_v47, %s4962_s30  ;;  %v1145_v11 = vsub.f32 %v1125_v38, %v1143_v47  ;;  %v1413_v47 = vld [vmem:[%s5725_s4 + $0x50] sm:$0xff] }
 0x9b2   :  { %v1148_v12 = vmul.f32 1.442695, %v1145_v11  ;;  %v1417_v11 = vld [vmem:[%s5725_s4 + $0x70] sm:$0xff] }
 0xa1e   :  { %v1153_v48 = vpop.permute.xlu0 %1152  ;;  %v1165_v49 = vpop.permute.xlu1 %1164 }
 0xa1f   :  { %v1158_v50 = vsub.f32 %v1124_v39, %v1153_v48  ;;  %v1170_v51 = vsub.f32 %v1124_v39, %v1165_v49 }
 0xa21   :  { %v1160_v52 = vmul.f32 1.442695, %v1158_v50  ;;  %v1172_v53 = vmul.f32 1.442695, %v1170_v51  ;;  %v1409_v51 = vld [vmem:[%s5725_s4 + $0x30] sm:$0xff] }
 0xa22   :  { %v1155_v54 = vpop.permute.xlu0 %1154  ;;  %v1167_v55 = vpop.permute.xlu1 %1166 }
 0xa23   :  { %4352 = vpow2.f32 %v1160_v52  ;;  %v1159_v56 = vsub.f32 %v1125_v38, %v1155_v54  ;;  %v1171_v57 = vsub.f32 %v1125_v38, %v1167_v55  ;;  %v1412_v52 = vld [vmem:[%s5725_s4 + $0x48] sm:$0xff] }
 0xa24   :  { %4354 = vpow2.f32 %v1172_v53  ;;  %v4089_v0 = vpack.c.bf16 %v1412_v52, %v1409_v51  ;;  %v1649_v51 = vld [vmem:[%s5726_s19 + $0x18] sm:$0xff] }
 0xa25   :  { %v1162_v58 = vmul.f32 1.442695, %v1159_v56  ;;  %v1174_v59 = vmul.f32 1.442695, %v1171_v57  ;;  %v1416_v56 = vld [vmem:[%s5725_s4 + $0x68] sm:$0xff]  ;;  %v1419_v57 = vld [vmem:[%s5725_s4 + $0x80] sm:$0xff] }
 0xa26   :  { %v4091_v2 = vpack.c.bf16 %v1419_v57, %v1416_v56  ;;  %v1652_v56 = vld [vmem:[%s5726_s19 + $0x30] sm:$0xff]  ;;  %v1653_v57 = vld [vmem:[%s5726_s19 + $0x38] sm:$0xff] }
 0xa27   :  { %4356 = vpow2.f32 %v1162_v58 }
 0xa28   :  { %4358 = vpow2.f32 %v1174_v59 }
 0xa29   :  { %4360 = vpow2.f32 %v1146_v10  ;;  %v1425_v10 = vld [vmem:[%s5725_s4 + $0xb0] sm:$0xff] }
 0xa2a   :  { %4362 = vpow2.f32 %v1148_v12  ;;  %v1420_v12 = vld [vmem:[%s5725_s4 + $0x88] sm:$0xff] }
 0xa2d   :  { %v5414_v60 = vpop.eup %4352 }
 0xa2e   :  { %v5416_v61 = vpop.eup %4354  ;;  %1178 = vrot.lane.b32.xlu0 %v5414_v60, %s4960_s1 }
 0xa2f   :  { %1188 = vrot.lane.b32.xlu1 %v5416_v61, %s4959_s8 }
 0xa31   :  { %v5422_v62 = vpop.eup %4356 }
 0xa32   :  { %v5424_v63 = vpop.eup %4358  ;;  %1180 = vrot.lane.b32.xlu0 %v5422_v62, %s4960_s1 }
 0xa33   :  { %1190 = vrot.lane.b32.xlu1 %v5424_v63, %s4959_s8  ;;  %v4361_v13 = vpop.eup %4360 }
 0xa34   :  { %v4363_v23 = vpop.eup %4362 }
 0xaa0   :  { %v1179_v14 = vpop.permute.xlu0 %1178 }
 0xaa1   :  { %v1184_v15 = vadd.f32 %v4361_v13, %v1179_v14  ;;  %v1189_v17 = vpop.permute.xlu1 %1188 }
 0xaa3   :  { %v1194_v21 = vadd.f32 %v1189_v17, %v1184_v15  ;;  %v4115_v15 = vpack.c.bf16 %v1420_v12, %v1417_v11  ;;  %v1421_v17 = vld [vmem:[%s5725_s4 + $0x90] sm:$0xff] }
 0xaa4   :  { %v1181_v24 = vpop.permute.xlu0 %1180 }
 0xaa5   :  { %4364 = vrcp.f32 %v1194_v21  ;;  %v1185_v28 = vadd.f32 %v4363_v23, %v1181_v24  ;;  %v1191_v31 = vpop.permute.xlu1 %1190  ;;  %v1431_v21 = vld [vmem:[%s5725_s4 + $0xe0] sm:$0xff]  ;;  %v4097_v24 = vpack.c.bf16 %v1424_v19, %v1421_v17  ;;  %v1749_v19 = vld [vmem:[%s5727_s10 + $0x8] sm:$0xff] }
 0xaa6   :  { %v4099_v25 = vpack.c.bf16 %v1431_v21, %v1428_v20  ;;  %v1748_v17 = vld [vmem:[%s5727_s10] sm:$0xff] }
 0xaa7   :  { %v1195_v32 = vadd.f32 %v1191_v31, %v1185_v28  ;;  %v1430_v28 = vld [vmem:[%s5725_s4 + $0xd8] sm:$0xff]  ;;  %v1429_v31 = vld [vmem:[%s5725_s4 + $0xd0] sm:$0xff]  ;;  %v4155_v20 = vpack.c.bf16 %v1749_v19, %v1748_v17 }
 0xaa8   :  { %v4101_v34 = vpack.c.bf16 %v1430_v28, %v1427_v27 }
 0xaa9   :  { %4366 = vrcp.f32 %v1195_v32  ;;  %v1432_v32 = vld [vmem:[%s5725_s4 + $0xe8] sm:$0xff] }
 0xaaa   :  { %v4123_v36 = vpack.c.bf16 %v1432_v32, %v1429_v31 }
 0xaaf   :  { %v4365_v38 = vpop.eup %4364 }
 0xab0   :  { %1212 = vrot.lane.b32.xlu1 %v4365_v38, %s4961_s21  ;;  %1204 = vrot.lane.b32.xlu0 %v4365_v38, %s4962_s30  ;;  %v1200_v39 = vmul.f32 %v4365_v38, %v4361_v13  ;;  %v1436_v38 = vld [vmem:[%s5725_s4 + $0x108] sm:$0xff] }
 0xab3   :  { %v4367_v40 = vpop.eup %4366 }
 0xab4   :  { %1214 = vrot.lane.b32.xlu1 %v4367_v40, %s4961_s21  ;;  %1206 = vrot.lane.b32.xlu0 %v4367_v40, %s4962_s30  ;;  %v1201_v41 = vmul.f32 %v4367_v40, %v4363_v23  ;;  %v1426_v23 = vld [vmem:[%s5725_s4 + $0xb8] sm:$0xff] }
 0xab5   :  { %v4119_v26 = vpack.c.bf16 %v1426_v23, %v1423_v22  ;;  %v1438_v40 = vld [vmem:[%s5725_s4 + $0x118] sm:$0xff] }
 0xab8   :  { %1441 = vrot.lane.b32.xlu1 %v5385_v16, %s4964_s2  ;;  %1439 = vrot.lane.b32.xlu0 %v5387_v18, %s4964_s2  ;;  %v4085_v16 = vpack.c.bf16 %v1406_v43, %v1403_v42  ;;  %v4087_v18 = vpack.c.bf16 %v1413_v47, %v1410_v46 }
 0xb22   :  { %v1205_v44 = vpop.permute.xlu0 %1204  ;;  %v1213_v45 = vpop.permute.xlu1 %1212 }
 0xb23   :  { %v1210_v48 = vmul.f32 %v5414_v60, %v1205_v44  ;;  %v1218_v49 = vmul.f32 %v5416_v61, %v1213_v45  ;;  %v1411_v60 = vld [vmem:[%s5725_s4 + $0x40] sm:$0xff]  ;;  %v1414_v61 = vld [vmem:[%s5725_s4 + $0x58] sm:$0xff]  ;;  %v1647_v45 = vld [vmem:[%s5726_s19 + $0x8] sm:$0xff] }
 0xb24   :  { %v4111_v8 = vpack.c.bf16 %v1414_v61, %v1411_v60  ;;  %v1646_v44 = vld [vmem:[%s5726_s19] sm:$0xff]  ;;  %v1655_v60 = vld [vmem:[%s5726_s19 + $0x48] sm:$0xff] }
 0xb25   :  { %v1221_v50 = vsel %vm1220_vm13, %v1200_v39, %v1210_v48  ;;  %v1435_v39 = vld [vmem:[%s5725_s4 + $0x100] sm:$0xff]  ;;  %v4131_v46 = vpack.c.bf16 %v1647_v45, %v1646_v44 }
 0xb26   :  { %v1223_v53 = vsel %vm854_vm8, %v1221_v50, %v1218_v49  ;;  %v1207_v54 = vpop.permute.xlu0 %1206  ;;  %v1215_v55 = vpop.permute.xlu1 %1214  ;;  %v4127_v42 = vpack.c.bf16 %v1438_v40, %v1435_v39 }
 0xb27   :  { %v1211_v58 = vmul.f32 %v5422_v62, %v1207_v54  ;;  %v1219_v59 = vmul.f32 %v5424_v63, %v1215_v55  ;;  %3392 = vmatmul.mubr.msk.f32.vlgmr.msra.gmra.mrb[6].mxu1 %vm1234_vm14, %v1223_v53  ;;  %3756 = vmatprep.mubr.msk.f32.mxu0 %vm1234_vm14, %v1223_v53  ;;  %v1415_v62 = vld [vmem:[%s5725_s4 + $0x60] sm:$0xff]  ;;  %v1422_v63 = vld [vmem:[%s5725_s4 + $0x98] sm:$0xff]  ;;  %v1651_v54 = vld [vmem:[%s5726_s19 + $0x28] sm:$0xff] }
 0xb28   :  { %4086 = vmatpush1.bf16.msra.mxu1 %v4085_v16  ;;  %1321 = vmatprep.mubr.f32.mxu1 %v4963_v33  ;;  %v4093_v13 = vpack.c.bf16 %v1418_v3, %v1415_v62  ;;  %v4095_v14 = vpack.c.bf16 %v1425_v10, %v1422_v63  ;;  %v1650_v53 = vld [vmem:[%s5726_s19 + $0x20] sm:$0xff]  ;;  %v1656_v3 = vld [vmem:[%s5726_s19 + $0x50] sm:$0xff]  ;;  %v1657_v63 = vld [vmem:[%s5726_s19 + $0x58] sm:$0xff] }
 0xb29   :  { %v1222_v1 = vsel %vm1220_vm13, %v1201_v41, %v1211_v58  ;;  %4088 = vmatprep.subr.bf16.mxu1 %v4087_v18  ;;  %v1648_v18 = vld [vmem:[%s5726_s19 + $0x10] sm:$0xff]  ;;  %v4139_v55 = vpack.c.bf16 %v1651_v54, %v1650_v53  ;;  %v4143_v58 = vpack.c.bf16 %v1653_v57, %v1652_v56 }
 0xb2a   :  { %v1440_v5 = vpop.permute.xlu0 %1439  ;;  %v1224_v7 = vsel %vm854_vm8, %v1222_v1, %v1219_v59  ;;  %v1442_v43 = vpop.permute.xlu1 %1441  ;;  %v4135_v52 = vpack.c.bf16 %v1649_v51, %v1648_v18  ;;  %v1654_v59 = vld [vmem:[%s5726_s19 + $0x40] sm:$0xff]  ;;  %v1981_v57 = vld [vmem:[%s5729_s3 + $0x10] sm:$0xff] }
 0xb2b   :  { %3393 = vmatmul.mubr.msk.f32.gmra.mrb[8].mxu1 %vm1234_vm14, %v1224_v7  ;;  %3757 = vmatmul.mubr.msk.f32.vlgmr.msra.gmra.mrb[6].mxu0 %vm1234_vm14, %v1224_v7  ;;  %v1979_v51 = vld [vmem:[%s5729_s3] sm:$0xff] }
 0xb2c   :  { %4090 = vmatpush1.bf16.msra.mxu1 %v4089_v0  ;;  %4110 = vmatpush3.bf16.msra.mxu0 %v4107_v37  ;;  %v1433_v37 = vld [vmem:[%s5725_s4 + $0xf0] sm:$0xff]  ;;  %v4147_v0 = vpack.c.bf16 %v1655_v60, %v1654_v59  ;;  %v5541_v59 = vld [vmem:[%s5728_s11 + $0x8] sm:$0xff] }
 0xb2d   :  { %3783 = vmatprep.mubr.msk.f32.mxu0 %vm468_vm0, %v1440_v5  ;;  %4092 = vmatprep.subr.bf16.mxu1 %v4091_v2  ;;  %v4105_v41 = vpack.c.bf16 %v1436_v38, %v1433_v37  ;;  %v5544_v60 = vld [vmem:[%s5728_s11 + $0x10] sm:$0xff] }
 0xb2e   :  { %4112 = vmatprep.subr.bf16.mxu0 %v4111_v8  ;;  %1511 = vmatprep.mubr.f32.mxu1 %v4963_v33 }
 0xb30   :  { %4094 = vmatpush1.bf16.msra.mxu1 %v4093_v13  ;;  %4114 = vmatpush3.bf16.msra.mxu0 %v4111_v8  ;;  %v4151_v8 = vpack.c.bf16 %v1657_v63, %v1656_v3  ;;  %v5571_v3 = vld [vmem:[%s5728_s11 + $0x38] sm:$0xff] }
 0xb31   :  { %4096 = vmatprep.subr.bf16.mxu1 %v4095_v14  ;;  %4116 = vmatprep.subr.bf16.mxu0 %v4115_v15 }
 0xb34   :  { %4098 = vmatpush1.bf16.msra.mxu1 %v4097_v24  ;;  %4118 = vmatpush3.bf16.msra.mxu0 %v4115_v15 }
 0xb35   :  { %4100 = vmatprep.subr.bf16.mxu1 %v4099_v25  ;;  %4120 = vmatprep.subr.bf16.mxu0 %v4119_v26 }
 0xb38   :  { %4102 = vmatpush1.bf16.msra.mxu1 %v4101_v34  ;;  %4122 = vmatpush3.bf16.msra.mxu0 %v4119_v26 }
 0xb39   :  { %4104 = vmatprep.subr.bf16.mxu1 %v4103_v35  ;;  %4124 = vmatprep.subr.bf16.mxu0 %v4123_v36 }
 0xb3c   :  { %4106 = vmatpush1.bf16.msra.mxu1 %v4105_v41  ;;  %4126 = vmatpush3.bf16.msra.mxu0 %v4123_v36  ;;  %v1750_v41 = vld [vmem:[%s5727_s10 + $0x10] sm:$0xff] }
 0xb3d   :  { %4128 = vmatprep.subr.bf16.mxu0 %v4127_v42  ;;  %4132 = vmatprep.subr.bf16.mxu1 %v4131_v46 }
 0xb3f   :  { %3397 = vmatmul.mubr.msk.f32.vlgmr.msra.gmra.mrb[10].mxu1 %vm468_vm0, %v1440_v5 }
 0xb40   :  { %4130 = vmatpush3.bf16.msra.mxu0 %v4127_v42  ;;  %1517 = vmatprep.mubr.f32.mxu1 %v4963_v33  ;;  %v1751_v42 = vld [vmem:[%s5727_s10 + $0x18] sm:$0xff] }
 0xb41   :  { %4134 = vmatpush3.bf16.msra.mxu1 %v4131_v46  ;;  %v4159_v45 = vpack.c.bf16 %v1751_v42, %v1750_v41  ;;  %v1746_v46 = vld [vmem:[#allocation4] sm:$0xff] }
 0xb42   :  { %4136 = vmatprep.subr.bf16.mxu1 %v4135_v52 }
 0xb43   :  { %3398 = vmatmul.mubr.msk.f32.gmra.mrb[12].mxu1 %vm468_vm0, %v1442_v43  ;;  %3784 = vmatmul.mubr.msk.f32.vlgmr.msra.gmra.mrb[8].mxu0 %vm468_vm0, %v1442_v43 }
 0xb45   :  { %4138 = vmatpush3.bf16.msra.mxu1 %v4135_v52  ;;  %v1980_v52 = vld [vmem:[%s5729_s3 + $0x8] sm:$0xff] }
 0xb46   :  { %4140 = vmatprep.subr.bf16.mxu1 %v4139_v55  ;;  %v4167_v56 = vpack.c.bf16 %v1980_v52, %v1979_v51 }
 0xb49   :  { %4142 = vmatpush3.bf16.msra.mxu1 %v4139_v55 }
 0xb4a   :  { %4144 = vmatprep.subr.bf16.mxu1 %v4143_v58 }
 0xb4d   :  { %4146 = vmatpush3.bf16.msra.mxu1 %v4143_v58  ;;  %v1982_v58 = vld [vmem:[%s5729_s3 + $0x18] sm:$0xff] }
 0xb4e   :  { %4148 = vmatprep.subr.bf16.mxu1 %v4147_v0 }
 0xb51   :  { %4150 = vmatpush3.bf16.msra.mxu1 %v4147_v0  ;;  %v5551_v0 = vld [vmem:[%s5728_s11 + $0x18] sm:$0xff] }
 0xb52   :  { %4152 = vmatprep.subr.bf16.mxu1 %v4151_v8 }
 0xb55   :  { %4154 = vmatpush3.bf16.msra.mxu1 %v4151_v8 }
 0xb56   :  { %4156 = vmatprep.subr.bf16.mxu1 %v4155_v20 }
 0xbfa   :  { %v1317_v47 = vpop.f32.mrb[6].mxu1 }
 0xbfb   :  { %v1319_v48 = vpop.f32.mrb[7].mxu1 }
 0xbfe   :  { %v1323_v49 = vpop.f32.mrb[8].mxu1  ;;  %v3758_v16 = vpop.f32.mrb[6].mxu0 }
 0xbff   :  { %v1325_v33 = vpop.f32.mrb[9].mxu1  ;;  %v1394_v50 = vpop.f32.mrb[7].mxu0 }
 0xc12   :  { %v1513_v61 = vpop.f32.mrb[10].mxu1 }
 0xc13   :  { %v1599_v1 = vmul.f32 %v1513_v61, %v1317_v47  ;;  %v1515_v2 = vpop.f32.mrb[11].mxu1  ;;  %v5524_v47 = vld [vmem:[%s5728_s11] sm:$0xff]  ;;  %v4171_v61 = vpack.c.bf16 %v1982_v58, %v1981_v57  ;;  %v2286_v57 = vld [vmem:[#allocation7] sm:$0xff] }
 0xc14   :  { %v1600_v62 = vmul.f32 %v1515_v2, %v1319_v48  ;;  %3828 = vmatprep.mubr.msk.f32.mxu0 %vm1849_vm2, %v5524_v47  ;;  %v5561_v2 = vld [vmem:[%s5728_s11 + $0x28] sm:$0xff] }
 0xc15   :  { %1609 = vrot.lane.b32.xlu0 %v1599_v1, %s4965_s7 }
 0xc16   :  { %1611 = vrot.lane.b32.xlu1 %v1600_v62, %s4965_s7  ;;  %v1519_v5 = vpop.f32.mrb[12].mxu1  ;;  %v3785_v7 = vpop.f32.mrb[8].mxu0 }
 0xc17   :  { %v1602_v10 = vmul.f32 %v1519_v5, %v1323_v49  ;;  %v1604_v11 = vmul.f32 %v3785_v7, %v3758_v16  ;;  %v1521_v12 = vpop.f32.mrb[13].mxu1  ;;  %v1590_v13 = vpop.f32.mrb[9].mxu0 }
 0xc18   :  { %v1603_v14 = vmul.f32 %v1521_v12, %v1325_v33  ;;  %v1601_v15 = vmul.f32 %v1590_v13, %v1394_v50 }
 0xc19   :  { %1626 = vrot.lane.b32.xlu0 %v1600_v62, %s4966_s12  ;;  %v5564_v62 = vld [vmem:[%s5728_s11 + $0x30] sm:$0xff] }
 0xc1a   :  { %1628 = vrot.lane.b32.xlu1 %v1601_v15, %s4966_s12  ;;  %v2139_v15 = vld [vmem:[%s5730_s25] sm:$0xff] }
 0xc1d   :  { %1613 = vrot.lane.b32.xlu0 %v1602_v10, %s4965_s7 }
 0xc1e   :  { %1615 = vrot.lane.b32.xlu1 %v1603_v14, %s4965_s7 }
 0xc21   :  { %1630 = vrot.lane.b32.xlu0 %v1603_v14, %s4966_s12  ;;  %v3414_v14 = vld [vmem:[#allocation27] ss:$0 sm:$0xff] }
 0xc22   :  { %1632 = vrot.lane.b32.xlu1 %v1604_v11, %s4966_s12 }
 0xc87   :  { %v1610_v21 = vpop.permute.xlu0 %1609 }
 0xc88   :  { %v1612_v22 = vpop.permute.xlu1 %1611 }
 0xc89   :  { %v1618_v23 = vsel %vm1617_vm15, %v1610_v21, %v1612_v22 }
 0xc8a   :  { %v1622_v25 = vadd.f32 %v1618_v23, %v1599_v1  ;;  %v5554_v1 = vld [vmem:[%s5728_s11 + $0x20] sm:$0xff] }
 0xc8b   :  { %v1627_v24 = vpop.permute.xlu0 %1626 }
 0xc8c   :  { %v1629_v26 = vpop.permute.xlu1 %1628 }
 0xc8d   :  { %v1635_v27 = vsel %vm1634_vm1, %v1627_v24, %v1629_v26 }
 0xc8e   :  { %v1639_v28 = vadd.f32 %v1635_v27, %v1622_v25 }
 0xc8f   :  { %v1614_v30 = vpop.permute.xlu0 %1613 }
 0xc90   :  { %v1642_v31 = vmul.f32 %v1641_v29, %v1639_v28  ;;  %v1616_v32 = vpop.permute.xlu1 %1615 }
 0xc91   :  { %v1619_v34 = vsel %vm1617_vm15, %v1614_v30, %v1616_v32 }
 0xc92   :  { %v1644_v35 = vadd.f32 %v1642_v31, %v5375_v4  ;;  %v1623_v37 = vadd.f32 %v1619_v34, %v1602_v10  ;;  %v1747_v4 = vld [vmem:[#allocation4 + $0x8] sm:$0xff] }
 0xc93   :  { %v1631_v36 = vpop.permute.xlu0 %1630 }
 0xc94   :  { %3810 = vmatprep.mubr.msk.f32.mxu1 %vm468_vm0, %v1644_v35  ;;  %v1633_v38 = vpop.permute.xlu1 %1632 }
 0xc95   :  { %v1636_v39 = vsel %vm1634_vm1, %v1631_v36, %v1633_v38 }
 0xc96   :  { %v1640_v40 = vadd.f32 %v1636_v39, %v1623_v37 }
 0xc98   :  { %v1643_v43 = vmul.f32 %v1641_v29, %v1640_v40 }
 0xc9a   :  { %v1645_v44 = vadd.f32 %v1643_v43, %v5380_v6  ;;  %v3401_v6 = vld [vmem:[#allocation25] ss:$0 sm:$0xff] }
 0xc9c   :  { %3811 = vmatmul.mubr.msk.f32.vlgmr.msra.gmra.mrb[14].mxu1 %vm468_vm0, %v1645_v44 }
 0xc9d   :  { %4158 = vmatpush3.bf16.msra.mxu1 %v4155_v20  ;;  %3821 = vmatprep.mubr.msk.f32.mxu1 %vm1617_vm15, %v1746_v46 }
 0xc9e   :  { %4160 = vmatprep.subr.bf16.mxu1 %v4159_v45 }
 0xca1   :  { %4162 = vmatpush3.bf16.msra.mxu1 %v4159_v45 }
 0xca2   :  { %3860 = vmatprep.subr.mxu1 %v2139_v15 }
 0xca4   :  { %3822 = vmatmul.mubr.msk.f32.vlgmr.msra.gmra.mrb[14].mxu1 %vm1617_vm15, %v1747_v4 }
 0xca5   :  { %3861 = vmatpush3.msra.mxu1 %v2139_v15 }
 0xd77   :  { %v3823_v48 = vpop.f32.mrb[14].mxu1 }
 0xd78   :  { %v4251_v49 = vadd.f32 %v3823_v48, %v3401_v6  ;;  %v1824_v16 = vpop.f32.mrb[15].mxu1 }
 0xd79   :  { %v4252_v33 = vadd.f32 %v3401_v6, %v1824_v16 }
 0xd7a   :  { %vm1836_vm0 = vcmp.ge.f32.partialorder %v4251_v49, 0.0  ;;  %v1838_v50 = vmul.f32 %v4251_v49, %v5364_v9 }
 0xd7b   :  { %vm1835_vm3 = vcmp.ge.f32.partialorder %v4252_v33, 0.0  ;;  %v1837_v18 = vmul.f32 %v4252_v33, %v5364_v9 }
 0xd7c   :  { %v5532_v53 = vsel %vm1836_vm0, %v4251_v49, %v1838_v50 }
 0xd7d   :  { %v5534_v54 = vsel %vm1835_vm3, %v4252_v33, %v1837_v18 }
 0xd7e   :  { %v4163_v55 = vpack.c.bf16 %v5532_v53, %v5534_v54 }
 0xd80   :  { %4164 = vmatprep.subr.bf16.mxu0 %v4163_v55 }
 0xd81   :  { %4166 = vmatpush3.bf16.msra.mxu0 %v4163_v55 }
 0xd82   :  { %4168 = vmatprep.subr.bf16.mxu0 %v4167_v56 }
 0xd84   :  { %3829 = vmatmul.mubr.msk.f32.vlgmr.msra.gmra.mrb[10].mxu0 %vm1849_vm2, %v5541_v59 }
 0xd85   :  { %3831 = vmatprep.mubr.msk.f32.mxu0 %vm1849_vm2, %v5544_v60  ;;  %4170 = vmatpush3.bf16.msra.mxu0 %v4167_v56 }
 0xd86   :  { %4172 = vmatprep.subr.bf16.mxu0 %v4171_v61 }
 0xd88   :  { %3832 = vmatmul.mubr.msk.f32.gmra.mrb[12].mxu0 %vm1849_vm2, %v5551_v0 }
 0xd89   :  { %3834 = vmatprep.mubr.msk.f32.mxu0 %vm1849_vm2, %v5554_v1  ;;  %4174 = vmatpush3.bf16.msra.mxu0 %v4171_v61 }
 0xd8c   :  { %3835 = vmatmul.mubr.msk.f32.gmra.mrb[14].mxu0 %vm1849_vm2, %v5561_v2 }
 0xd8d   :  { %3837 = vmatprep.mubr.msk.f32.mxu0 %vm1849_vm2, %v5564_v62 }
 0xd90   :  { %3838 = vmatmul.mubr.msk.f32.gmra.mrb[16].mxu0 %vm1849_vm2, %v5571_v3 }
 0xe57   :  { %v3830_v63 = vpop.f32.mrb[10].mxu0 }
 0xe58   :  { %v1940_v5 = vpop.f32.mrb[11].mxu0 }
 0xe59   :  { %3848 = vmatprep.mubr.msk.f32.mxu0 %vm1617_vm15, %v1940_v5 }
 0xe5a   :  { %3849 = vmatmul.mubr.msk.f32.vlgmr.msra.gmra.mrb[18].mxu0 %vm1617_vm15, %v3830_v63 }
 0xe5b   :  { %v3833_v7 = vpop.f32.mrb[12].mxu0 }
 0xe5c   :  { %v1950_v8 = vpop.f32.mrb[13].mxu0 }
 0xe5d   :  { %3851 = vmatprep.mubr.msk.f32.mxu0 %vm1617_vm15, %v1950_v8 }
 0xe5e   :  { %3852 = vmatmul.mubr.msk.f32.gmra.mrb[20].mxu0 %vm1617_vm15, %v3833_v7 }
 0xe5f   :  { %v3836_v10 = vpop.f32.mrb[14].mxu0 }
 0xe60   :  { %v1960_v11 = vpop.f32.mrb[15].mxu0 }
 0xe61   :  { %3854 = vmatprep.mubr.msk.f32.mxu0 %vm1617_vm15, %v1960_v11 }
 0xe62   :  { %3855 = vmatmul.mubr.msk.f32.gmra.mrb[22].mxu0 %vm1617_vm15, %v3836_v10 }
 0xe63   :  { %v3839_v12 = vpop.f32.mrb[16].mxu0 }
 0xe64   :  { %v1970_v13 = vpop.f32.mrb[17].mxu0 }
 0xe65   :  { %3857 = vmatprep.mubr.msk.f32.mxu0 %vm1617_vm15, %v1970_v13 }
 0xe66   :  { %3858 = vmatmul.mubr.msk.f32.gmra.mrb[24].mxu0 %vm1617_vm15, %v3839_v12 }
 0xe67   :  { %3876 = vmatprep.mubr.msk.f32.mxu0 %vm1617_vm15, %v2286_v57 }
 0xf2d   :  { %v3850_v17 = vpop.f32.mrb[18].mxu0 }
 0xf2e   :  { %v2086_v19 = vadd.f32 %v3850_v17, %v3414_v14  ;;  %v2080_v20 = vpop.f32.mrb[19].mxu0 }
 0xf2f   :  { %v2081_v21 = vadd.f32 %v3414_v14, %v2080_v20 }
 0xf31   :  { %v3853_v22 = vpop.f32.mrb[20].mxu0 }
 0xf32   :  { %v2096_v23 = vadd.f32 %v3853_v22, %v3414_v14  ;;  %v2090_v24 = vpop.f32.mrb[21].mxu0 }
 0xf33   :  { %v2091_v25 = vadd.f32 %v3414_v14, %v2090_v24 }
 0xf35   :  { %v3856_v26 = vpop.f32.mrb[22].mxu0 }
 0xf36   :  { %v2106_v27 = vadd.f32 %v3856_v26, %v3414_v14  ;;  %v2100_v28 = vpop.f32.mrb[23].mxu0 }
 0xf37   :  { %v2101_v29 = vadd.f32 %v3414_v14, %v2100_v28 }
 0xf38   :  { %2125 = vrot.lane.b32.xlu1 %v2106_v27, %s4967_s9 }
 0xf39   :  { %v3859_v30 = vpop.f32.mrb[24].mxu0  ;;  %2123 = vrot.lane.b32.xlu0 %v2101_v29, %s4967_s9 }
 0xf3a   :  { %v2116_v31 = vadd.f32 %v3859_v30, %v3414_v14  ;;  %v2110_v32 = vpop.f32.mrb[25].mxu0 }
 0xf3b   :  { %v2111_v34 = vadd.f32 %v3414_v14, %v2110_v32  ;;  %v2462_v32 = vld [vmem:[#allocation28] sm:$0xff] }
 0xf3c   :  { %2129 = vrot.lane.b32.xlu1 %v2116_v31, %s4967_s9 }
 0xf3d   :  { %2127 = vrot.lane.b32.xlu0 %v2111_v34, %s4967_s9  ;;  %v2463_v34 = vld [vmem:[#allocation28 + $0x8] sm:$0xff] }
 0xfaa   :  { %v2126_v35 = vpop.permute.xlu1 %2125 }
 0xfab   :  { %v2124_v36 = vpop.permute.xlu0 %2123  ;;  %v2136_v38 = vmul.f32 %v2126_v35, %v2086_v19 }
 0xfac   :  { %v2135_v37 = vmul.f32 %v2124_v36, %v2081_v21  ;;  %v4187_v36 = vpack.c.bf16 %v2463_v34, %v2462_v32 }
 0xfae   :  { %v2130_v39 = vpop.permute.xlu1 %2129  ;;  %3862 = vmatprep.mubr.msk.f32.mxu1 %vm2140_vm4, %v2135_v37  ;;  %v2464_v37 = vld [vmem:[#allocation28 + $0x10] sm:$0xff] }
 0xfaf   :  { %v2128_v40 = vpop.permute.xlu0 %2127  ;;  %3863 = vmatmul.mubr.msk.f32.vlgmr.msra.gmra.mrb[16].mxu1 %vm2140_vm4, %v2136_v38  ;;  %v2138_v42 = vmul.f32 %v2130_v39, %v2096_v23  ;;  %v2465_v38 = vld [vmem:[#allocation28 + $0x18] sm:$0xff] }
 0xfb0   :  { %v2137_v41 = vmul.f32 %v2128_v40, %v2091_v25  ;;  %v5604_v39 = vld [vmem:[#allocation7 + $0x8] sm:$0xff]  ;;  %v4191_v40 = vpack.c.bf16 %v2465_v38, %v2464_v37 }
 0xfb2   :  { %3865 = vmatprep.mubr.msk.f32.mxu1 %vm2140_vm4, %v2137_v41 }
 0xfb3   :  { %3866 = vmatmul.mubr.msk.f32.gmra.mrb[18].mxu1 %vm2140_vm4, %v2138_v42 }
 0xfb4   :  { %3883 = vmatprep.mubr.msk.f32.mxu1 %vm1849_vm2, %v5554_v1 }
0x1082   :  { %v3864_v43 = vpop.f32.mrb[16].mxu1 }
0x1083   :  { %vm2239_vm5 = vcmp.ge.f32.partialorder %v3864_v43, 0.0  ;;  %v2243_v44 = vmul.f32 0.01, %v3864_v43  ;;  %v2219_v45 = vpop.f32.mrb[17].mxu1 }
0x1084   :  { %vm2238_vm7 = vcmp.ge.f32.partialorder %v2219_v45, 0.0  ;;  %v2242_v46 = vmul.f32 0.01, %v2219_v45 }
0x1085   :  { %v2247_v4 = vsel %vm2239_vm5, %v3864_v43, %v2243_v44  ;;  %v3433_v44 = vld [vmem:[#allocation30] ss:$0 sm:$0xff] }
0x1086   :  { %v3867_v6 = vpop.f32.mrb[18].mxu1  ;;  %v2254_v48 = vsel %vm2250_vm6, %v2247_v4, 0.0  ;;  %v2246_v49 = vsel %vm2238_vm7, %v2219_v45, %v2242_v46 }
0x1087   :  { %2255 = vadd.xlane.f32.xlu1 %v2254_v48  ;;  %v2229_v16 = vpop.f32.mrb[19].mxu1  ;;  %v2251_v33 = vsel %vm2250_vm6, %v2246_v49, 0.0  ;;  %v2245_v50 = vmul.f32 0.01, %v3867_v6  ;;  %vm2241_vm9 = vcmp.ge.f32.partialorder %v3867_v6, 0.0 }
0x1088   :  { %vm2240_vm8 = vcmp.ge.f32.partialorder %v2229_v16, 0.0  ;;  %v2244_v18 = vmul.f32 0.01, %v2229_v16  ;;  %2252 = vadd.xlane.f32.xlu0 %v2251_v33 }
0x1089   :  { %v2249_v55 = vsel %vm2241_vm9, %v3867_v6, %v2245_v50 }
0x108a   :  { %v2248_v51 = vsel %vm2240_vm8, %v2229_v16, %v2244_v18  ;;  %v2260_v56 = vsel %vm2250_vm6, %v2249_v55, 0.0 }
0x108b   :  { %v2257_v52 = vsel %vm2250_vm6, %v2248_v51, 0.0 }
0x108c   :  { %2258 = vadd.xlane.f32.xlu0 %v2257_v52 }
0x1090   :  { %2261 = vadd.xlane.f32.xlu0 %v2260_v56 }
0x1114   :  { %v2256_v1 = vpop.xlane.xlu1 %2255 }
0x1115   :  { %v2253_v58 = vpop.xlane.xlu0 %2252 }
0x1116   :  { %v2263_v5 = vmax.f32 %v2253_v58, %v2256_v1 }
0x1119   :  { %v2259_v61 = vpop.xlane.xlu0 %2258 }
0x111d   :  { %v2262_v63 = vpop.xlane.xlu0 %2261 }
0x111e   :  { %v2264_v7 = vmax.f32 %v2259_v61, %v2262_v63 }
0x1120   :  { %v2265_v8 = vmax.f32 %v2263_v5, %v2264_v7  ;;  %v2738_v5 = vld [vmem:[%s5731_s15] sm:$0xff]  ;;  %v2739_v7 = vld [vmem:[%s5731_s15 + $0x8] sm:$0xff] }
0x1122   :  { %v2266_v10 = vrot.slane %v2265_v8, 4 }
0x1124   :  { %v2267_v11 = vmax.f32 %v2265_v8, %v2266_v10 }
0x1126   :  { %v2268_v12 = vrot.slane %v2267_v11, 2 }
0x1128   :  { %v2269_v13 = vmax.f32 %v2267_v11, %v2268_v12 }
0x112a   :  { %v2270_v14 = vrot.slane %v2269_v13, 1 }
0x112c   :  { %v2271_v15 = vmax.f32 %v2269_v13, %v2270_v14 }
0x112e   :  { %4263 = vpush %v2271_v15 }
0x115f   :  { %s4264_s0 = spop %4263 }
0x1160   :  { %v2273_v17 = vstv %s4264_s0 }
0x1161   :  { %v2274_v19 = vsub.f32 %v2253_v58, %v2273_v17  ;;  %v2275_v20 = vsub.f32 %v2256_v1, %v2273_v17  ;;  %v2276_v21 = vsub.f32 %v2259_v61, %v2273_v17  ;;  %v2277_v22 = vsub.f32 %v2262_v63, %v2273_v17 }
0x1163   :  { %v2278_v23 = vmul.f32 1.442695, %v2274_v19  ;;  %v2280_v24 = vmul.f32 1.442695, %v2275_v20  ;;  %v2282_v25 = vmul.f32 1.442695, %v2276_v21 }
0x1164   :  { %v2284_v26 = vmul.f32 1.442695, %v2277_v22  ;;  %v2757_v21 = vld [vmem:[#allocation31] sm:$0xff]  ;;  %v2758_v22 = vld [vmem:[#allocation31 + $0x8] sm:$0xff] }
0x1165   :  { %4368 = vpow2.f32 %v2278_v23  ;;  %v4207_v23 = vpack.c.bf16 %v2758_v22, %v2757_v21 }
0x1166   :  { %4370 = vpow2.f32 %v2280_v24  ;;  %v2759_v24 = vld [vmem:[#allocation31 + $0x10] sm:$0xff] }
0x1167   :  { %4372 = vpow2.f32 %v2282_v25  ;;  %v2760_v25 = vld [vmem:[#allocation31 + $0x18] sm:$0xff] }
0x1168   :  { %4374 = vpow2.f32 %v2284_v26  ;;  %v4211_v26 = vpack.c.bf16 %v2760_v25, %v2759_v24  ;;  %v3216_v24 = vld [vmem:[%s5152_s20] sm:$0xff]  ;;  %v3217_v25 = vld [vmem:[%s5152_s20 + $0x8] sm:$0xff] }
0x116f   :  { %v5595_v27 = vpop.eup %4368 }
0x1170   :  { %v4371_v28 = vpop.eup %4370 }
0x1171   :  { %v5597_v29 = vpop.eup %4372  ;;  %v4175_v30 = vpack.c.bf16 %v4371_v28, %v5595_v27 }
0x1172   :  { %v5600_v31 = vpop.eup %4374 }
0x1173   :  { %4176 = vmatprep.subr.bf16.mxu0 %v4175_v30  ;;  %v4179_v35 = vpack.c.bf16 %v5600_v31, %v5597_v29 }
0x1174   :  { %4178 = vmatpush3.bf16.msra.mxu0 %v4175_v30 }
0x1175   :  { %4180 = vmatprep.subr.bf16.mxu0 %v4179_v35 }
0x1178   :  { %4182 = vmatpush3.bf16.msra.mxu0 %v4179_v35 }
0x1179   :  { %4188 = vmatprep.subr.bf16.mxu0 %v4187_v36 }
0x117b   :  { %3877 = vmatmul.mubr.msk.f32.vlgmr.msra.gmra.mrb[26].mxu0 %vm1617_vm15, %v5604_v39 }
0x117c   :  { %4190 = vmatpush3.bf16.msra.mxu0 %v4187_v36  ;;  %3897 = vmatprep.mubr.msk.f32.mxu0 %vm1617_vm15, %v5534_v54  ;;  %v2752_v36 = vstv %s5360_s29 }
0x117d   :  { %4192 = vmatprep.subr.bf16.mxu0 %v4191_v40 }
0x1180   :  { %4194 = vmatpush3.bf16.msra.mxu0 %v4191_v40 }
0x1183   :  { %3898 = vmatmul.mubr.msk.f32.vlgmr.msra.gmra.mrb[28].mxu0 %vm1617_vm15, %v5532_v53 }
0x1184   :  { %3918 = vmatprep.mubr.msk.f32.mxu0 %vm1617_vm15, %v2286_v57 }
0x124e   :  { %v3878_v41 = vpop.f32.mrb[26].mxu0 }
0x124f   :  { %v2360_v42 = vpop.f32.mrb[27].mxu0 }
0x1250   :  { %v4183_v43 = vpack.c.bf16 %v3878_v41, %v2360_v42  ;;  %v2937_v42 = vld [vmem:[#allocation6] sm:$0xff] }
0x1252   :  { %4184 = vmatprep.subr.bf16.mxu1 %v4183_v43 }
0x1253   :  { %4186 = vmatpush3.bf16.msra.mxu1 %v4183_v43  ;;  %v2938_v43 = vld [vmem:[#allocation6 + $0x8] sm:$0xff] }
0x1256   :  { %3884 = vmatmul.mubr.msk.f32.vlgmr.msra.gmra.mrb[20].mxu1 %vm1849_vm2, %v5561_v2  ;;  %v3899_v45 = vpop.f32.mrb[28].mxu0  ;;  %v4968_v2 = vmov 0  }
0x1257   :  { %v2551_v46 = vadd.f32 %v3899_v45, %v3433_v44  ;;  %v2545_v4 = vpop.f32.mrb[29].mxu0  ;;  %3886 = vmatprep.mubr.msk.f32.mxu1 %vm1849_vm2, %v5564_v62  ;;  %4343 = vset.pattern.permute.xlu0 %v4968_v2  ;;  %v2851_v45 = vld [vmem:[%s5732_s27 + $0x8] sm:$0xff] }
0x1258   :  { %v2546_v6 = vadd.f32 %v3433_v44, %v2545_v4  ;;  %4342 = vset.pattern.permute.xlu1 %v4968_v2  ;;  %v2850_v44 = vld [vmem:[%s5732_s27] sm:$0xff] }
0x1259   :  { %v3030_v4 = vld [vmem:[%s5733_s6] sm:$0xff] }
0x125a   :  { %v4195_v48 = vpack.c.bf16 %v2551_v46, %v2546_v6  ;;  %3887 = vmatmul.mubr.msk.f32.gmra.mrb[22].mxu1 %vm1849_vm2, %v5571_v3  ;;  %v2853_v46 = vld [vmem:[%s5732_s27 + $0x18] sm:$0xff] }
0x125b   :  { %3904 = vmatprep.mubr.msk.f32.mxu1 %vm1849_vm2, %v5524_v47 }
0x125c   :  { %4196 = vmatprep.subr.bf16.mxu1 %v4195_v48 }
0x125d   :  { %4198 = vmatpush3.bf16.msra.mxu1 %v4195_v48  ;;  %v3031_v48 = vld [vmem:[%s5733_s6 + $0x8] sm:$0xff] }
0x125e   :  { %4208 = vmatprep.subr.bf16.mxu1 %v4207_v23  ;;  %v4227_v2 = vpack.c.bf16 %v3031_v48, %v3030_v4 }
0x1260   :  { %3905 = vmatmul.mubr.msk.f32.vlgmr.msra.gmra.mrb[24].mxu1 %vm1849_vm2, %v5541_v59 }
0x1261   :  { %3907 = vmatprep.mubr.msk.f32.mxu1 %vm1849_vm2, %v5544_v60  ;;  %4210 = vmatpush3.bf16.msra.mxu1 %v4207_v23 }
0x1262   :  { %4212 = vmatprep.subr.bf16.mxu1 %v4211_v26 }
0x1264   :  { %3908 = vmatmul.mubr.msk.f32.gmra.mrb[26].mxu1 %vm1849_vm2, %v5551_v0 }
0x1265   :  { %4214 = vmatpush3.bf16.msra.mxu1 %v4211_v26  ;;  %v4243_v26 = vpack.c.bf16 %v3217_v25, %v3216_v24 }
0x1329   :  { %v3885_v62 = vpop.f32.mrb[20].mxu1 }
0x132a   :  { %v2441_v49 = vadd.f32 1e-16, %v3885_v62  ;;  %v2435_v3 = vpop.f32.mrb[21].mxu1  ;;  %v3032_v62 = vld [vmem:[%s5733_s6 + $0x10] sm:$0xff] }
0x132b   :  { %v2436_v16 = vadd.f32 1e-16, %v2435_v3 }
0x132c   :  { %4376 = vrcp.f32 %v2441_v49  ;;  %v3033_v49 = vld [vmem:[%s5733_s6 + $0x18] sm:$0xff] }
0x132d   :  { %4378 = vrcp.f32 %v2436_v16  ;;  %v3888_v47 = vpop.f32.mrb[22].mxu1  ;;  %v4231_v3 = vpack.c.bf16 %v3033_v49, %v3032_v62 }
0x132e   :  { %v2445_v33 = vpop.f32.mrb[23].mxu1  ;;  %v2451_v50 = vadd.f32 1e-16, %v3888_v47 }
0x132f   :  { %v2446_v18 = vadd.f32 1e-16, %v2445_v33 }
0x1331   :  { %4380 = vrcp.f32 %v2446_v18 }
0x1332   :  { %4382 = vrcp.f32 %v2451_v50 }
0x1333   :  { %v3906_v52 = vpop.f32.mrb[24].mxu1 }
0x1334   :  { %v2620_v55 = vpop.f32.mrb[25].mxu1 }
0x1336   :  { %v4377_v59 = vpop.eup %4376 }
0x1337   :  { %v4379_v60 = vpop.eup %4378  ;;  %v2457_v51 = vmul.f32 %v4377_v59, %v4371_v28  ;;  %v3909_v58 = vpop.f32.mrb[26].mxu1  ;;  %v2940_v28 = vld [vmem:[#allocation33 + $0x8] sm:$0xff] }
0x1338   :  { %v2455_v0 = vmul.f32 %v4379_v60, %v5595_v27  ;;  %v2630_v1 = vpop.f32.mrb[27].mxu1  ;;  %v2939_v27 = vld [vmem:[#allocation33] sm:$0xff] }
0x1339   :  { %2646 = vperm.xlu0 %4343, %v2457_v51  }
0x133a   :  { %2641 = vperm.xlu1 %4342, %v2455_v0  }
0x133b   :  { %v4381_v56 = vpop.eup %4380 }
0x133c   :  { %v2459_v57 = vmul.f32 %v4381_v56, %v5597_v29  ;;  %v4383_v61 = vpop.eup %4382  ;;  %v4223_v29 = vpack.c.bf16 %v2940_v28, %v2939_v27  ;;  %v3218_v27 = vld [vmem:[%s5152_s20 + $0x10] sm:$0xff]  ;;  %v3219_v28 = vld [vmem:[%s5152_s20 + $0x18] sm:$0xff] }
0x133d   :  { %v2461_v63 = vmul.f32 %v4383_v61, %v5600_v31 }
0x133e   :  { %2651 = vperm.xlu1 %4342, %v2459_v57   ;;  %4224 = vmatprep.subr.bf16.mxu1 %v4223_v29 }
0x1342   :  { %2656 = vperm.xlu1 %4342, %v2461_v63   ;;  %v3123_v63 = vld [vmem:[#allocation34] sm:$0xff] }
0x1346   :  { %2742 = vperm.xlu1 %4342, %v2738_v5   ;;  %v3124_v5 = vld [vmem:[#allocation34 + $0x8] sm:$0xff] }
0x134a   :  { %2747 = vperm.xlu1 %4342, %v2739_v7   ;;  %v4235_v7 = vpack.c.bf16 %v3124_v5, %v3123_v63 }
0x13b8   :  { %v2647_v8 = vpop.permute.xlu0 %2646 }
0x13b9   :  { %v2660_v10 = vmul.f32 %v3906_v52, %v2647_v8  ;;  %v2642_v11 = vpop.permute.xlu1 %2641  ;;  %v3125_v8 = vld [vmem:[#allocation34 + $0x10] sm:$0xff] }
0x13ba   :  { %v2659_v12 = vmul.f32 %v2642_v11, %v2620_v55 }
0x13bc   :  { %v4199_v13 = vpack.c.bf16 %v2660_v10, %v2659_v12  ;;  %v3126_v10 = vld [vmem:[#allocation34 + $0x18] sm:$0xff] }
0x13bd   :  { %v2652_v14 = vpop.permute.xlu1 %2651  ;;  %v4239_v11 = vpack.c.bf16 %v3126_v10, %v3125_v8 }
0x13be   :  { %4200 = vmatprep.subr.bf16.mxu0 %v4199_v13  ;;  %v2661_v17 = vmul.f32 %v2652_v14, %v2630_v1 }
0x13bf   :  { %4202 = vmatpush3.bf16.msra.mxu0 %v4199_v13 }
0x13c1   :  { %v2657_v15 = vpop.permute.xlu1 %2656 }
0x13c2   :  { %v2662_v19 = vmul.f32 %v3909_v58, %v2657_v15 }
0x13c4   :  { %v4203_v20 = vpack.c.bf16 %v2662_v19, %v2661_v17 }
0x13c5   :  { %v2743_v30 = vpop.permute.xlu1 %2742 }
0x13c6   :  { %4204 = vmatprep.subr.bf16.mxu0 %v4203_v20 }
0x13c7   :  { %4206 = vmatpush3.bf16.msra.mxu0 %v4203_v20 }
0x13c9   :  { %v2748_v31 = vpop.permute.xlu1 %2747 }
0x13ca   :  { %3919 = vmatmul.mubr.msk.f32.vlgmr.msra.gmra.mrb[30].mxu0 %vm1617_vm15, %v5604_v39 }
0x149d   :  { %v3920_v32 = vpop.f32.mrb[30].mxu0 }
0x149e   :  { %v2751_v34 = vmul.f32 %v3920_v32, %v2748_v31  ;;  %v2729_v35 = vpop.f32.mrb[31].mxu0 }
0x149f   :  { %v2750_v37 = vmul.f32 %v2743_v30, %v2729_v35 }
0x14a0   :  { %v2754_v38 = vmul.f32 %v2752_v36, %v2751_v34 }
0x14a1   :  { %v2753_v39 = vmul.f32 %v2752_v36, %v2750_v37 }
0x14a2   :  { %v2756_v41 = vadd.f32 %v2754_v38, %v5532_v53  ;;  %v2852_v53 = vld [vmem:[%s5732_s27 + $0x10] sm:$0xff] }
0x14a3   :  { %v2755_v40 = vadd.f32 %v2753_v39, %v5534_v54  ;;  %v4215_v54 = vpack.c.bf16 %v2851_v45, %v2850_v44  ;;  %v4219_v6 = vpack.c.bf16 %v2853_v46, %v2852_v53 }
0x14a5   :  { %3929 = vmatprep.mubr.msk.f32.mxu1 %vm1617_vm15, %v2755_v40  ;;  %4216 = vmatprep.subr.bf16.mxu0 %v4215_v54 }
0x14a6   :  { %3930 = vmatmul.mubr.msk.f32.vlgmr.msra.gmra.mrb[28].mxu1 %vm1617_vm15, %v2756_v41  ;;  %4218 = vmatpush3.bf16.msra.mxu0 %v4215_v54  ;;  %v3452_v41 = vld [vmem:[%s5157_s24] ss:$0 sm:$0xff] }
0x14a7   :  { %4226 = vmatpush3.bf16.msra.mxu1 %v4223_v29  ;;  %3947 = vmatprep.mubr.msk.f32.mxu1 %vm1849_vm2, %v2937_v42  ;;  %v4247_v29 = vpack.c.bf16 %v3219_v28, %v3218_v27  ;;  %v3308_v42 = vstv %s5362_s26 }
0x14a8   :  { %4220 = vmatprep.subr.bf16.mxu0 %v4219_v6  ;;  %4228 = vmatprep.subr.bf16.mxu1 %v4227_v2 }
0x14aa   :  { %3948 = vmatmul.mubr.msk.f32.vlgmr.msra.gmra.mrb[30].mxu1 %vm1849_vm2, %v2938_v43  ;;  %4222 = vmatpush3.bf16.msra.mxu0 %v4219_v6 }
0x14ab   :  { %4230 = vmatpush3.bf16.msra.mxu1 %v4227_v2  ;;  %4236 = vmatprep.subr.bf16.mxu0 %v4235_v7 }
0x14ac   :  { %4232 = vmatprep.subr.bf16.mxu1 %v4231_v3 }
0x14af   :  { %4234 = vmatpush3.bf16.msra.mxu1 %v4231_v3 }
0x14b0   :  { %4244 = vmatprep.subr.bf16.mxu1 %v4243_v26 }
0x1579   :  { %v3931_v16 = vpop.f32.mrb[28].mxu1 }
0x157a   :  { %v2843_v47 = vmul.f32 0.999995, %v3931_v16  ;;  %v2833_v33 = vpop.f32.mrb[29].mxu1 }
0x157b   :  { %v2842_v50 = vmul.f32 0.999995, %v2833_v33 }
0x157c   :  { %v2847_v18 = vmul.f32 %v2843_v47, %v5364_v9  ;;  %vm2845_vm10 = vcmp.ge.f32.partialorder %v2843_v47, 0.0 }
0x157d   :  { %vm2844_vm11 = vcmp.ge.f32.partialorder %v2842_v50, 0.0  ;;  %v2846_v59 = vmul.f32 %v2842_v50, %v5364_v9  ;;  %v3949_v60 = vpop.f32.mrb[30].mxu1 }
0x157e   :  { %v3023_v51 = vmul.f32 0.999995, %v3949_v60  ;;  %v3013_v0 = vpop.f32.mrb[31].mxu1  ;;  %v2849_v56 = vsel %vm2845_vm10, %v2843_v47, %v2847_v18 }
0x157f   :  { %v3022_v52 = vmul.f32 0.999995, %v3013_v0  ;;  %v2848_v55 = vsel %vm2844_vm11, %v2842_v50, %v2846_v59 }
0x1580   :  { %v3027_v57 = vmul.f32 %v3023_v51, %v5364_v9  ;;  %3940 = vmatprep.mubr.msk.f32.mxu0 %vm1617_vm15, %v2848_v55  ;;  %vm3025_vm12 = vcmp.ge.f32.partialorder %v3023_v51, 0.0 }
0x1581   :  { %vm3024_vm13 = vcmp.ge.f32.partialorder %v3022_v52, 0.0  ;;  %v3026_v58 = vmul.f32 %v3022_v52, %v5364_v9  ;;  %3941 = vmatmul.mubr.msk.f32.vlgmr.msra.gmra.mrb[32].mxu0 %vm1617_vm15, %v2849_v56 }
0x1582   :  { %v3029_v1 = vsel %vm3025_vm12, %v3023_v51, %v3027_v57  ;;  %4238 = vmatpush3.bf16.msra.mxu0 %v4235_v7 }
0x1583   :  { %v3028_v61 = vsel %vm3024_vm13, %v3022_v52, %v3026_v58  ;;  %4240 = vmatprep.subr.bf16.mxu0 %v4239_v11 }
0x1584   :  { %3958 = vmatprep.mubr.msk.f32.mxu1 %vm1617_vm15, %v3028_v61 }
0x1585   :  { %3959 = vmatmul.mubr.msk.f32.vlgmr.msra.gmra.mrb[32].mxu1 %vm1617_vm15, %v3029_v1 }
0x1586   :  { %4242 = vmatpush3.bf16.msra.mxu0 %v4239_v11  ;;  %4246 = vmatpush3.bf16.msra.mxu1 %v4243_v26 }
0x1587   :  { %4248 = vmatprep.subr.bf16.mxu1 %v4247_v29 }
0x158a   :  { %4250 = vmatpush3.bf16.msra.mxu1 %v4247_v29 }
0x1654   :  { %v3942_v12 = vpop.f32.mrb[32].mxu0 }
0x1655   :  { %v2926_v13 = vpop.f32.mrb[33].mxu0  ;;  %v2936_v39 = vmul.f32 0.999995, %v3942_v12 }
0x1656   :  { %v2935_v40 = vmul.f32 0.999995, %v2926_v13 }
0x1657   :  { %v3310_v44 = vmul.f32 %v3308_v42, %v2936_v39 }
0x1658   :  { %v3960_v14 = vpop.f32.mrb[32].mxu1  ;;  %v3309_v53 = vmul.f32 %v3308_v42, %v2935_v40 }
0x1659   :  { %v3116_v15 = vmul.f32 0.999995, %v3960_v14  ;;  %v3106_v17 = vpop.f32.mrb[33].mxu1 }
0x165a   :  { %v3115_v19 = vmul.f32 0.999995, %v3106_v17 }
0x165b   :  { %v3120_v20 = vmul.f32 %v3116_v15, %v5364_v9  ;;  %vm3118_vm14 = vcmp.ge.f32.partialorder %v3116_v15, 0.0 }
0x165c   :  { %vm3117_vm1 = vcmp.ge.f32.partialorder %v3115_v19, 0.0  ;;  %v3119_v21 = vmul.f32 %v3115_v19, %v5364_v9 }
0x165d   :  { %v3122_v23 = vsel %vm3118_vm14, %v3116_v15, %v3120_v20 }
0x165e   :  { %v3121_v22 = vsel %vm3117_vm1, %v3115_v19, %v3119_v21 }
0x165f   :  { %3969 = vmatprep.mubr.msk.f32.mxu0 %vm1617_vm15, %v3121_v22 }
0x1660   :  { %3970 = vmatmul.mubr.msk.f32.vlgmr.msra.gmra.mrb[34].mxu0 %vm1617_vm15, %v3122_v23 }
0x1733   :  { %v3971_v30 = vpop.f32.mrb[34].mxu0 }
0x1734   :  { %v3209_v31 = vmul.f32 0.999995, %v3971_v30  ;;  %v3199_v32 = vpop.f32.mrb[35].mxu0 }
0x1735   :  { %v3208_v34 = vmul.f32 0.999995, %v3199_v32 }
0x1736   :  { %v3213_v35 = vmul.f32 %v3209_v31, %v5364_v9  ;;  %vm3211_vm2 = vcmp.ge.f32.partialorder %v3209_v31, 0.0 }
0x1737   :  { %vm3210_vm0 = vcmp.ge.f32.partialorder %v3208_v34, 0.0  ;;  %v3212_v36 = vmul.f32 %v3208_v34, %v5364_v9 }
0x1738   :  { %v3215_v38 = vsel %vm3211_vm2, %v3209_v31, %v3213_v35 }
0x1739   :  { %v3214_v37 = vsel %vm3210_vm0, %v3208_v34, %v3212_v36 }
0x173a   :  { %3980 = vmatprep.mubr.msk.f32.mxu1 %vm1617_vm15, %v3214_v37 }
0x173b   :  { %3981 = vmatmul.mubr.msk.f32.vlgmr.msra.gmra.mrb[34].mxu1 %vm1617_vm15, %v3215_v38 }
0x180e   :  { %v3982_v43 = vpop.f32.mrb[34].mxu1 }
0x180f   :  { %v3305_v45 = vadd.f32 %v3982_v43, %v3452_v41  ;;  %v3299_v54 = vpop.f32.mrb[35].mxu1 }
0x1810   :  { %v3300_v46 = vadd.f32 %v3452_v41, %v3299_v54 }
0x1811   :  { %v3312_v4 = vadd.f32 %v3310_v44, %v3305_v45 }
0x1812   :  { %v3311_v9 = vadd.f32 %v3309_v53, %v3300_v46 }
0x1813   :  { %3314 = vst.msk [vmem:[%s5162_s5 + $0x8] sm:$0xff] %vm2140_vm4, %v3312_v4 }
0x1814   :  { %3313 = vst.msk [vmem:[%s5162_s5] sm:$0xff] %vm2140_vm4, %v3311_v9 }
0x1815   :  { %3319 = vsyncpa [#allocation3], 1 }
0x1816   :  { %3320 = vsyncpa [#allocation5], 1 }
0x1817   :  { %3321 = vsyncpa [#allocation8], 1 }
0x1818   :  { %3322 = vsyncpa [#allocation11], 1 }
0x1819   :  { %3323 = vsyncpa [#allocation14], 1 }
0x181a   :  { %3324 = vsyncpa [#allocation17], 1 }
0x181b   :  { %3325 = vsyncpa [#allocation20], 1 }
0x181c   :  { %3326 = vsyncpa [#allocation23], 1 }
0x181d   :  { %3327 = vsyncpa [#allocation26], 1 }
0x181e   :  { %3328 = vsyncpa [#allocation29], 1 }
0x181f   :  { %3329 = vsyncpa [#allocation32], 1 }
0x1820   :  { %3330 = vsyncpa [#allocation35], 1 }

</bundles_post_ra>
